<compile_context>
chip_gen: v6e
topology: v6e:2x2x1
jax: 0.10.0
libtpu: 0.0.40
codegen_flags: <defaults>
</compile_context>

<pallas_src>
import functools

import jax
import jax.numpy as jnp
from jax.experimental import pallas as pl
from jax.experimental.pallas import tpu as pltpu

LATENT_DIM = 2
IMG = 32  # 32x32 (FashionMNIST padded by 2)
HID = 128 * 4 * 4  # 2048


def _round_up(x, m):
    return (x + m - 1) // m * m


# ----------------------------------------------------------------------------
# Pallas kernels
# ----------------------------------------------------------------------------
def _mm_bias_act_kernel(x_ref, w_ref, b_ref, o_ref, *, act):
    """o = act(x @ w + b) for one (TILE_M, K) x (K, N) tile; f32 accumulate/epilogue."""
    y = jnp.dot(x_ref[...], w_ref[...], preferred_element_type=jnp.float32)
    y = y + b_ref[...]                      # b: (1, N) f32
    if act == "relu":
        y = jnp.maximum(y, 0.0)
    elif act == "sigmoid":
        y = jax.nn.sigmoid(y)               # stays f32 -> output strictly in [0, 1]
    o_ref[...] = y.astype(o_ref.dtype)


def _latent_kernel(h_ref, wmu_ref, bmu_ref, wlv_ref, blv_ref, eps_ref,
                   wd_ref, bd_ref, mu_ref, lv_ref, d_ref):
    """Fused: mu = h@Wmu+b, logvar = h@Wlv+b, z = mu+eps*exp(.5*lv), d = z@Wd+b."""
    h = h_ref[...]
    mu = jnp.dot(h, wmu_ref[...], preferred_element_type=jnp.float32) + bmu_ref[...]
    lv = jnp.dot(h, wlv_ref[...], preferred_element_type=jnp.float32) + blv_ref[...]
    z = mu + eps_ref[...] * jnp.exp(0.5 * lv)
    d = jnp.dot(z, wd_ref[...], preferred_element_type=jnp.float32) + bd_ref[...]
    mu_ref[...] = mu
    lv_ref[...] = lv
    d_ref[...] = d


# ----------------------------------------------------------------------------
# Pallas wrappers
# ----------------------------------------------------------------------------
def _choose_tile_m(M, K, N, budget_bytes=4 << 20):
    """Pick an M-tile: big enough to amortize per-step overhead, small enough that
    the double-buffered (bf16 input tile + f32 output tile) stays well under the
    scoped-VMEM default on every generation (v7x has only 64 MiB physical)."""
    per_row = K * 2 + N * 4            # bf16 x-row + f32 out-row
    tm = max(8, min(1024, budget_bytes // max(per_row, 1)))
    tm = (tm // 8) * 8
    tm = min(tm, _round_up(M, 8))
    return max(tm, 8)


def pallas_linear(x, w, b, act="none", out_dtype=jnp.float32):
    """act(x @ w + b) with a 1-D grid over M (rows). x:(M,K) bf16, w:(K,N) bf16."""
    M, K = x.shape
    N = w.shape[1]
    tm = _choose_tile_m(M, K, N)
    Mp = _round_up(M, tm)
    if Mp != M:
        x = jnp.pad(x, ((0, Mp - M), (0, 0)))
    grid = (Mp // tm,)

    kernel = functools.partial(_mm_bias_act_kernel, act=act)
    flops = 2 * Mp * K * N
    transcendentals = Mp * N if act == "sigmoid" else 0
    bytes_accessed = (Mp * K * x.dtype.itemsize + K * N * w.dtype.itemsize
                      + Mp * N * jnp.dtype(out_dtype).itemsize + N * 4)

    out = pl.pallas_call(
        kernel,
        out_shape=jax.ShapeDtypeStruct((Mp, N), out_dtype),
        grid_spec=pltpu.PrefetchScalarGridSpec(
            num_scalar_prefetch=0,
            grid=grid,
            in_specs=[
                pl.BlockSpec((tm, K), lambda i: (i, 0)),   # streamed row tiles
                pl.BlockSpec((K, N), lambda i: (0, 0)),    # weight resident across grid
                pl.BlockSpec((1, N), lambda i: (0, 0)),    # bias resident across grid
            ],
            out_specs=pl.BlockSpec((tm, N), lambda i: (i, 0)),
        ),
        compiler_params=pltpu.CompilerParams(
            dimension_semantics=("parallel",),             # shard row tiles across TCs
        ),
        cost_estimate=pl.CostEstimate(
            flops=flops, transcendentals=transcendentals, bytes_accessed=bytes_accessed),
    )(x, w, b.reshape(1, N).astype(jnp.float32))
    return out[:M] if Mp != M else out


def pallas_latent(h, wmu, bmu, wlv, blv, eps, wd, bd):
    """Single-launch fused latent path (all tensors are tiny -> one VMEM block)."""
    B = h.shape[0]
    vmem = pl.BlockSpec(memory_space=pltpu.MemorySpace.VMEM)
    return pl.pallas_call(
        _latent_kernel,
        out_shape=(
            jax.ShapeDtypeStruct((B, LATENT_DIM), jnp.float32),
            jax.ShapeDtypeStruct((B, LATENT_DIM), jnp.float32),
            jax.ShapeDtypeStruct((B, HID), jnp.float32),
        ),
        in_specs=[vmem] * 8,
        out_specs=(vmem, vmem, vmem),
    )(h, wmu, bmu.reshape(1, -1), wlv, blv.reshape(1, -1), eps, wd, bd.reshape(1, -1))


# ----------------------------------------------------------------------------
# Conv / ConvTranspose as NHWC im2col (JAX glue) + Pallas matmul
# ----------------------------------------------------------------------------
def _im2col_nhwc(x, k, stride, pad):
    """x: (B, H, W, C) -> patches (B*oh*ow, k*k*C), K order = (ky, kx, c)."""
    B, H, W, C = x.shape
    xp = jnp.pad(x, ((0, 0), (pad, pad), (pad, pad), (0, 0)))
    oh = (H + 2 * pad - k) // stride + 1
    ow = (W + 2 * pad - k) // stride + 1
    cols = []
    for i in range(k):
        for j in range(k):
            cols.append(xp[:, i:i + stride * oh:stride, j:j + stride * ow:stride, :])
    patches = jnp.concatenate(cols, axis=-1)          # (B, oh, ow, k*k*C)
    return patches.reshape(B * oh * ow, k * k * C), oh, ow


def conv2d_nhwc(x, w, b, stride, pad, act, out_dtype=jnp.float32):
    """PyTorch-semantics Conv2d on NHWC activations. w: (OC, IC, k, k) torch layout."""
    B = x.shape[0]
    OC, IC, k, _ = w.shape
    # NOTE: e1 has K = 9 (MXU under-utilized); kept as a matmul — the layer is
    # memory-bound anyway and lane-dense in/out.
    patches, oh, ow = _im2col_nhwc(x.astype(jnp.bfloat16), k, stride, pad)
    wm = jnp.transpose(w, (2, 3, 1, 0)).reshape(k * k * IC, OC).astype(jnp.bfloat16)
    y = pallas_linear(patches, wm, b, act, out_dtype=out_dtype)   # (B*oh*ow, OC)
    return y.reshape(B, oh, ow, OC)


def conv_transpose2d_nhwc(x, w, b, act, out_dtype=jnp.float32):
    """PyTorch ConvTranspose2d(k=3, stride=2, padding=1, output_padding=1) on NHWC,
    lowered to the sub-pixel form: 2x2 stride-1 conv -> (ry,rx,oc) channels ->
    depth-to-space. w: (IC, OC, 3, 3) torch layout, b: (OC,)."""
    B, H, W, IC = x.shape
    _, OC, k, _ = w.shape
    assert k == 3

    # Effective 2x2 kernel: y[2q+r] gets x[q+dy] * w[..., r+1-2*dy] (valid taps only).
    w_eff = jnp.zeros((2, 2, IC, 2, 2, OC), w.dtype)   # (dy, dx, ic, ry, rx, oc)
    for dy in range(2):
        for dx in range(2):
            for ry in range(2):
                for rx in range(2):
                    ky = ry + 1 - 2 * dy
                    kx = rx + 1 - 2 * dx
                    if 0 <= ky < k and 0 <= kx < k:
                        w_eff = w_eff.at[dy, dx, :, ry, rx, :].set(w[:, :, ky, kx])
    w_mat = w_eff.reshape(4 * IC, 4 * OC).astype(jnp.bfloat16)
    b_eff = jnp.tile(b, 4)                              # (ry,rx) major, oc minor

    xb = jnp.pad(x.astype(jnp.bfloat16), ((0, 0), (0, 1), (0, 1), (0, 0)))
    cols = []
    for dy in range(2):
        for dx in range(2):
            cols.append(xb[:, dy:dy + H, dx:dx + W, :])
    patches = jnp.concatenate(cols, axis=-1).reshape(B * H * W, 4 * IC)

    y = pallas_linear(patches, w_mat, b_eff, act, out_dtype=out_dtype)  # (B*H*W, 4*OC)
    y = y.reshape(B, H, W, 2, 2, OC).transpose(0, 1, 3, 2, 4, 5)
    return y.reshape(B, 2 * H, 2 * W, OC)


# ----------------------------------------------------------------------------
# Deterministic parameter init (PyTorch-like uniform, no checkpoint loading)
# ----------------------------------------------------------------------------
def _init_uniform(key, shape, fan_in):
    bound = 1.0 / jnp.sqrt(float(fan_in))
    return jax.random.uniform(key, shape, jnp.float32, -bound, bound)


def init_params(key):
    ks = jax.random.split(key, 18)
    p = {}
    # encoder convs: (OC, IC, 3, 3)
    p["e1w"] = _init_uniform(ks[0], (32, 1, 3, 3), 1 * 9)
    p["e1b"] = _init_uniform(ks[1], (32,), 1 * 9)
    p["e2w"] = _init_uniform(ks[2], (64, 32, 3, 3), 32 * 9)
    p["e2b"] = _init_uniform(ks[3], (64,), 32 * 9)
    p["e3w"] = _init_uniform(ks[4], (128, 64, 3, 3), 64 * 9)
    p["e3b"] = _init_uniform(ks[5], (128,), 64 * 9)
    # fc_mu / fc_logvar: stored as (in, out) for x @ w
    p["mu_w"] = _init_uniform(ks[6], (HID, LATENT_DIM), HID)
    p["mu_b"] = _init_uniform(ks[7], (LATENT_DIM,), HID)
    p["lv_w"] = _init_uniform(ks[8], (HID, LATENT_DIM), HID)
    p["lv_b"] = _init_uniform(ks[9], (LATENT_DIM,), HID)
    # decoder_input
    p["di_w"] = _init_uniform(ks[10], (LATENT_DIM, HID), LATENT_DIM)
    p["di_b"] = _init_uniform(ks[11], (HID,), LATENT_DIM)
    # decoder conv transposes: (IC, OC, 3, 3)
    p["d1w"] = _init_uniform(ks[12], (128, 64, 3, 3), 64 * 9)
    p["d1b"] = _init_uniform(ks[13], (64,), 64 * 9)
    p["d2w"] = _init_uniform(ks[14], (64, 32, 3, 3), 32 * 9)
    p["d2b"] = _init_uniform(ks[15], (32,), 32 * 9)
    p["d3w"] = _init_uniform(ks[16], (32, 1, 3, 3), 1 * 9)
    p["d3b"] = _init_uniform(ks[17], (1,), 1 * 9)
    return p


# ----------------------------------------------------------------------------
# VAE forward (mirrors the PyTorch module)
# ----------------------------------------------------------------------------
@jax.jit
def vae_forward(p, x, eps):
    B = x.shape[0]
    x_nhwc = jnp.transpose(x, (0, 2, 3, 1))                                # (B,32,32,1)

    # encoder (NHWC, bf16 intermediates between layers)
    h = conv2d_nhwc(x_nhwc, p["e1w"], p["e1b"], 2, 1, "relu", jnp.bfloat16)  # (B,16,16,32)
    h = conv2d_nhwc(h, p["e2w"], p["e2b"], 2, 1, "relu", jnp.bfloat16)       # (B,8,8,64)
    h = conv2d_nhwc(h, p["e3w"], p["e3b"], 2, 1, "relu", jnp.float32)        # (B,4,4,128)
    # flatten in PyTorch (C,H,W) order so fc weights keep identical semantics
    hf = jnp.transpose(h, (0, 3, 1, 2)).reshape(B, HID)                      # (B,2048)

    # fused latent path: mu, logvar, reparameterize, decoder_input
    mu, logvar, d = pallas_latent(hf, p["mu_w"], p["mu_b"], p["lv_w"], p["lv_b"],
                                  eps, p["di_w"], p["di_b"])

    # decoder (view (B,128,4,4) NCHW like PyTorch, then to NHWC)
    d = d.reshape(B, 128, 4, 4).transpose(0, 2, 3, 1)                        # (B,4,4,128)
    d = conv_transpose2d_nhwc(d, p["d1w"], p["d1b"], "relu", jnp.bfloat16)   # (B,8,8,64)
    d = conv_transpose2d_nhwc(d, p["d2w"], p["d2b"], "relu", jnp.bfloat16)   # (B,16,16,32)
    d = conv_transpose2d_nhwc(d, p["d3w"], p["d3b"], "sigmoid", jnp.float32) # (B,32,32,1)
    recon = jnp.transpose(d, (0, 3, 1, 2))                                   # NCHW
    return recon, mu, logvar


if __name__ == "__main__":
    key = jax.random.PRNGKey(0)
    k_param, k_x, k_eps = jax.random.split(key, 3)

    B = 2
    params = init_params(k_param)
    x = jax.random.normal(k_x, (B, 1, IMG, IMG), jnp.float32)   # NCHW, like PyTorch
    eps = jax.random.normal(k_eps, (B, LATENT_DIM), jnp.float32)

    recon, mu, logvar = vae_forward(params, x, eps)
    jax.block_until_ready((recon, mu, logvar))

    assert recon.shape == (B, 1, IMG, IMG), recon.shape
    assert mu.shape == (B, LATENT_DIM), mu.shape
    assert logvar.shape == (B, LATENT_DIM), logvar.shape
    assert bool(jnp.all(jnp.isfinite(recon)))
    assert bool(jnp.all((recon >= 0.0) & (recon <= 1.0)))  # sigmoid evaluated in f32

    print("KERNEL_OK")
</pallas_src>

<mosaic_0001>
module attributes {stable_mosaic.version = 11 : i64} {
  func.func @_mm_bias_act_kernel(%arg0: i32, %arg1: memref<512x9xbf16, #tpu.memory_space<vmem>>, %arg2: memref<9x32xbf16, #tpu.memory_space<vmem>>, %arg3: memref<1x32xf32, #tpu.memory_space<vmem>>, %arg4: memref<512x32xbf16, #tpu.memory_space<vmem>>) attributes {dimension_semantics = [#tpu.dimension_semantics<parallel>], iteration_bounds = array<i64: 1>, scalar_prefetch = 0 : i64, scratch_operands = 0 : i64, tpu.core_type = #tpu.core_type<tc>, window_params = [{transform_indices = @transform_0, window_bounds = array<i64: 512, 9>}, {pipeline_mode = #tpu.pipeline_mode<synchronous>, transform_indices = @transform_1, window_bounds = array<i64: 9, 32>}, {pipeline_mode = #tpu.pipeline_mode<synchronous>, transform_indices = @transform_2, window_bounds = array<i64: 1, 32>}, {transform_indices = @transform_3, window_bounds = array<i64: 512, 32>}]} {
    %c0 = arith.constant 0 : index
    %c0_0 = arith.constant 0 : index
    %0 = vector.load %arg1[%c0, %c0_0] : memref<512x9xbf16, #tpu.memory_space<vmem>>, vector<512x9xbf16>
    %c0_1 = arith.constant 0 : index
    %c0_2 = arith.constant 0 : index
    %1 = vector.load %arg2[%c0_1, %c0_2] : memref<9x32xbf16, #tpu.memory_space<vmem>>, vector<9x32xbf16>
    %cst = arith.constant dense<0.000000e+00> : vector<512x32xf32>
    %2 = tpu.matmul %0, %1, %cst {dimension_numbers = #tpu.dot_dimension_numbers<[1], [0], [0], [1], [0, 0, 1, 1], [], []>} : vector<512x9xbf16>, vector<9x32xbf16>, vector<512x32xf32> -> vector<512x32xf32>
    %c0_3 = arith.constant 0 : index
    %c0_4 = arith.constant 0 : index
    %3 = vector.load %arg3[%c0_3, %c0_4] : memref<1x32xf32, #tpu.memory_space<vmem>>, vector<1x32xf32>
    %4 = vector.broadcast %3 : vector<1x32xf32> to vector<512x32xf32>
    %5 = arith.addf %2, %4 : vector<512x32xf32>
    %cst_5 = arith.constant 0.000000e+00 : f32
    %6 = vector.broadcast %cst_5 : f32 to vector<512x32xf32>
    %7 = arith.maximumf %5, %6 : vector<512x32xf32>
    %8 = arith.truncf %7 : vector<512x32xf32> to vector<512x32xbf16>
    %c0_6 = arith.constant 0 : index
    %c0_7 = arith.constant 0 : index
    %9 = vector.load %arg4[%c0_6, %c0_7] : memref<512x32xbf16, #tpu.memory_space<vmem>>, vector<512x32xbf16>
    tpu.vector_store %arg4[%c0_6, %c0_7], %8 {strides = array<i32>} : memref<512x32xbf16, #tpu.memory_space<vmem>>, vector<512x32xbf16>,
    return
  }
  func.func @transform_0(%arg0: i32) -> (i32, i32) {
    %c0_i32 = arith.constant 0 : i32
    %c0_i32_0 = arith.constant 0 : i32
    return %arg0, %c0_i32 : i32, i32
  }
  func.func @transform_1(%arg0: i32) -> (i32, i32) {
    %c0_i32 = arith.constant 0 : i32
    %c0_i32_0 = arith.constant 0 : i32
    %c0_i32_1 = arith.constant 0 : i32
    return %c0_i32, %c0_i32_0 : i32, i32
  }
  func.func @transform_2(%arg0: i32) -> (i32, i32) {
    %c0_i32 = arith.constant 0 : i32
    %c0_i32_0 = arith.constant 0 : i32
    %c0_i32_1 = arith.constant 0 : i32
    return %c0_i32, %c0_i32_0 : i32, i32
  }
  func.func @transform_3(%arg0: i32) -> (i32, i32) {
    %c0_i32 = arith.constant 0 : i32
    %c0_i32_0 = arith.constant 0 : i32
    return %arg0, %c0_i32 : i32, i32
  }
}

module attributes {stable_mosaic.version = 11 : i64} {
  func.func @_mm_bias_act_kernel(%arg0: i32, %arg1: memref<128x288xbf16, #tpu.memory_space<vmem>>, %arg2: memref<288x64xbf16, #tpu.memory_space<vmem>>, %arg3: memref<1x64xf32, #tpu.memory_space<vmem>>, %arg4: memref<128x64xbf16, #tpu.memory_space<vmem>>) attributes {dimension_semantics = [#tpu.dimension_semantics<parallel>], iteration_bounds = array<i64: 1>, scalar_prefetch = 0 : i64, scratch_operands = 0 : i64, tpu.core_type = #tpu.core_type<tc>, window_params = [{transform_indices = @transform_0, window_bounds = array<i64: 128, 288>}, {pipeline_mode = #tpu.pipeline_mode<synchronous>, transform_indices = @transform_1, window_bounds = array<i64: 288, 64>}, {pipeline_mode = #tpu.pipeline_mode<synchronous>, transform_indices = @transform_2, window_bounds = array<i64: 1, 64>}, {transform_indices = @transform_3, window_bounds = array<i64: 128, 64>}]} {
    %c0 = arith.constant 0 : index
    %c0_0 = arith.constant 0 : index
    %0 = vector.load %arg1[%c0, %c0_0] : memref<128x288xbf16, #tpu.memory_space<vmem>>, vector<128x288xbf16>
    %c0_1 = arith.constant 0 : index
    %c0_2 = arith.constant 0 : index
    %1 = vector.load %arg2[%c0_1, %c0_2] : memref<288x64xbf16, #tpu.memory_space<vmem>>, vector<288x64xbf16>
    %cst = arith.constant dense<0.000000e+00> : vector<128x64xf32>
    %2 = tpu.matmul %0, %1, %cst {dimension_numbers = #tpu.dot_dimension_numbers<[1], [0], [0], [1], [0, 0, 1, 1], [], []>} : vector<128x288xbf16>, vector<288x64xbf16>, vector<128x64xf32> -> vector<128x64xf32>
    %c0_3 = arith.constant 0 : index
    %c0_4 = arith.constant 0 : index
    %3 = vector.load %arg3[%c0_3, %c0_4] : memref<1x64xf32, #tpu.memory_space<vmem>>, vector<1x64xf32>
    %4 = vector.broadcast %3 : vector<1x64xf32> to vector<128x64xf32>
    %5 = arith.addf %2, %4 : vector<128x64xf32>
    %cst_5 = arith.constant 0.000000e+00 : f32
    %6 = vector.broadcast %cst_5 : f32 to vector<128x64xf32>
    %7 = arith.maximumf %5, %6 : vector<128x64xf32>
    %8 = arith.truncf %7 : vector<128x64xf32> to vector<128x64xbf16>
    %c0_6 = arith.constant 0 : index
    %c0_7 = arith.constant 0 : index
    %9 = vector.load %arg4[%c0_6, %c0_7] : memref<128x64xbf16, #tpu.memory_space<vmem>>, vector<128x64xbf16>
    tpu.vector_store %arg4[%c0_6, %c0_7], %8 {strides = array<i32>} : memref<128x64xbf16, #tpu.memory_space<vmem>>, vector<128x64xbf16>,
    return
  }
  func.func @transform_0(%arg0: i32) -> (i32, i32) {
    %c0_i32 = arith.constant 0 : i32
    %c0_i32_0 = arith.constant 0 : i32
    return %arg0, %c0_i32 : i32, i32
  }
  func.func @transform_1(%arg0: i32) -> (i32, i32) {
    %c0_i32 = arith.constant 0 : i32
    %c0_i32_0 = arith.constant 0 : i32
    %c0_i32_1 = arith.constant 0 : i32
    return %c0_i32, %c0_i32_0 : i32, i32
  }
  func.func @transform_2(%arg0: i32) -> (i32, i32) {
    %c0_i32 = arith.constant 0 : i32
    %c0_i32_0 = arith.constant 0 : i32
    %c0_i32_1 = arith.constant 0 : i32
    return %c0_i32, %c0_i32_0 : i32, i32
  }
  func.func @transform_3(%arg0: i32) -> (i32, i32) {
    %c0_i32 = arith.constant 0 : i32
    %c0_i32_0 = arith.constant 0 : i32
    return %arg0, %c0_i32 : i32, i32
  }
}

module attributes {stable_mosaic.version = 11 : i64} {
  func.func @_mm_bias_act_kernel(%arg0: i32, %arg1: memref<32x576xbf16, #tpu.memory_space<vmem>>, %arg2: memref<576x128xbf16, #tpu.memory_space<vmem>>, %arg3: memref<1x128xf32, #tpu.memory_space<vmem>>, %arg4: memref<32x128xf32, #tpu.memory_space<vmem>>) attributes {dimension_semantics = [#tpu.dimension_semantics<parallel>], iteration_bounds = array<i64: 1>, scalar_prefetch = 0 : i64, scratch_operands = 0 : i64, tpu.core_type = #tpu.core_type<tc>, window_params = [{transform_indices = @transform_0, window_bounds = array<i64: 32, 576>}, {pipeline_mode = #tpu.pipeline_mode<synchronous>, transform_indices = @transform_1, window_bounds = array<i64: 576, 128>}, {pipeline_mode = #tpu.pipeline_mode<synchronous>, transform_indices = @transform_2, window_bounds = array<i64: 1, 128>}, {transform_indices = @transform_3, window_bounds = array<i64: 32, 128>}]} {
    %c0 = arith.constant 0 : index
    %c0_0 = arith.constant 0 : index
    %0 = vector.load %arg1[%c0, %c0_0] : memref<32x576xbf16, #tpu.memory_space<vmem>>, vector<32x576xbf16>
    %c0_1 = arith.constant 0 : index
    %c0_2 = arith.constant 0 : index
    %1 = vector.load %arg2[%c0_1, %c0_2] : memref<576x128xbf16, #tpu.memory_space<vmem>>, vector<576x128xbf16>
    %cst = arith.constant dense<0.000000e+00> : vector<32x128xf32>
    %2 = tpu.matmul %0, %1, %cst {dimension_numbers = #tpu.dot_dimension_numbers<[1], [0], [0], [1], [0, 0, 1, 1], [], []>} : vector<32x576xbf16>, vector<576x128xbf16>, vector<32x128xf32> -> vector<32x128xf32>
    %c0_3 = arith.constant 0 : index
    %c0_4 = arith.constant 0 : index
    %3 = vector.load %arg3[%c0_3, %c0_4] : memref<1x128xf32, #tpu.memory_space<vmem>>, vector<1x128xf32>
    %4 = vector.broadcast %3 : vector<1x128xf32> to vector<32x128xf32>
    %5 = arith.addf %2, %4 : vector<32x128xf32>
    %cst_5 = arith.constant 0.000000e+00 : f32
    %6 = vector.broadcast %cst_5 : f32 to vector<32x128xf32>
    %7 = arith.maximumf %5, %6 : vector<32x128xf32>
    %c0_6 = arith.constant 0 : index
    %c0_7 = arith.constant 0 : index
    %8 = vector.load %arg4[%c0_6, %c0_7] : memref<32x128xf32, #tpu.memory_space<vmem>>, vector<32x128xf32>
    tpu.vector_store %arg4[%c0_6, %c0_7], %7 {strides = array<i32>} : memref<32x128xf32, #tpu.memory_space<vmem>>, vector<32x128xf32>,
    return
  }
  func.func @transform_0(%arg0: i32) -> (i32, i32) {
    %c0_i32 = arith.constant 0 : i32
    %c0_i32_0 = arith.constant 0 : i32
    return %arg0, %c0_i32 : i32, i32
  }
  func.func @transform_1(%arg0: i32) -> (i32, i32) {
    %c0_i32 = arith.constant 0 : i32
    %c0_i32_0 = arith.constant 0 : i32
    %c0_i32_1 = arith.constant 0 : i32
    return %c0_i32, %c0_i32_0 : i32, i32
  }
  func.func @transform_2(%arg0: i32) -> (i32, i32) {
    %c0_i32 = arith.constant 0 : i32
    %c0_i32_0 = arith.constant 0 : i32
    %c0_i32_1 = arith.constant 0 : i32
    return %c0_i32, %c0_i32_0 : i32, i32
  }
  func.func @transform_3(%arg0: i32) -> (i32, i32) {
    %c0_i32 = arith.constant 0 : i32
    %c0_i32_0 = arith.constant 0 : i32
    return %arg0, %c0_i32 : i32, i32
  }
}

module attributes {stable_mosaic.version = 11 : i64} {
  func.func @_latent_kernel(%arg0: memref<2x2048xf32, #tpu.memory_space<vmem>>, %arg1: memref<2048x2xf32, #tpu.memory_space<vmem>>, %arg2: memref<1x2xf32, #tpu.memory_space<vmem>>, %arg3: memref<2048x2xf32, #tpu.memory_space<vmem>>, %arg4: memref<1x2xf32, #tpu.memory_space<vmem>>, %arg5: memref<2x2xf32, #tpu.memory_space<vmem>>, %arg6: memref<2x2048xf32, #tpu.memory_space<vmem>>, %arg7: memref<1x2048xf32, #tpu.memory_space<vmem>>, %arg8: memref<2x2xf32, #tpu.memory_space<vmem>>, %arg9: memref<2x2xf32, #tpu.memory_space<vmem>>, %arg10: memref<2x2048xf32, #tpu.memory_space<vmem>>) attributes {dimension_semantics = [], scalar_prefetch = 0 : i64, scratch_operands = 0 : i64, tpu.core_type = #tpu.core_type<tc>} {
    %c0 = arith.constant 0 : index
    %c0_0 = arith.constant 0 : index
    %0 = vector.load %arg0[%c0, %c0_0] : memref<2x2048xf32, #tpu.memory_space<vmem>>, vector<2x2048xf32>
    %c0_1 = arith.constant 0 : index
    %c0_2 = arith.constant 0 : index
    %1 = vector.load %arg1[%c0_1, %c0_2] : memref<2048x2xf32, #tpu.memory_space<vmem>>, vector<2048x2xf32>
    %cst = arith.constant dense<0.000000e+00> : vector<2x2xf32>
    %2 = tpu.matmul %0, %1, %cst {dimension_numbers = #tpu.dot_dimension_numbers<[1], [0], [0], [1], [0, 0, 1, 1], [], []>} : vector<2x2048xf32>, vector<2048x2xf32>, vector<2x2xf32> -> vector<2x2xf32>
    %c0_3 = arith.constant 0 : index
    %c0_4 = arith.constant 0 : index
    %3 = vector.load %arg2[%c0_3, %c0_4] : memref<1x2xf32, #tpu.memory_space<vmem>>, vector<1x2xf32>
    %4 = vector.broadcast %3 : vector<1x2xf32> to vector<2x2xf32>
    %5 = arith.addf %2, %4 : vector<2x2xf32>
    %c0_5 = arith.constant 0 : index
    %c0_6 = arith.constant 0 : index
    %6 = vector.load %arg3[%c0_5, %c0_6] : memref<2048x2xf32, #tpu.memory_space<vmem>>, vector<2048x2xf32>
    %cst_7 = arith.constant dense<0.000000e+00> : vector<2x2xf32>
    %7 = tpu.matmul %0, %6, %cst_7 {dimension_numbers = #tpu.dot_dimension_numbers<[1], [0], [0], [1], [0, 0, 1, 1], [], []>} : vector<2x2048xf32>, vector<2048x2xf32>, vector<2x2xf32> -> vector<2x2xf32>
    %c0_8 = arith.constant 0 : index
    %c0_9 = arith.constant 0 : index
    %8 = vector.load %arg4[%c0_8, %c0_9] : memref<1x2xf32, #tpu.memory_space<vmem>>, vector<1x2xf32>
    %9 = vector.broadcast %8 : vector<1x2xf32> to vector<2x2xf32>
    %10 = arith.addf %7, %9 : vector<2x2xf32>
    %c0_10 = arith.constant 0 : index
    %c0_11 = arith.constant 0 : index
    %11 = vector.load %arg5[%c0_10, %c0_11] : memref<2x2xf32, #tpu.memory_space<vmem>>, vector<2x2xf32>
    %cst_12 = arith.constant 5.000000e-01 : f32
    %12 = vector.broadcast %cst_12 : f32 to vector<2x2xf32>
    %13 = arith.mulf %12, %10 : vector<2x2xf32>
    %14 = math.exp %13 : vector<2x2xf32>
    %15 = arith.mulf %11, %14 : vector<2x2xf32>
    %16 = arith.addf %5, %15 : vector<2x2xf32>
    %c0_13 = arith.constant 0 : index
    %c0_14 = arith.constant 0 : index
    %17 = vector.load %arg6[%c0_13, %c0_14] : memref<2x2048xf32, #tpu.memory_space<vmem>>, vector<2x2048xf32>
    %cst_15 = arith.constant dense<0.000000e+00> : vector<2x2048xf32>
    %18 = tpu.matmul %16, %17, %cst_15 {dimension_numbers = #tpu.dot_dimension_numbers<[1], [0], [0], [1], [0, 0, 1, 1], [], []>} : vector<2x2xf32>, vector<2x2048xf32>, vector<2x2048xf32> -> vector<2x2048xf32>
    %c0_16 = arith.constant 0 : index
    %c0_17 = arith.constant 0 : index
    %19 = vector.load %arg7[%c0_16, %c0_17] : memref<1x2048xf32, #tpu.memory_space<vmem>>, vector<1x2048xf32>
    %20 = vector.broadcast %19 : vector<1x2048xf32> to vector<2x2048xf32>
    %21 = arith.addf %18, %20 : vector<2x2048xf32>
    %c0_18 = arith.constant 0 : index
    %c0_19 = arith.constant 0 : index
    %22 = vector.load %arg8[%c0_18, %c0_19] : memref<2x2xf32, #tpu.memory_space<vmem>>, vector<2x2xf32>
    tpu.vector_store %arg8[%c0_18, %c0_19], %5 {strides = array<i32>} : memref<2x2xf32, #tpu.memory_space<vmem>>, vector<2x2xf32>,
    %c0_20 = arith.constant 0 : index
    %c0_21 = arith.constant 0 : index
    %23 = vector.load %arg9[%c0_20, %c0_21] : memref<2x2xf32, #tpu.memory_space<vmem>>, vector<2x2xf32>
    tpu.vector_store %arg9[%c0_20, %c0_21], %10 {strides = array<i32>} : memref<2x2xf32, #tpu.memory_space<vmem>>, vector<2x2xf32>,
    %c0_22 = arith.constant 0 : index
    %c0_23 = arith.constant 0 : index
    %24 = vector.load %arg10[%c0_22, %c0_23] : memref<2x2048xf32, #tpu.memory_space<vmem>>, vector<2x2048xf32>
    tpu.vector_store %arg10[%c0_22, %c0_23], %21 {strides = array<i32>} : memref<2x2048xf32, #tpu.memory_space<vmem>>, vector<2x2048xf32>,
    return
  }
}

module attributes {stable_mosaic.version = 11 : i64} {
  func.func @_mm_bias_act_kernel(%arg0: i32, %arg1: memref<32x512xbf16, #tpu.memory_space<vmem>>, %arg2: memref<512x256xbf16, #tpu.memory_space<vmem>>, %arg3: memref<1x256xf32, #tpu.memory_space<vmem>>, %arg4: memref<32x256xbf16, #tpu.memory_space<vmem>>) attributes {dimension_semantics = [#tpu.dimension_semantics<parallel>], iteration_bounds = array<i64: 1>, scalar_prefetch = 0 : i64, scratch_operands = 0 : i64, tpu.core_type = #tpu.core_type<tc>, window_params = [{transform_indices = @transform_0, window_bounds = array<i64: 32, 512>}, {pipeline_mode = #tpu.pipeline_mode<synchronous>, transform_indices = @transform_1, window_bounds = array<i64: 512, 256>}, {pipeline_mode = #tpu.pipeline_mode<synchronous>, transform_indices = @transform_2, window_bounds = array<i64: 1, 256>}, {transform_indices = @transform_3, window_bounds = array<i64: 32, 256>}]} {
    %c0 = arith.constant 0 : index
    %c0_0 = arith.constant 0 : index
    %0 = vector.load %arg1[%c0, %c0_0] : memref<32x512xbf16, #tpu.memory_space<vmem>>, vector<32x512xbf16>
    %c0_1 = arith.constant 0 : index
    %c0_2 = arith.constant 0 : index
    %1 = vector.load %arg2[%c0_1, %c0_2] : memref<512x256xbf16, #tpu.memory_space<vmem>>, vector<512x256xbf16>
    %cst = arith.constant dense<0.000000e+00> : vector<32x256xf32>
    %2 = tpu.matmul %0, %1, %cst {dimension_numbers = #tpu.dot_dimension_numbers<[1], [0], [0], [1], [0, 0, 1, 1], [], []>} : vector<32x512xbf16>, vector<512x256xbf16>, vector<32x256xf32> -> vector<32x256xf32>
    %c0_3 = arith.constant 0 : index
    %c0_4 = arith.constant 0 : index
    %3 = vector.load %arg3[%c0_3, %c0_4] : memref<1x256xf32, #tpu.memory_space<vmem>>, vector<1x256xf32>
    %4 = vector.broadcast %3 : vector<1x256xf32> to vector<32x256xf32>
    %5 = arith.addf %2, %4 : vector<32x256xf32>
    %cst_5 = arith.constant 0.000000e+00 : f32
    %6 = vector.broadcast %cst_5 : f32 to vector<32x256xf32>
    %7 = arith.maximumf %5, %6 : vector<32x256xf32>
    %8 = arith.truncf %7 : vector<32x256xf32> to vector<32x256xbf16>
    %c0_6 = arith.constant 0 : index
    %c0_7 = arith.constant 0 : index
    %9 = vector.load %arg4[%c0_6, %c0_7] : memref<32x256xbf16, #tpu.memory_space<vmem>>, vector<32x256xbf16>
    tpu.vector_store %arg4[%c0_6, %c0_7], %8 {strides = array<i32>} : memref<32x256xbf16, #tpu.memory_space<vmem>>, vector<32x256xbf16>,
    return
  }
  func.func @transform_0(%arg0: i32) -> (i32, i32) {
    %c0_i32 = arith.constant 0 : i32
    %c0_i32_0 = arith.constant 0 : i32
    return %arg0, %c0_i32 : i32, i32
  }
  func.func @transform_1(%arg0: i32) -> (i32, i32) {
    %c0_i32 = arith.constant 0 : i32
    %c0_i32_0 = arith.constant 0 : i32
    %c0_i32_1 = arith.constant 0 : i32
    return %c0_i32, %c0_i32_0 : i32, i32
  }
  func.func @transform_2(%arg0: i32) -> (i32, i32) {
    %c0_i32 = arith.constant 0 : i32
    %c0_i32_0 = arith.constant 0 : i32
    %c0_i32_1 = arith.constant 0 : i32
    return %c0_i32, %c0_i32_0 : i32, i32
  }
  func.func @transform_3(%arg0: i32) -> (i32, i32) {
    %c0_i32 = arith.constant 0 : i32
    %c0_i32_0 = arith.constant 0 : i32
    return %arg0, %c0_i32 : i32, i32
  }
}

module attributes {stable_mosaic.version = 11 : i64} {
  func.func @_mm_bias_act_kernel(%arg0: i32, %arg1: memref<128x256xbf16, #tpu.memory_space<vmem>>, %arg2: memref<256x128xbf16, #tpu.memory_space<vmem>>, %arg3: memref<1x128xf32, #tpu.memory_space<vmem>>, %arg4: memref<128x128xbf16, #tpu.memory_space<vmem>>) attributes {dimension_semantics = [#tpu.dimension_semantics<parallel>], iteration_bounds = array<i64: 1>, scalar_prefetch = 0 : i64, scratch_operands = 0 : i64, tpu.core_type = #tpu.core_type<tc>, window_params = [{transform_indices = @transform_0, window_bounds = array<i64: 128, 256>}, {pipeline_mode = #tpu.pipeline_mode<synchronous>, transform_indices = @transform_1, window_bounds = array<i64: 256, 128>}, {pipeline_mode = #tpu.pipeline_mode<synchronous>, transform_indices = @transform_2, window_bounds = array<i64: 1, 128>}, {transform_indices = @transform_3, window_bounds = array<i64: 128, 128>}]} {
    %c0 = arith.constant 0 : index
    %c0_0 = arith.constant 0 : index
    %0 = vector.load %arg1[%c0, %c0_0] : memref<128x256xbf16, #tpu.memory_space<vmem>>, vector<128x256xbf16>
    %c0_1 = arith.constant 0 : index
    %c0_2 = arith.constant 0 : index
    %1 = vector.load %arg2[%c0_1, %c0_2] : memref<256x128xbf16, #tpu.memory_space<vmem>>, vector<256x128xbf16>
    %cst = arith.constant dense<0.000000e+00> : vector<128x128xf32>
    %2 = tpu.matmul %0, %1, %cst {dimension_numbers = #tpu.dot_dimension_numbers<[1], [0], [0], [1], [0, 0, 1, 1], [], []>} : vector<128x256xbf16>, vector<256x128xbf16>, vector<128x128xf32> -> vector<128x128xf32>
    %c0_3 = arith.constant 0 : index
    %c0_4 = arith.constant 0 : index
    %3 = vector.load %arg3[%c0_3, %c0_4] : memref<1x128xf32, #tpu.memory_space<vmem>>, vector<1x128xf32>
    %4 = vector.broadcast %3 : vector<1x128xf32> to vector<128x128xf32>
    %5 = arith.addf %2, %4 : vector<128x128xf32>
    %cst_5 = arith.constant 0.000000e+00 : f32
    %6 = vector.broadcast %cst_5 : f32 to vector<128x128xf32>
    %7 = arith.maximumf %5, %6 : vector<128x128xf32>
    %8 = arith.truncf %7 : vector<128x128xf32> to vector<128x128xbf16>
    %c0_6 = arith.constant 0 : index
    %c0_7 = arith.constant 0 : index
    %9 = vector.load %arg4[%c0_6, %c0_7] : memref<128x128xbf16, #tpu.memory_space<vmem>>, vector<128x128xbf16>
    tpu.vector_store %arg4[%c0_6, %c0_7], %8 {strides = array<i32>} : memref<128x128xbf16, #tpu.memory_space<vmem>>, vector<128x128xbf16>,
    return
  }
  func.func @transform_0(%arg0: i32) -> (i32, i32) {
    %c0_i32 = arith.constant 0 : i32
    %c0_i32_0 = arith.constant 0 : i32
    return %arg0, %c0_i32 : i32, i32
  }
  func.func @transform_1(%arg0: i32) -> (i32, i32) {
    %c0_i32 = arith.constant 0 : i32
    %c0_i32_0 = arith.constant 0 : i32
    %c0_i32_1 = arith.constant 0 : i32
    return %c0_i32, %c0_i32_0 : i32, i32
  }
  func.func @transform_2(%arg0: i32) -> (i32, i32) {
    %c0_i32 = arith.constant 0 : i32
    %c0_i32_0 = arith.constant 0 : i32
    %c0_i32_1 = arith.constant 0 : i32
    return %c0_i32, %c0_i32_0 : i32, i32
  }
  func.func @transform_3(%arg0: i32) -> (i32, i32) {
    %c0_i32 = arith.constant 0 : i32
    %c0_i32_0 = arith.constant 0 : i32
    return %arg0, %c0_i32 : i32, i32
  }
}

module attributes {stable_mosaic.version = 11 : i64} {
  func.func @_mm_bias_act_kernel(%arg0: i32, %arg1: memref<512x128xbf16, #tpu.memory_space<vmem>>, %arg2: memref<128x4xbf16, #tpu.memory_space<vmem>>, %arg3: memref<1x4xf32, #tpu.memory_space<vmem>>, %arg4: memref<512x4xf32, #tpu.memory_space<vmem>>) attributes {dimension_semantics = [#tpu.dimension_semantics<parallel>], iteration_bounds = array<i64: 1>, scalar_prefetch = 0 : i64, scratch_operands = 0 : i64, tpu.core_type = #tpu.core_type<tc>, window_params = [{transform_indices = @transform_0, window_bounds = array<i64: 512, 128>}, {pipeline_mode = #tpu.pipeline_mode<synchronous>, transform_indices = @transform_1, window_bounds = array<i64: 128, 4>}, {pipeline_mode = #tpu.pipeline_mode<synchronous>, transform_indices = @transform_2, window_bounds = array<i64: 1, 4>}, {transform_indices = @transform_3, window_bounds = array<i64: 512, 4>}]} {
    %c0 = arith.constant 0 : index
    %c0_0 = arith.constant 0 : index
    %0 = vector.load %arg1[%c0, %c0_0] : memref<512x128xbf16, #tpu.memory_space<vmem>>, vector<512x128xbf16>
    %c0_1 = arith.constant 0 : index
    %c0_2 = arith.constant 0 : index
    %1 = vector.load %arg2[%c0_1, %c0_2] : memref<128x4xbf16, #tpu.memory_space<vmem>>, vector<128x4xbf16>
    %cst = arith.constant dense<0.000000e+00> : vector<512x4xf32>
    %2 = tpu.matmul %0, %1, %cst {dimension_numbers = #tpu.dot_dimension_numbers<[1], [0], [0], [1], [0, 0, 1, 1], [], []>} : vector<512x128xbf16>, vector<128x4xbf16>, vector<512x4xf32> -> vector<512x4xf32>
    %c0_3 = arith.constant 0 : index
    %c0_4 = arith.constant 0 : index
    %3 = vector.load %arg3[%c0_3, %c0_4] : memref<1x4xf32, #tpu.memory_space<vmem>>, vector<1x4xf32>
    %4 = vector.broadcast %3 : vector<1x4xf32> to vector<512x4xf32>
    %5 = arith.addf %2, %4 : vector<512x4xf32>
    %6 = arith.negf %5 : vector<512x4xf32>
    %7 = math.exp %6 : vector<512x4xf32>
    %cst_5 = arith.constant 1.000000e+00 : f32
    %8 = vector.broadcast %cst_5 : f32 to vector<512x4xf32>
    %9 = arith.addf %8, %7 : vector<512x4xf32>
    %10 = arith.divf %8, %9 : vector<512x4xf32>
    %c0_6 = arith.constant 0 : index
    %c0_7 = arith.constant 0 : index
    %11 = vector.load %arg4[%c0_6, %c0_7] : memref<512x4xf32, #tpu.memory_space<vmem>>, vector<512x4xf32>
    tpu.vector_store %arg4[%c0_6, %c0_7], %10 {strides = array<i32>} : memref<512x4xf32, #tpu.memory_space<vmem>>, vector<512x4xf32>,
    return
  }
  func.func @transform_0(%arg0: i32) -> (i32, i32) {
    %c0_i32 = arith.constant 0 : i32
    %c0_i32_0 = arith.constant 0 : i32
    return %arg0, %c0_i32 : i32, i32
  }
  func.func @transform_1(%arg0: i32) -> (i32, i32) {
    %c0_i32 = arith.constant 0 : i32
    %c0_i32_0 = arith.constant 0 : i32
    %c0_i32_1 = arith.constant 0 : i32
    return %c0_i32, %c0_i32_0 : i32, i32
  }
  func.func @transform_2(%arg0: i32) -> (i32, i32) {
    %c0_i32 = arith.constant 0 : i32
    %c0_i32_0 = arith.constant 0 : i32
    %c0_i32_1 = arith.constant 0 : i32
    return %c0_i32, %c0_i32_0 : i32, i32
  }
  func.func @transform_3(%arg0: i32) -> (i32, i32) {
    %c0_i32 = arith.constant 0 : i32
    %c0_i32_0 = arith.constant 0 : i32
    return %arg0, %c0_i32 : i32, i32
  }
}

</mosaic_0001>

<bundles_post_ra>
// kernel: vae_forward.7
= control target key start
LH: loop header
LB: loop body
LE: loop exit
PB: predicated region body
PF: predicated region fallthrough
CT: control target
= control target key end

     0   :  { %vm350_vm0 = vcmask 1043456   ;;  %vm351_vm1 = vcmask 1044480   ;;  %vm253_vm2 = vcmask 72704   ;;  %v1364_v1 = vmov 65535   ;;  %s1841_s1 = inlined_call_operand.vmem [shape: bf16[9,32], index: 1, kind: input, shape index: {}]   ;;  %s1842_s0 = inlined_call_operand.vmem [shape: bf16[512,9], index: 0, kind: input, shape index: {}]   ;;  %s1843_s2 = inlined_call_operand.vmem [shape: f32[1,32], index: 2, kind: input, shape index: {}]   ;;  %s1844_s3 = inlined_call_operand.vmem [shape: bf16[512,32], index: 3, kind: output, shape index: {}]  }
   0x1   :  { %v1331_v0 = vld [vmem:[%s1841_s1] sm:$0x1f]   ;;  %v352_v2 = vsel %vm350_vm0, 4294967295, %v1364_v1  ;;  %v1334_v7 = vld [vmem:[%s1842_s0 + $0x8] sm:$0xff]   ;;  %v1336_v9 = vld [vmem:[%s1842_s0 + $0x10] sm:$0xff]   ;;  %vm966_vm3 = vcmask 257024  }
   0x2   :  { %v1332_v3 = vld [vmem:[%s1842_s0] sm:$0xff]   ;;  %v353_v4 = vsel %vm351_vm1, %v352_v2, 0  ;;  %v1335_v8 = vld [vmem:[%s1842_s0 + $0x88] sm:$0xff]   ;;  %v1337_v10 = vld [vmem:[%s1842_s0 + $0x90] sm:$0xff]  }
   0x3   :  { %v1333_v5 = vld [vmem:[%s1842_s0 + $0x80] sm:$0xff]   ;;  %v355_v6 = vand.u32 %v1331_v0, %v353_v4  ;;  %1264 = vmatprep.mubr.msk.bf16.mxu0 %vm253_vm2, %v1332_v3  ;;  %v1338_v11 = vld [vmem:[%s1842_s0 + $0x18] sm:$0xff]   ;;  %v1342_v15 = vld [vmem:[%s1842_s0 + $0x28] sm:$0xff]  }
   0x4   :  { %1296 = vmatprep.mubr.msk.bf16.mxu1 %vm253_vm2, %v1333_v5  ;;  %v1339_v12 = vld [vmem:[%s1842_s0 + $0x98] sm:$0xff]   ;;  %v1340_v13 = vld [vmem:[%s1842_s0 + $0x20] sm:$0xff]   ;;  %v1343_v16 = vld [vmem:[%s1842_s0 + $0xa8] sm:$0xff]  }
   0x5   :  { %1262 = vmatprep.subr.bf16.mxu0 %v355_v6  ;;  %1328 = vmatprep.subr.bf16.mxu1 %v355_v6  ;;  %v1341_v14 = vld [vmem:[%s1842_s0 + $0xa0] sm:$0xff]   ;;  %v1344_v17 = vld [vmem:[%s1842_s0 + $0x30] sm:$0xff]   ;;  %v1346_v19 = vld [vmem:[%s1842_s0 + $0x38] sm:$0xff]  }
   0x6   :  { %1263 = vmatpush3.bf16.msra.mxu0 %v355_v6  ;;  %1329 = vmatpush3.bf16.msra.mxu1 %v355_v6  ;;  %v1345_v18 = vld [vmem:[%s1842_s0 + $0xb0] sm:$0xff]   ;;  %v1347_v20 = vld [vmem:[%s1842_s0 + $0xb8] sm:$0xff]   ;;  %v1348_v21 = vld [vmem:[%s1842_s0 + $0x40] sm:$0xff]  }
   0x7   :  { %v1349_v22 = vld [vmem:[%s1842_s0 + $0xc0] sm:$0xff]   ;;  %v1350_v23 = vld [vmem:[%s1842_s0 + $0x48] sm:$0xff]   ;;  %v1352_v25 = vld [vmem:[%s1842_s0 + $0x50] sm:$0xff]  }
   0x8   :  { %v1351_v24 = vld [vmem:[%s1842_s0 + $0xc8] sm:$0xff]   ;;  %v1353_v26 = vld [vmem:[%s1842_s0 + $0xd0] sm:$0xff]   ;;  %v1354_v27 = vld [vmem:[%s1842_s0 + $0x58] sm:$0xff]  }
   0x9   :  { %1265 = vmatmul.mubr.msk.bf16.vlgmr.msra.gmra.mxu0 %vm253_vm2, %v1334_v7  ;;  %1297 = vmatmul.mubr.msk.bf16.vlgmr.msra.gmra.mxu1 %vm253_vm2, %v1335_v8  ;;  %v1355_v28 = vld [vmem:[%s1842_s0 + $0xd8] sm:$0xff]   ;;  %v1356_v29 = vld [vmem:[%s1842_s0 + $0x60] sm:$0xff]   ;;  %v1358_v31 = vld [vmem:[%s1842_s0 + $0x68] sm:$0xff]  }
   0xa   :  { %1268 = vmatprep.mubr.msk.bf16.mxu0 %vm253_vm2, %v1336_v9  ;;  %1300 = vmatprep.mubr.msk.bf16.mxu1 %vm253_vm2, %v1337_v10  ;;  %v1357_v30 = vld [vmem:[%s1842_s0 + $0xe0] sm:$0xff]   ;;  %v1359_v32 = vld [vmem:[%s1842_s0 + $0xe8] sm:$0xff]   ;;  %v1360_v33 = vld [vmem:[%s1842_s0 + $0x70] sm:$0xff]  }
   0xb   :  { %v1361_v34 = vld [vmem:[%s1842_s0 + $0xf0] sm:$0xff]   ;;  %v1362_v35 = vld [vmem:[%s1842_s0 + $0x78] sm:$0xff]   ;;  %v1519_v37 = vld [vmem:[%s1843_s2] ss:$0 sm:$0xff] }
   0xc   :  { %v1363_v36 = vld [vmem:[%s1842_s0 + $0xf8] sm:$0xff]  }
  0x11   :  { %1269 = vmatmul.mubr.msk.bf16.gmra.mxu0 %vm253_vm2, %v1338_v11  ;;  %1301 = vmatmul.mubr.msk.bf16.gmra.mxu1 %vm253_vm2, %v1339_v12 }
  0x12   :  { %1272 = vmatprep.mubr.msk.bf16.mxu0 %vm253_vm2, %v1340_v13  ;;  %1304 = vmatprep.mubr.msk.bf16.mxu1 %vm253_vm2, %v1341_v14 }
  0x19   :  { %1273 = vmatmul.mubr.msk.bf16.gmra.mxu0 %vm253_vm2, %v1342_v15  ;;  %1305 = vmatmul.mubr.msk.bf16.gmra.mxu1 %vm253_vm2, %v1343_v16 }
  0x1a   :  { %1276 = vmatprep.mubr.msk.bf16.mxu0 %vm253_vm2, %v1344_v17  ;;  %1308 = vmatprep.mubr.msk.bf16.mxu1 %vm253_vm2, %v1345_v18 }
  0x21   :  { %1277 = vmatmul.mubr.msk.bf16.gmra.mxu0 %vm253_vm2, %v1346_v19  ;;  %1309 = vmatmul.mubr.msk.bf16.gmra.mxu1 %vm253_vm2, %v1347_v20 }
  0x22   :  { %1280 = vmatprep.mubr.msk.bf16.mxu0 %vm253_vm2, %v1348_v21  ;;  %1312 = vmatprep.mubr.msk.bf16.mxu1 %vm253_vm2, %v1349_v22 }
  0x29   :  { %1281 = vmatmul.mubr.msk.bf16.gmra.mxu0 %vm253_vm2, %v1350_v23  ;;  %1313 = vmatmul.mubr.msk.bf16.gmra.mxu1 %vm253_vm2, %v1351_v24 }
  0x2a   :  { %1284 = vmatprep.mubr.msk.bf16.mxu0 %vm253_vm2, %v1352_v25  ;;  %1316 = vmatprep.mubr.msk.bf16.mxu1 %vm253_vm2, %v1353_v26 }
  0x31   :  { %1285 = vmatmul.mubr.msk.bf16.gmra.mxu0 %vm253_vm2, %v1354_v27  ;;  %1317 = vmatmul.mubr.msk.bf16.gmra.mxu1 %vm253_vm2, %v1355_v28 }
  0x32   :  { %1288 = vmatprep.mubr.msk.bf16.mxu0 %vm253_vm2, %v1356_v29  ;;  %1320 = vmatprep.mubr.msk.bf16.mxu1 %vm253_vm2, %v1357_v30 }
  0x39   :  { %1289 = vmatmul.mubr.msk.bf16.gmra.mxu0 %vm253_vm2, %v1358_v31  ;;  %1321 = vmatmul.mubr.msk.bf16.gmra.mxu1 %vm253_vm2, %v1359_v32 }
  0x3a   :  { %1292 = vmatprep.mubr.msk.bf16.mxu0 %vm253_vm2, %v1360_v33  ;;  %1324 = vmatprep.mubr.msk.bf16.mxu1 %vm253_vm2, %v1361_v34 }
  0x41   :  { %1293 = vmatmul.mubr.msk.bf16.gmra.mxu0 %vm253_vm2, %v1362_v35  ;;  %1325 = vmatmul.mubr.msk.bf16.gmra.mxu1 %vm253_vm2, %v1363_v36 }
  0xc9   :  { %v1266_v38 = vpop.f32.mrf.mxu0  ;;  %v1298_v39 = vpop.f32.mrf.mxu1 }
  0xca   :  { %v400_v40 = vadd.f32 %v1266_v38, %v1519_v37  ;;  %v528_v41 = vadd.f32 %v1298_v39, %v1519_v37 }
  0xcb   :  { %v391_v42 = vpop.f32.mrf.mxu0  ;;  %v519_v43 = vpop.f32.mrf.mxu1 }
  0xcc   :  { %v648_v44 = vmax.f32 %v400_v40, 0.0  ;;  %v680_v45 = vmax.f32 %v528_v41, 0.0  ;;  %v392_v46 = vadd.f32 %v1519_v37, %v391_v42  ;;  %v520_v47 = vadd.f32 %v1519_v37, %v519_v43 }
  0xcd   :  { %v1267_v48 = vpop.f32.mrf.mxu0  ;;  %v1299_v49 = vpop.f32.mrf.mxu1 }
  0xce   :  { %v1167_v50 = vpack.c.bf16 %v648_v44, %v648_v44  ;;  %v1199_v51 = vpack.c.bf16 %v680_v45, %v680_v45  ;;  %v646_v52 = vmax.f32 %v392_v46, 0.0  ;;  %v678_v53 = vmax.f32 %v520_v47, 0.0 }
  0xcf   :  { %v403_v54 = vadd.f32 %v1267_v48, %v1519_v37  ;;  %v531_v55 = vadd.f32 %v1299_v49, %v1519_v37  ;;  %v394_v56 = vpop.f32.mrf.mxu0  ;;  %v522_v57 = vpop.f32.mrf.mxu1 }
  0xd0   :  { %969 = vst.msk [vmem:[%s1844_s3 + $0x8] sm:$0xf] %vm966_vm3, %v1167_v50  ;;  %1001 = vst.msk [vmem:[%s1844_s3 + $0x88] sm:$0xf] %vm966_vm3, %v1199_v51  ;;  %v1165_v58 = vpack.c.bf16 %v646_v52, %v646_v52  ;;  %v1197_v59 = vpack.c.bf16 %v678_v53, %v678_v53  ;;  %v395_v60 = vadd.f32 %v1519_v37, %v394_v56 }
  0xd1   :  { %v523_v61 = vadd.f32 %v1519_v37, %v522_v57  ;;  %v649_v62 = vmax.f32 %v403_v54, 0.0  ;;  %v681_v63 = vmax.f32 %v531_v55, 0.0  ;;  %v1270_v0 = vpop.f32.mrf.mxu0  ;;  %v1302_v1 = vpop.f32.mrf.mxu1 }
  0xd2   :  { %967 = vst.msk [vmem:[%s1844_s3] sm:$0xf] %vm966_vm3, %v1165_v58  ;;  %999 = vst.msk [vmem:[%s1844_s3 + $0x80] sm:$0xf] %vm966_vm3, %v1197_v59  ;;  %v647_v2 = vmax.f32 %v395_v60, 0.0  ;;  %v416_v4 = vadd.f32 %v1270_v0, %v1519_v37  ;;  %v544_v5 = vadd.f32 %v1302_v1, %v1519_v37 }
  0xd3   :  { %v679_v3 = vmax.f32 %v523_v61, 0.0  ;;  %v1168_v6 = vpack.c.bf16 %v649_v62, %v649_v62  ;;  %v1200_v7 = vpack.c.bf16 %v681_v63, %v681_v63  ;;  %v407_v8 = vpop.f32.mrf.mxu0  ;;  %v535_v9 = vpop.f32.mrf.mxu1 }
  0xd4   :  { %v1166_v10 = vpack.c.bf16 %v647_v2, %v647_v2  ;;  %v652_v12 = vmax.f32 %v416_v4, 0.0  ;;  %v684_v13 = vmax.f32 %v544_v5, 0.0  ;;  %v408_v14 = vadd.f32 %v1519_v37, %v407_v8 }
  0xd5   :  { %v1198_v11 = vpack.c.bf16 %v679_v3, %v679_v3  ;;  %970 = vst.msk [vmem:[%s1844_s3 + $0xc] sm:$0xf] %vm966_vm3, %v1168_v6  ;;  %1002 = vst.msk [vmem:[%s1844_s3 + $0x8c] sm:$0xf] %vm966_vm3, %v1200_v7  ;;  %v536_v15 = vadd.f32 %v1519_v37, %v535_v9  ;;  %v1271_v16 = vpop.f32.mrf.mxu0  ;;  %v1303_v17 = vpop.f32.mrf.mxu1 }
  0xd6   :  { %968 = vst.msk [vmem:[%s1844_s3 + $0x4] sm:$0xf] %vm966_vm3, %v1166_v10  ;;  %v1171_v18 = vpack.c.bf16 %v652_v12, %v652_v12  ;;  %v1203_v19 = vpack.c.bf16 %v684_v13, %v684_v13  ;;  %v419_v20 = vadd.f32 %v1271_v16, %v1519_v37  ;;  %v547_v21 = vadd.f32 %v1303_v17, %v1519_v37 }
  0xd7   :  { %1000 = vst.msk [vmem:[%s1844_s3 + $0x84] sm:$0xf] %vm966_vm3, %v1198_v11  ;;  %v650_v22 = vmax.f32 %v408_v14, 0.0  ;;  %v682_v23 = vmax.f32 %v536_v15, 0.0  ;;  %v410_v24 = vpop.f32.mrf.mxu0  ;;  %v538_v25 = vpop.f32.mrf.mxu1 }
  0xd8   :  { %973 = vst.msk [vmem:[%s1844_s3 + $0x18] sm:$0xf] %vm966_vm3, %v1171_v18  ;;  %1005 = vst.msk [vmem:[%s1844_s3 + $0x98] sm:$0xf] %vm966_vm3, %v1203_v19  ;;  %v653_v26 = vmax.f32 %v419_v20, 0.0  ;;  %v685_v27 = vmax.f32 %v547_v21, 0.0  ;;  %v411_v28 = vadd.f32 %v1519_v37, %v410_v24  ;;  %v539_v29 = vadd.f32 %v1519_v37, %v538_v25 }
  0xd9   :  { %v1169_v30 = vpack.c.bf16 %v650_v22, %v650_v22  ;;  %v1201_v31 = vpack.c.bf16 %v682_v23, %v682_v23  ;;  %v1274_v32 = vpop.f32.mrf.mxu0  ;;  %v1306_v33 = vpop.f32.mrf.mxu1 }
  0xda   :  { %v1172_v34 = vpack.c.bf16 %v653_v26, %v653_v26  ;;  %v1204_v35 = vpack.c.bf16 %v685_v27, %v685_v27  ;;  %v651_v36 = vmax.f32 %v411_v28, 0.0  ;;  %v683_v38 = vmax.f32 %v539_v29, 0.0 }
  0xdb   :  { %971 = vst.msk [vmem:[%s1844_s3 + $0x10] sm:$0xf] %vm966_vm3, %v1169_v30  ;;  %1003 = vst.msk [vmem:[%s1844_s3 + $0x90] sm:$0xf] %vm966_vm3, %v1201_v31  ;;  %v432_v39 = vadd.f32 %v1274_v32, %v1519_v37  ;;  %v560_v40 = vadd.f32 %v1306_v33, %v1519_v37  ;;  %v423_v41 = vpop.f32.mrf.mxu0  ;;  %v551_v42 = vpop.f32.mrf.mxu1 }
  0xdc   :  { %974 = vst.msk [vmem:[%s1844_s3 + $0x1c] sm:$0xf] %vm966_vm3, %v1172_v34  ;;  %1006 = vst.msk [vmem:[%s1844_s3 + $0x9c] sm:$0xf] %vm966_vm3, %v1204_v35  ;;  %v1170_v43 = vpack.c.bf16 %v651_v36, %v651_v36  ;;  %v1202_v44 = vpack.c.bf16 %v683_v38, %v683_v38  ;;  %v424_v45 = vadd.f32 %v1519_v37, %v423_v41 }
  0xdd   :  { %v552_v46 = vadd.f32 %v1519_v37, %v551_v42  ;;  %v656_v47 = vmax.f32 %v432_v39, 0.0  ;;  %v688_v48 = vmax.f32 %v560_v40, 0.0  ;;  %v1275_v49 = vpop.f32.mrf.mxu0  ;;  %v1307_v50 = vpop.f32.mrf.mxu1 }
  0xde   :  { %972 = vst.msk [vmem:[%s1844_s3 + $0x14] sm:$0xf] %vm966_vm3, %v1170_v43  ;;  %1004 = vst.msk [vmem:[%s1844_s3 + $0x94] sm:$0xf] %vm966_vm3, %v1202_v44  ;;  %v654_v51 = vmax.f32 %v424_v45, 0.0  ;;  %v435_v53 = vadd.f32 %v1275_v49, %v1519_v37  ;;  %v563_v54 = vadd.f32 %v1307_v50, %v1519_v37 }
  0xdf   :  { %v686_v52 = vmax.f32 %v552_v46, 0.0  ;;  %v1175_v55 = vpack.c.bf16 %v656_v47, %v656_v47  ;;  %v1207_v56 = vpack.c.bf16 %v688_v48, %v688_v48  ;;  %v426_v57 = vpop.f32.mrf.mxu0  ;;  %v554_v58 = vpop.f32.mrf.mxu1 }
  0xe0   :  { %v1173_v59 = vpack.c.bf16 %v654_v51, %v654_v51  ;;  %v657_v61 = vmax.f32 %v435_v53, 0.0  ;;  %v689_v62 = vmax.f32 %v563_v54, 0.0  ;;  %v427_v63 = vadd.f32 %v1519_v37, %v426_v57 }
  0xe1   :  { %v1205_v60 = vpack.c.bf16 %v686_v52, %v686_v52  ;;  %977 = vst.msk [vmem:[%s1844_s3 + $0x28] sm:$0xf] %vm966_vm3, %v1175_v55  ;;  %1009 = vst.msk [vmem:[%s1844_s3 + $0xa8] sm:$0xf] %vm966_vm3, %v1207_v56  ;;  %v555_v0 = vadd.f32 %v1519_v37, %v554_v58  ;;  %v1278_v1 = vpop.f32.mrf.mxu0  ;;  %v1310_v2 = vpop.f32.mrf.mxu1 }
  0xe2   :  { %975 = vst.msk [vmem:[%s1844_s3 + $0x20] sm:$0xf] %vm966_vm3, %v1173_v59  ;;  %v1176_v3 = vpack.c.bf16 %v657_v61, %v657_v61  ;;  %v1208_v4 = vpack.c.bf16 %v689_v62, %v689_v62  ;;  %v448_v5 = vadd.f32 %v1278_v1, %v1519_v37  ;;  %v576_v6 = vadd.f32 %v1310_v2, %v1519_v37 }
  0xe3   :  { %1007 = vst.msk [vmem:[%s1844_s3 + $0xa0] sm:$0xf] %vm966_vm3, %v1205_v60  ;;  %v655_v7 = vmax.f32 %v427_v63, 0.0  ;;  %v687_v8 = vmax.f32 %v555_v0, 0.0  ;;  %v439_v9 = vpop.f32.mrf.mxu0  ;;  %v567_v10 = vpop.f32.mrf.mxu1 }
  0xe4   :  { %978 = vst.msk [vmem:[%s1844_s3 + $0x2c] sm:$0xf] %vm966_vm3, %v1176_v3  ;;  %1010 = vst.msk [vmem:[%s1844_s3 + $0xac] sm:$0xf] %vm966_vm3, %v1208_v4  ;;  %v660_v11 = vmax.f32 %v448_v5, 0.0  ;;  %v692_v12 = vmax.f32 %v576_v6, 0.0  ;;  %v440_v13 = vadd.f32 %v1519_v37, %v439_v9  ;;  %v568_v14 = vadd.f32 %v1519_v37, %v567_v10 }
  0xe5   :  { %v1174_v15 = vpack.c.bf16 %v655_v7, %v655_v7  ;;  %v1206_v16 = vpack.c.bf16 %v687_v8, %v687_v8  ;;  %v1279_v17 = vpop.f32.mrf.mxu0  ;;  %v1311_v18 = vpop.f32.mrf.mxu1 }
  0xe6   :  { %v1179_v19 = vpack.c.bf16 %v660_v11, %v660_v11  ;;  %v1211_v20 = vpack.c.bf16 %v692_v12, %v692_v12  ;;  %v658_v21 = vmax.f32 %v440_v13, 0.0  ;;  %v690_v22 = vmax.f32 %v568_v14, 0.0 }
  0xe7   :  { %976 = vst.msk [vmem:[%s1844_s3 + $0x24] sm:$0xf] %vm966_vm3, %v1174_v15  ;;  %1008 = vst.msk [vmem:[%s1844_s3 + $0xa4] sm:$0xf] %vm966_vm3, %v1206_v16  ;;  %v451_v23 = vadd.f32 %v1279_v17, %v1519_v37  ;;  %v579_v24 = vadd.f32 %v1311_v18, %v1519_v37  ;;  %v442_v25 = vpop.f32.mrf.mxu0  ;;  %v570_v26 = vpop.f32.mrf.mxu1 }
  0xe8   :  { %981 = vst.msk [vmem:[%s1844_s3 + $0x38] sm:$0xf] %vm966_vm3, %v1179_v19  ;;  %1013 = vst.msk [vmem:[%s1844_s3 + $0xb8] sm:$0xf] %vm966_vm3, %v1211_v20  ;;  %v1177_v27 = vpack.c.bf16 %v658_v21, %v658_v21  ;;  %v1209_v28 = vpack.c.bf16 %v690_v22, %v690_v22  ;;  %v443_v29 = vadd.f32 %v1519_v37, %v442_v25 }
  0xe9   :  { %v571_v30 = vadd.f32 %v1519_v37, %v570_v26  ;;  %v661_v31 = vmax.f32 %v451_v23, 0.0  ;;  %v693_v32 = vmax.f32 %v579_v24, 0.0  ;;  %v1282_v33 = vpop.f32.mrf.mxu0  ;;  %v1314_v34 = vpop.f32.mrf.mxu1 }
  0xea   :  { %979 = vst.msk [vmem:[%s1844_s3 + $0x30] sm:$0xf] %vm966_vm3, %v1177_v27  ;;  %1011 = vst.msk [vmem:[%s1844_s3 + $0xb0] sm:$0xf] %vm966_vm3, %v1209_v28  ;;  %v659_v35 = vmax.f32 %v443_v29, 0.0  ;;  %v464_v38 = vadd.f32 %v1282_v33, %v1519_v37  ;;  %v592_v39 = vadd.f32 %v1314_v34, %v1519_v37 }
  0xeb   :  { %v691_v36 = vmax.f32 %v571_v30, 0.0  ;;  %v1180_v40 = vpack.c.bf16 %v661_v31, %v661_v31  ;;  %v1212_v41 = vpack.c.bf16 %v693_v32, %v693_v32  ;;  %v455_v42 = vpop.f32.mrf.mxu0  ;;  %v583_v43 = vpop.f32.mrf.mxu1 }
  0xec   :  { %v1178_v44 = vpack.c.bf16 %v659_v35, %v659_v35  ;;  %v664_v46 = vmax.f32 %v464_v38, 0.0  ;;  %v696_v47 = vmax.f32 %v592_v39, 0.0  ;;  %v456_v48 = vadd.f32 %v1519_v37, %v455_v42 }
  0xed   :  { %v1210_v45 = vpack.c.bf16 %v691_v36, %v691_v36  ;;  %982 = vst.msk [vmem:[%s1844_s3 + $0x3c] sm:$0xf] %vm966_vm3, %v1180_v40  ;;  %1014 = vst.msk [vmem:[%s1844_s3 + $0xbc] sm:$0xf] %vm966_vm3, %v1212_v41  ;;  %v584_v49 = vadd.f32 %v1519_v37, %v583_v43  ;;  %v1283_v50 = vpop.f32.mrf.mxu0  ;;  %v1315_v51 = vpop.f32.mrf.mxu1 }
  0xee   :  { %980 = vst.msk [vmem:[%s1844_s3 + $0x34] sm:$0xf] %vm966_vm3, %v1178_v44  ;;  %v1183_v52 = vpack.c.bf16 %v664_v46, %v664_v46  ;;  %v1215_v53 = vpack.c.bf16 %v696_v47, %v696_v47  ;;  %v467_v54 = vadd.f32 %v1283_v50, %v1519_v37  ;;  %v595_v55 = vadd.f32 %v1315_v51, %v1519_v37 }
  0xef   :  { %1012 = vst.msk [vmem:[%s1844_s3 + $0xb4] sm:$0xf] %vm966_vm3, %v1210_v45  ;;  %v662_v56 = vmax.f32 %v456_v48, 0.0  ;;  %v694_v57 = vmax.f32 %v584_v49, 0.0  ;;  %v458_v58 = vpop.f32.mrf.mxu0  ;;  %v586_v59 = vpop.f32.mrf.mxu1 }
  0xf0   :  { %985 = vst.msk [vmem:[%s1844_s3 + $0x48] sm:$0xf] %vm966_vm3, %v1183_v52  ;;  %1017 = vst.msk [vmem:[%s1844_s3 + $0xc8] sm:$0xf] %vm966_vm3, %v1215_v53  ;;  %v665_v60 = vmax.f32 %v467_v54, 0.0  ;;  %v697_v61 = vmax.f32 %v595_v55, 0.0  ;;  %v459_v62 = vadd.f32 %v1519_v37, %v458_v58  ;;  %v587_v63 = vadd.f32 %v1519_v37, %v586_v59 }
  0xf1   :  { %v1181_v0 = vpack.c.bf16 %v662_v56, %v662_v56  ;;  %v1213_v1 = vpack.c.bf16 %v694_v57, %v694_v57  ;;  %v1286_v2 = vpop.f32.mrf.mxu0  ;;  %v1318_v3 = vpop.f32.mrf.mxu1 }
  0xf2   :  { %v1184_v4 = vpack.c.bf16 %v665_v60, %v665_v60  ;;  %v1216_v5 = vpack.c.bf16 %v697_v61, %v697_v61  ;;  %v663_v6 = vmax.f32 %v459_v62, 0.0  ;;  %v695_v7 = vmax.f32 %v587_v63, 0.0 }
  0xf3   :  { %983 = vst.msk [vmem:[%s1844_s3 + $0x40] sm:$0xf] %vm966_vm3, %v1181_v0  ;;  %1015 = vst.msk [vmem:[%s1844_s3 + $0xc0] sm:$0xf] %vm966_vm3, %v1213_v1  ;;  %v480_v8 = vadd.f32 %v1286_v2, %v1519_v37  ;;  %v608_v9 = vadd.f32 %v1318_v3, %v1519_v37  ;;  %v471_v10 = vpop.f32.mrf.mxu0  ;;  %v599_v11 = vpop.f32.mrf.mxu1 }
  0xf4   :  { %986 = vst.msk [vmem:[%s1844_s3 + $0x4c] sm:$0xf] %vm966_vm3, %v1184_v4  ;;  %1018 = vst.msk [vmem:[%s1844_s3 + $0xcc] sm:$0xf] %vm966_vm3, %v1216_v5  ;;  %v1182_v12 = vpack.c.bf16 %v663_v6, %v663_v6  ;;  %v1214_v13 = vpack.c.bf16 %v695_v7, %v695_v7  ;;  %v472_v14 = vadd.f32 %v1519_v37, %v471_v10 }
  0xf5   :  { %v600_v15 = vadd.f32 %v1519_v37, %v599_v11  ;;  %v668_v16 = vmax.f32 %v480_v8, 0.0  ;;  %v700_v17 = vmax.f32 %v608_v9, 0.0  ;;  %v1287_v18 = vpop.f32.mrf.mxu0  ;;  %v1319_v19 = vpop.f32.mrf.mxu1 }
  0xf6   :  { %984 = vst.msk [vmem:[%s1844_s3 + $0x44] sm:$0xf] %vm966_vm3, %v1182_v12  ;;  %1016 = vst.msk [vmem:[%s1844_s3 + $0xc4] sm:$0xf] %vm966_vm3, %v1214_v13  ;;  %v666_v20 = vmax.f32 %v472_v14, 0.0  ;;  %v483_v22 = vadd.f32 %v1287_v18, %v1519_v37  ;;  %v611_v23 = vadd.f32 %v1319_v19, %v1519_v37 }
  0xf7   :  { %v698_v21 = vmax.f32 %v600_v15, 0.0  ;;  %v1187_v24 = vpack.c.bf16 %v668_v16, %v668_v16  ;;  %v1219_v25 = vpack.c.bf16 %v700_v17, %v700_v17  ;;  %v474_v26 = vpop.f32.mrf.mxu0  ;;  %v602_v27 = vpop.f32.mrf.mxu1 }
  0xf8   :  { %v1185_v28 = vpack.c.bf16 %v666_v20, %v666_v20  ;;  %v669_v30 = vmax.f32 %v483_v22, 0.0  ;;  %v701_v31 = vmax.f32 %v611_v23, 0.0  ;;  %v475_v32 = vadd.f32 %v1519_v37, %v474_v26 }
  0xf9   :  { %v1217_v29 = vpack.c.bf16 %v698_v21, %v698_v21  ;;  %989 = vst.msk [vmem:[%s1844_s3 + $0x58] sm:$0xf] %vm966_vm3, %v1187_v24  ;;  %1021 = vst.msk [vmem:[%s1844_s3 + $0xd8] sm:$0xf] %vm966_vm3, %v1219_v25  ;;  %v603_v33 = vadd.f32 %v1519_v37, %v602_v27  ;;  %v1290_v34 = vpop.f32.mrf.mxu0  ;;  %v1322_v35 = vpop.f32.mrf.mxu1 }
  0xfa   :  { %987 = vst.msk [vmem:[%s1844_s3 + $0x50] sm:$0xf] %vm966_vm3, %v1185_v28  ;;  %v1188_v36 = vpack.c.bf16 %v669_v30, %v669_v30  ;;  %v1220_v38 = vpack.c.bf16 %v701_v31, %v701_v31  ;;  %v496_v39 = vadd.f32 %v1290_v34, %v1519_v37  ;;  %v624_v40 = vadd.f32 %v1322_v35, %v1519_v37 }
  0xfb   :  { %1019 = vst.msk [vmem:[%s1844_s3 + $0xd0] sm:$0xf] %vm966_vm3, %v1217_v29  ;;  %v667_v41 = vmax.f32 %v475_v32, 0.0  ;;  %v699_v42 = vmax.f32 %v603_v33, 0.0  ;;  %v487_v43 = vpop.f32.mrf.mxu0  ;;  %v615_v44 = vpop.f32.mrf.mxu1 }
  0xfc   :  { %990 = vst.msk [vmem:[%s1844_s3 + $0x5c] sm:$0xf] %vm966_vm3, %v1188_v36  ;;  %1022 = vst.msk [vmem:[%s1844_s3 + $0xdc] sm:$0xf] %vm966_vm3, %v1220_v38  ;;  %v672_v45 = vmax.f32 %v496_v39, 0.0  ;;  %v704_v46 = vmax.f32 %v624_v40, 0.0  ;;  %v488_v47 = vadd.f32 %v1519_v37, %v487_v43  ;;  %v616_v48 = vadd.f32 %v1519_v37, %v615_v44 }
  0xfd   :  { %v1186_v49 = vpack.c.bf16 %v667_v41, %v667_v41  ;;  %v1218_v50 = vpack.c.bf16 %v699_v42, %v699_v42  ;;  %v1291_v51 = vpop.f32.mrf.mxu0  ;;  %v1323_v52 = vpop.f32.mrf.mxu1 }
  0xfe   :  { %v1191_v53 = vpack.c.bf16 %v672_v45, %v672_v45  ;;  %v1223_v54 = vpack.c.bf16 %v704_v46, %v704_v46  ;;  %v670_v55 = vmax.f32 %v488_v47, 0.0  ;;  %v702_v56 = vmax.f32 %v616_v48, 0.0 }
  0xff   :  { %988 = vst.msk [vmem:[%s1844_s3 + $0x54] sm:$0xf] %vm966_vm3, %v1186_v49  ;;  %1020 = vst.msk [vmem:[%s1844_s3 + $0xd4] sm:$0xf] %vm966_vm3, %v1218_v50  ;;  %v499_v57 = vadd.f32 %v1291_v51, %v1519_v37  ;;  %v627_v58 = vadd.f32 %v1323_v52, %v1519_v37  ;;  %v490_v59 = vpop.f32.mrf.mxu0  ;;  %v618_v60 = vpop.f32.mrf.mxu1 }
 0x100   :  { %993 = vst.msk [vmem:[%s1844_s3 + $0x68] sm:$0xf] %vm966_vm3, %v1191_v53  ;;  %1025 = vst.msk [vmem:[%s1844_s3 + $0xe8] sm:$0xf] %vm966_vm3, %v1223_v54  ;;  %v1189_v61 = vpack.c.bf16 %v670_v55, %v670_v55  ;;  %v1221_v62 = vpack.c.bf16 %v702_v56, %v702_v56  ;;  %v491_v63 = vadd.f32 %v1519_v37, %v490_v59 }
 0x101   :  { %v619_v0 = vadd.f32 %v1519_v37, %v618_v60  ;;  %v673_v1 = vmax.f32 %v499_v57, 0.0  ;;  %v705_v2 = vmax.f32 %v627_v58, 0.0  ;;  %v1294_v3 = vpop.f32.mrf.mxu0  ;;  %v1326_v4 = vpop.f32.mrf.mxu1 }
 0x102   :  { %991 = vst.msk [vmem:[%s1844_s3 + $0x60] sm:$0xf] %vm966_vm3, %v1189_v61  ;;  %1023 = vst.msk [vmem:[%s1844_s3 + $0xe0] sm:$0xf] %vm966_vm3, %v1221_v62  ;;  %v671_v5 = vmax.f32 %v491_v63, 0.0  ;;  %v512_v7 = vadd.f32 %v1294_v3, %v1519_v37  ;;  %v640_v8 = vadd.f32 %v1326_v4, %v1519_v37 }
 0x103   :  { %v703_v6 = vmax.f32 %v619_v0, 0.0  ;;  %v1192_v9 = vpack.c.bf16 %v673_v1, %v673_v1  ;;  %v1224_v10 = vpack.c.bf16 %v705_v2, %v705_v2  ;;  %v503_v11 = vpop.f32.mrf.mxu0  ;;  %v631_v12 = vpop.f32.mrf.mxu1 }
 0x104   :  { %v1190_v13 = vpack.c.bf16 %v671_v5, %v671_v5  ;;  %v676_v15 = vmax.f32 %v512_v7, 0.0  ;;  %v708_v16 = vmax.f32 %v640_v8, 0.0  ;;  %v504_v17 = vadd.f32 %v1519_v37, %v503_v11 }
 0x105   :  { %v1222_v14 = vpack.c.bf16 %v703_v6, %v703_v6  ;;  %994 = vst.msk [vmem:[%s1844_s3 + $0x6c] sm:$0xf] %vm966_vm3, %v1192_v9  ;;  %1026 = vst.msk [vmem:[%s1844_s3 + $0xec] sm:$0xf] %vm966_vm3, %v1224_v10  ;;  %v632_v18 = vadd.f32 %v1519_v37, %v631_v12  ;;  %v1295_v19 = vpop.f32.mrf.mxu0  ;;  %v1327_v20 = vpop.f32.mrf.mxu1 }
 0x106   :  { %992 = vst.msk [vmem:[%s1844_s3 + $0x64] sm:$0xf] %vm966_vm3, %v1190_v13  ;;  %v1195_v21 = vpack.c.bf16 %v676_v15, %v676_v15  ;;  %v1227_v22 = vpack.c.bf16 %v708_v16, %v708_v16  ;;  %v515_v23 = vadd.f32 %v1295_v19, %v1519_v37  ;;  %v643_v24 = vadd.f32 %v1327_v20, %v1519_v37 }
 0x107   :  { %1024 = vst.msk [vmem:[%s1844_s3 + $0xe4] sm:$0xf] %vm966_vm3, %v1222_v14  ;;  %v674_v25 = vmax.f32 %v504_v17, 0.0  ;;  %v706_v26 = vmax.f32 %v632_v18, 0.0  ;;  %v506_v27 = vpop.f32.mrf.mxu0  ;;  %v634_v28 = vpop.f32.mrf.mxu1 }
 0x108   :  { %997 = vst.msk [vmem:[%s1844_s3 + $0x78] sm:$0xf] %vm966_vm3, %v1195_v21  ;;  %1029 = vst.msk [vmem:[%s1844_s3 + $0xf8] sm:$0xf] %vm966_vm3, %v1227_v22  ;;  %v677_v29 = vmax.f32 %v515_v23, 0.0  ;;  %v709_v30 = vmax.f32 %v643_v24, 0.0  ;;  %v507_v31 = vadd.f32 %v1519_v37, %v506_v27  ;;  %v635_v32 = vadd.f32 %v1519_v37, %v634_v28 }
 0x109   :  { %v1193_v33 = vpack.c.bf16 %v674_v25, %v674_v25  ;;  %v1225_v34 = vpack.c.bf16 %v706_v26, %v706_v26 }
 0x10a   :  { %v1196_v35 = vpack.c.bf16 %v677_v29, %v677_v29  ;;  %v1228_v36 = vpack.c.bf16 %v709_v30, %v709_v30  ;;  %v675_v38 = vmax.f32 %v507_v31, 0.0  ;;  %v707_v39 = vmax.f32 %v635_v32, 0.0 }
 0x10b   :  { %995 = vst.msk [vmem:[%s1844_s3 + $0x70] sm:$0xf] %vm966_vm3, %v1193_v33  ;;  %1027 = vst.msk [vmem:[%s1844_s3 + $0xf0] sm:$0xf] %vm966_vm3, %v1225_v34 }
 0x10c   :  { %998 = vst.msk [vmem:[%s1844_s3 + $0x7c] sm:$0xf] %vm966_vm3, %v1196_v35  ;;  %1030 = vst.msk [vmem:[%s1844_s3 + $0xfc] sm:$0xf] %vm966_vm3, %v1228_v36  ;;  %v1194_v37 = vpack.c.bf16 %v675_v38, %v675_v38  ;;  %v1226_v40 = vpack.c.bf16 %v707_v39, %v707_v39 }
 0x10e   :  { %996 = vst.msk [vmem:[%s1844_s3 + $0x74] sm:$0xf] %vm966_vm3, %v1194_v37  ;;  %1028 = vst.msk [vmem:[%s1844_s3 + $0xf4] sm:$0xf] %vm966_vm3, %v1226_v40 }

// kernel: vae_forward.8
= control target key start
LH: loop header
LB: loop body
LE: loop exit
PB: predicated region body
PF: predicated region fallthrough
CT: control target
= control target key end

     0   :  { %vm318_vm0 = vcmask 261120   ;;  %vm617_vm1 = vcmask 519168   ;;  %s1144_s1 = inlined_call_operand.vmem [shape: bf16[288,64], index: 1, kind: input, shape index: {}]   ;;  %s1145_s0 = inlined_call_operand.vmem [shape: bf16[128,288], index: 0, kind: input, shape index: {}]   ;;  %s1146_s2 = inlined_call_operand.vmem [shape: f32[1,64], index: 2, kind: input, shape index: {}]   ;;  %s1147_s3 = inlined_call_operand.vmem [shape: bf16[128,64], index: 3, kind: output, shape index: {}]  }
   0x1   :  { %v831_v0 = vld [vmem:[%s1144_s1 + $0x78] sm:$0xff]   ;;  %v833_v2 = vld [vmem:[%s1144_s1 + $0x70] sm:$0xff]   ;;  %v835_v4 = vld [vmem:[%s1144_s1 + $0x68] sm:$0xff]  }
   0x2   :  { %v832_v1 = vld [vmem:[%s1144_s1 + $0x38] sm:$0xff]   ;;  %721 = vmatprep.subr.bf16.mxu0 %v831_v0  ;;  %815 = vmatprep.subr.bf16.mxu1 %v831_v0  ;;  %v834_v3 = vld [vmem:[%s1144_s1 + $0x30] sm:$0xff]   ;;  %v836_v5 = vld [vmem:[%s1144_s1 + $0x28] sm:$0xff]  }
   0x3   :  { %722 = vmatpush3.bf16.msra.mxu0 %v832_v1  ;;  %823 = vmatpush3.bf16.msra.mxu1 %v832_v1  ;;  %v837_v6 = vld [vmem:[%s1144_s1 + $0x60] sm:$0xff]   ;;  %v839_v8 = vld [vmem:[%s1144_s1 + $0x58] sm:$0xff]   ;;  %v841_v10 = vld [vmem:[%s1144_s1 + $0x50] sm:$0xff]  }
   0x4   :  { %723 = vmatprep.subr.bf16.mxu0 %v833_v2  ;;  %816 = vmatprep.subr.bf16.mxu1 %v833_v2  ;;  %v838_v7 = vld [vmem:[%s1144_s1 + $0x20] sm:$0xff]   ;;  %v840_v9 = vld [vmem:[%s1144_s1 + $0x18] sm:$0xff]   ;;  %v842_v13 = vld [vmem:[%s1144_s1 + $0x10] sm:$0xff]  }
   0x5   :  { %v849_v11 = vld [vmem:[%s1145_s0 + $0x4] ss:$12 sps:$4 sm:$0xff]   ;;  %v852_v12 = vld [vmem:[%s1145_s0 + $0x94] ss:$12 sps:$4 sm:$0xff]   ;;  %v843_v14 = vld [vmem:[%s1144_s1 + $0x48] sm:$0xff]  }
   0x6   :  { %375 = vmatprep.mubr.bf16.mxu0 %v849_v11  ;;  %423 = vmatprep.mubr.bf16.mxu1 %v852_v12  ;;  %v844_v15 = vld [vmem:[%s1144_s1 + $0x8] sm:$0xff]   ;;  %v845_v16 = vld [vmem:[%s1144_s1 + $0x40] sm:$0xff]   ;;  %v850_v20 = vld [vmem:[%s1145_s0 + $0x90] ss:$12 sps:$4 sm:$0xff]  }
   0x7   :  { %724 = vmatpush3.bf16.msra.mxu0 %v834_v3  ;;  %824 = vmatpush3.bf16.msra.mxu1 %v834_v3  ;;  %v846_v17 = vld [vmem:[%s1144_s1] sm:$0xff]   ;;  %v853_v19 = vld [vmem:[%s1144_s1 + $0x88] sm:$0xff]   ;;  %v864_v28 = vld [vmem:[%s1145_s0 + $0x30] ss:$12 sps:$4 sm:$0xff]  }
   0x8   :  { %725 = vmatprep.subr.bf16.mxu0 %v835_v4  ;;  %817 = vmatprep.subr.bf16.mxu1 %v835_v4  ;;  %v847_v18 = vld [vmem:[%s1145_s0] ss:$12 sps:$4 sm:$0xff]   ;;  %v854_v21 = vld [vmem:[%s1145_s0 + $0x1c] ss:$12 sps:$4 sm:$0xff]   ;;  %v858_v24 = vld [vmem:[%s1145_s0 + $0x18] ss:$12 sps:$4 sm:$0xff]  }
   0x9   :  { %v856_v22 = vld [vmem:[%s1145_s0 + $0xac] ss:$12 sps:$4 sm:$0xff]   ;;  %v860_v23 = vld [vmem:[%s1144_s1 + $0x80] sm:$0xff]   ;;  %v859_v25 = vld [vmem:[%s1145_s0 + $0xa8] ss:$12 sps:$4 sm:$0xff]  }
   0xa   :  { %v861_v26 = vld [vmem:[%s1145_s0 + $0x34] ss:$12 sps:$4 sm:$0xff]   ;;  %v866_v30 = vld [vmem:[%s1145_s0 + $0x4c] ss:$12 sps:$4 sm:$0xff]   ;;  %v870_v33 = vld [vmem:[%s1145_s0 + $0x50] ss:$12 sps:$4 sm:$0xff]  }
   0xb   :  { %726 = vmatpush3.bf16.msra.mxu0 %v836_v5  ;;  %825 = vmatpush3.bf16.msra.mxu1 %v836_v5  ;;  %v863_v27 = vld [vmem:[%s1145_s0 + $0x8] ss:$12 sps:$4 sm:$0xff]   ;;  %v865_v29 = vld [vmem:[%s1145_s0 + $0x20] ss:$12 sps:$4 sm:$0xff]   ;;  %v868_v31 = vld [vmem:[%s1145_s0 + $0x38] ss:$12 sps:$4 sm:$0xff]  }
   0xc   :  { %727 = vmatprep.subr.bf16.mxu0 %v837_v6  ;;  %818 = vmatprep.subr.bf16.mxu1 %v837_v6  ;;  %v869_v32 = vld [vmem:[%s1145_s0 + $0x48] ss:$12 sps:$4 sm:$0xff]   ;;  %v871_v34 = vld [vmem:[%s1145_s0 + $0x64] ss:$12 sps:$4 sm:$0xff]   ;;  %v874_v36 = vld [vmem:[%s1145_s0 + $0x60] ss:$12 sps:$4 sm:$0xff]  }
   0xd   :  { %v873_v35 = vld [vmem:[%s1145_s0 + $0x68] ss:$12 sps:$4 sm:$0xff]   ;;  %v875_v37 = vld [vmem:[%s1145_s0 + $0x80] ss:$12 sps:$4 sm:$0xff]   ;;  %v878_v39 = vld [vmem:[%s1145_s0 + $0x98] ss:$12 sps:$4 sm:$0xff]  }
   0xe   :  { %v876_v38 = vld [vmem:[%s1145_s0 + $0x7c] ss:$12 sps:$4 sm:$0xff]   ;;  %v879_v40 = vld [vmem:[%s1145_s0 + $0x78] ss:$12 sps:$4 sm:$0xff]   ;;  %v1054_v60 = vld [vmem:[%s1146_s2] ss:$0 sm:$0xff] }
   0xf   :  { %728 = vmatpush3.bf16.msra.mxu0 %v838_v7  ;;  %826 = vmatpush3.bf16.msra.mxu1 %v838_v7  ;;  %v880_v41 = vld [vmem:[%s1145_s0 + $0xb0] ss:$12 sps:$4 sm:$0xff]  }
  0x10   :  { %729 = vmatprep.subr.bf16.mxu0 %v839_v8  ;;  %819 = vmatprep.subr.bf16.mxu1 %v839_v8 }
  0x13   :  { %730 = vmatpush3.bf16.msra.mxu0 %v840_v9  ;;  %827 = vmatpush3.bf16.msra.mxu1 %v840_v9 }
  0x14   :  { %731 = vmatprep.subr.bf16.mxu0 %v841_v10  ;;  %820 = vmatprep.subr.bf16.mxu1 %v841_v10 }
  0x17   :  { %732 = vmatpush3.bf16.msra.mxu0 %v842_v13  ;;  %828 = vmatpush3.bf16.msra.mxu1 %v842_v13 }
  0x18   :  { %733 = vmatprep.subr.bf16.mxu0 %v843_v14  ;;  %821 = vmatprep.subr.bf16.mxu1 %v843_v14 }
  0x1b   :  { %734 = vmatpush3.bf16.msra.mxu0 %v844_v15  ;;  %829 = vmatpush3.bf16.msra.mxu1 %v844_v15 }
  0x1c   :  { %735 = vmatprep.subr.bf16.mxu0 %v845_v16  ;;  %822 = vmatprep.subr.bf16.mxu1 %v845_v16 }
  0x1f   :  { %736 = vmatpush3.bf16.msra.mxu0 %v846_v17  ;;  %830 = vmatpush3.bf16.msra.mxu1 %v846_v17 }
  0x20   :  { %795 = vmatprep.subr.bf16.mxu1 %v853_v19 }
  0x22   :  { %376 = vmatmul.mubr.bf16.vlgmr.msra.gmra.mxu0 %v847_v18  ;;  %424 = vmatmul.mubr.bf16.vlgmr.msra.gmra.mxu1 %v850_v20 }
  0x23   :  { %796 = vmatpush3.bf16.msra.mxu1 %v853_v19  ;;  %383 = vmatprep.mubr.bf16.mxu0 %v854_v21 }
  0x24   :  { %431 = vmatprep.mubr.bf16.mxu1 %v856_v22  ;;  %797 = vmatprep.subr.bf16.mxu1 %v860_v23 }
  0x27   :  { %798 = vmatpush3.bf16.msra.mxu1 %v860_v23 }
  0x2a   :  { %384 = vmatmul.mubr.bf16.gmra.mxu0 %v858_v24  ;;  %432 = vmatmul.mubr.bf16.gmra.mxu1 %v859_v25 }
  0x2b   :  { %391 = vmatprep.mubr.bf16.mxu0 %v861_v26  ;;  %799 = vmatprep.mubr.msk.bf16.mxu1 %vm318_vm0, %v863_v27 }
  0x32   :  { %392 = vmatmul.mubr.bf16.gmra.mxu0 %v864_v28  ;;  %800 = vmatmul.mubr.msk.bf16.vlgmr.msra.gmra.mxu1 %vm318_vm0, %v865_v29 }
  0x33   :  { %399 = vmatprep.mubr.bf16.mxu0 %v866_v30  ;;  %803 = vmatprep.mubr.msk.bf16.mxu1 %vm318_vm0, %v868_v31 }
  0x3a   :  { %400 = vmatmul.mubr.bf16.gmra.mxu0 %v869_v32  ;;  %804 = vmatmul.mubr.msk.bf16.gmra.mxu1 %vm318_vm0, %v870_v33 }
  0x3b   :  { %407 = vmatprep.mubr.bf16.mxu0 %v871_v34  ;;  %807 = vmatprep.mubr.msk.bf16.mxu1 %vm318_vm0, %v873_v35 }
  0x42   :  { %408 = vmatmul.mubr.bf16.gmra.mxu0 %v874_v36  ;;  %808 = vmatmul.mubr.msk.bf16.gmra.mxu1 %vm318_vm0, %v875_v37 }
  0x43   :  { %415 = vmatprep.mubr.bf16.mxu0 %v876_v38  ;;  %811 = vmatprep.mubr.msk.bf16.mxu1 %vm318_vm0, %v878_v39 }
  0x4a   :  { %416 = vmatmul.mubr.bf16.gmra.mxu0 %v879_v40  ;;  %812 = vmatmul.mubr.msk.bf16.gmra.mxu1 %vm318_vm0, %v880_v41 }
  0xe2   :  { %v737_v42 = vpop.f32.mrf.mxu0  ;;  %v1035_v43 = vpop.f32.mrf.mxu1 }
  0xe4   :  { %v738_v44 = vpop.f32.mrf.mxu0  ;;  %v1037_v45 = vpop.f32.mrf.mxu1 }
  0xe5   :  { %v739_v57 = vadd.f32 %v738_v44, %v737_v42 }
  0xe6   :  { %v740_v46 = vpop.f32.mrf.mxu0  ;;  %v1039_v47 = vpop.f32.mrf.mxu1 }
  0xe7   :  { %v378_v3 = vadd.f32 %v739_v57, %v1054_v60 }
  0xe8   :  { %v741_v48 = vpop.f32.mrf.mxu0  ;;  %v1041_v49 = vpop.f32.mrf.mxu1 }
  0xe9   :  { %v742_v63 = vadd.f32 %v741_v48, %v740_v46 }
  0xea   :  { %v743_v50 = vpop.f32.mrf.mxu0  ;;  %v1043_v51 = vpop.f32.mrf.mxu1 }
  0xeb   :  { %v381_v11 = vadd.f32 %v742_v63, %v1054_v60 }
  0xec   :  { %v744_v52 = vpop.f32.mrf.mxu0  ;;  %v1045_v53 = vpop.f32.mrf.mxu1 }
  0xed   :  { %v745_v54 = vadd.f32 %v744_v52, %v743_v50 }
  0xee   :  { %v746_v55 = vpop.f32.mrf.mxu0  ;;  %v1047_v56 = vpop.f32.mrf.mxu1 }
  0xef   :  { %v386_v62 = vadd.f32 %v745_v54, %v1054_v60  ;;  %v781_v54 = vadd.f32 %v1045_v53, %v1043_v51  ;;  %v775_v53 = vadd.f32 %v1037_v45, %v1035_v43 }
  0xf0   :  { %v747_v58 = vpop.f32.mrf.mxu0  ;;  %v1049_v59 = vpop.f32.mrf.mxu1 }
  0xf1   :  { %v748_v61 = vadd.f32 %v747_v58, %v746_v55 }
  0xf2   :  { %v749_v0 = vpop.f32.mrf.mxu0  ;;  %v801_v1 = vpop.f32.mrf.mxu1 }
  0xf3   :  { %v483_v2 = vadd.f32 %v801_v1, %v386_v62  ;;  %v389_v8 = vadd.f32 %v748_v61, %v1054_v60 }
  0xf4   :  { %v750_v4 = vpop.f32.mrf.mxu0  ;;  %v474_v5 = vpop.f32.mrf.mxu1 }
  0xf5   :  { %v539_v6 = vmax.f32 %v483_v2, 0.0  ;;  %v475_v7 = vadd.f32 %v474_v5, %v378_v3  ;;  %v751_v13 = vadd.f32 %v750_v4, %v749_v0  ;;  %v784_v3 = vadd.f32 %v1049_v59, %v1047_v56 }
  0xf6   :  { %v752_v9 = vpop.f32.mrf.mxu0  ;;  %v802_v10 = vpop.f32.mrf.mxu1  ;;  %v778_v56 = vadd.f32 %v1041_v49, %v1039_v47 }
  0xf7   :  { %v707_v12 = vpack.c.bf16 %v539_v6, %v539_v6  ;;  %v537_v14 = vmax.f32 %v475_v7, 0.0  ;;  %v486_v15 = vadd.f32 %v802_v10, %v389_v8  ;;  %v394_v26 = vadd.f32 %v751_v13, %v1054_v60 }
  0xf8   :  { %v753_v16 = vpop.f32.mrf.mxu0  ;;  %v477_v17 = vpop.f32.mrf.mxu1  ;;  %v426_v13 = vadd.f32 %v775_v53, %v1054_v60 }
  0xf9   :  { %620 = vst.msk [vmem:[%s1147_s3 + $0x8] sm:$0xf] %vm617_vm1, %v707_v12  ;;  %v705_v18 = vpack.c.bf16 %v537_v14, %v537_v14  ;;  %v540_v19 = vmax.f32 %v486_v15, 0.0  ;;  %v478_v20 = vadd.f32 %v477_v17, %v381_v11  ;;  %v754_v24 = vadd.f32 %v753_v16, %v752_v9 }
  0xfa   :  { %v755_v21 = vpop.f32.mrf.mxu0  ;;  %v805_v22 = vpop.f32.mrf.mxu1  ;;  %v434_v9 = vadd.f32 %v781_v54, %v1054_v60  ;;  %v437_v15 = vadd.f32 %v784_v3, %v1054_v60 }
  0xfb   :  { %618 = vst.msk [vmem:[%s1147_s3] sm:$0xf] %vm617_vm1, %v705_v18  ;;  %v708_v23 = vpack.c.bf16 %v540_v19, %v540_v19  ;;  %v538_v25 = vmax.f32 %v478_v20, 0.0  ;;  %v397_v36 = vadd.f32 %v754_v24, %v1054_v60 }
  0xfc   :  { %v756_v27 = vpop.f32.mrf.mxu0  ;;  %v490_v28 = vpop.f32.mrf.mxu1 }
  0xfd   :  { %621 = vst.msk [vmem:[%s1147_s3 + $0xc] sm:$0xf] %vm617_vm1, %v708_v23  ;;  %v706_v29 = vpack.c.bf16 %v538_v25, %v538_v25  ;;  %v757_v30 = vadd.f32 %v756_v27, %v755_v21  ;;  %v491_v31 = vadd.f32 %v490_v28, %v394_v26  ;;  %v429_v27 = vadd.f32 %v778_v56, %v1054_v60 }
  0xfe   :  { %v758_v32 = vpop.f32.mrf.mxu0  ;;  %v806_v33 = vpop.f32.mrf.mxu1 }
  0xff   :  { %619 = vst.msk [vmem:[%s1147_s3 + $0x4] sm:$0xf] %vm617_vm1, %v706_v29  ;;  %v402_v34 = vadd.f32 %v757_v30, %v1054_v60  ;;  %v541_v35 = vmax.f32 %v491_v31, 0.0 }
 0x100   :  { %v759_v37 = vpop.f32.mrf.mxu0  ;;  %v493_v38 = vpop.f32.mrf.mxu1 }
 0x101   :  { %v499_v39 = vadd.f32 %v805_v22, %v402_v34  ;;  %v709_v40 = vpack.c.bf16 %v541_v35, %v541_v35  ;;  %v760_v41 = vadd.f32 %v759_v37, %v758_v32  ;;  %v494_v42 = vadd.f32 %v493_v38, %v397_v36 }
 0x102   :  { %v761_v44 = vpop.f32.mrf.mxu0  ;;  %v809_v46 = vpop.f32.mrf.mxu1 }
 0x103   :  { %v543_v48 = vmax.f32 %v499_v39, 0.0  ;;  %622 = vst.msk [vmem:[%s1147_s3 + $0x10] sm:$0xf] %vm617_vm1, %v709_v40  ;;  %v405_v50 = vadd.f32 %v760_v41, %v1054_v60  ;;  %v542_v52 = vmax.f32 %v494_v42, 0.0 }
 0x104   :  { %v762_v55 = vpop.f32.mrf.mxu0  ;;  %v506_v57 = vpop.f32.mrf.mxu1 }
 0x105   :  { %v711_v58 = vpack.c.bf16 %v543_v48, %v543_v48  ;;  %v502_v61 = vadd.f32 %v806_v33, %v405_v50  ;;  %v710_v62 = vpack.c.bf16 %v542_v52, %v542_v52  ;;  %v763_v63 = vadd.f32 %v762_v55, %v761_v44 }
 0x106   :  { %v764_v0 = vpop.f32.mrf.mxu0  ;;  %v810_v1 = vpop.f32.mrf.mxu1 }
 0x107   :  { %624 = vst.msk [vmem:[%s1147_s3 + $0x18] sm:$0xf] %vm617_vm1, %v711_v58  ;;  %v544_v2 = vmax.f32 %v502_v61, 0.0  ;;  %623 = vst.msk [vmem:[%s1147_s3 + $0x14] sm:$0xf] %vm617_vm1, %v710_v62  ;;  %v410_v51 = vadd.f32 %v763_v63, %v1054_v60 }
 0x108   :  { %v765_v4 = vpop.f32.mrf.mxu0  ;;  %v509_v5 = vpop.f32.mrf.mxu1 }
 0x109   :  { %v712_v6 = vpack.c.bf16 %v544_v2, %v544_v2  ;;  %v507_v7 = vadd.f32 %v506_v57, %v410_v51  ;;  %v766_v8 = vadd.f32 %v765_v4, %v764_v0 }
 0x10a   :  { %v767_v10 = vpop.f32.mrf.mxu0  ;;  %v813_v11 = vpop.f32.mrf.mxu1 }
 0x10b   :  { %625 = vst.msk [vmem:[%s1147_s3 + $0x1c] sm:$0xf] %vm617_vm1, %v712_v6  ;;  %v545_v12 = vmax.f32 %v507_v7, 0.0  ;;  %v413_v43 = vadd.f32 %v766_v8, %v1054_v60  ;;  %v531_v45 = vadd.f32 %v813_v11, %v434_v9 }
 0x10c   :  { %v768_v59 = vpop.f32.mrf.mxu0  ;;  %v522_v14 = vpop.f32.mrf.mxu1 }
 0x10d   :  { %v713_v16 = vpack.c.bf16 %v545_v12, %v545_v12  ;;  %v510_v17 = vadd.f32 %v509_v5, %v413_v43  ;;  %v551_v18 = vmax.f32 %v531_v45, 0.0  ;;  %v769_v19 = vadd.f32 %v768_v59, %v767_v10 }
 0x10e   :  { %v523_v20 = vadd.f32 %v522_v14, %v426_v13  ;;  %v770_v21 = vpop.f32.mrf.mxu0  ;;  %v814_v22 = vpop.f32.mrf.mxu1 }
 0x10f   :  { %626 = vst.msk [vmem:[%s1147_s3 + $0x20] sm:$0xf] %vm617_vm1, %v713_v16  ;;  %v546_v23 = vmax.f32 %v510_v17, 0.0  ;;  %v719_v47 = vpack.c.bf16 %v551_v18, %v551_v18  ;;  %v418_v49 = vadd.f32 %v769_v19, %v1054_v60  ;;  %v534_v24 = vadd.f32 %v814_v22, %v437_v15 }
 0x110   :  { %v549_v25 = vmax.f32 %v523_v20, 0.0  ;;  %v771_v26 = vpop.f32.mrf.mxu0  ;;  %v525_v28 = vpop.f32.mrf.mxu1 }
 0x111   :  { %v714_v29 = vpack.c.bf16 %v546_v23, %v546_v23  ;;  %632 = vst.msk [vmem:[%s1147_s3 + $0x38] sm:$0xf] %vm617_vm1, %v719_v47  ;;  %v515_v30 = vadd.f32 %v809_v46, %v418_v49  ;;  %v552_v31 = vmax.f32 %v534_v24, 0.0  ;;  %v772_v32 = vadd.f32 %v771_v26, %v770_v21 }
 0x112   :  { %v717_v33 = vpack.c.bf16 %v549_v25, %v549_v25  ;;  %v526_v34 = vadd.f32 %v525_v28, %v429_v27 }
 0x113   :  { %627 = vst.msk [vmem:[%s1147_s3 + $0x24] sm:$0xf] %vm617_vm1, %v714_v29  ;;  %v547_v35 = vmax.f32 %v515_v30, 0.0  ;;  %v720_v36 = vpack.c.bf16 %v552_v31, %v552_v31  ;;  %v421_v37 = vadd.f32 %v772_v32, %v1054_v60 }
 0x114   :  { %630 = vst.msk [vmem:[%s1147_s3 + $0x30] sm:$0xf] %vm617_vm1, %v717_v33  ;;  %v550_v38 = vmax.f32 %v526_v34, 0.0 }
 0x115   :  { %v715_v39 = vpack.c.bf16 %v547_v35, %v547_v35  ;;  %633 = vst.msk [vmem:[%s1147_s3 + $0x3c] sm:$0xf] %vm617_vm1, %v720_v36  ;;  %v518_v40 = vadd.f32 %v810_v1, %v421_v37 }
 0x116   :  { %v718_v41 = vpack.c.bf16 %v550_v38, %v550_v38 }
 0x117   :  { %628 = vst.msk [vmem:[%s1147_s3 + $0x28] sm:$0xf] %vm617_vm1, %v715_v39  ;;  %v548_v60 = vmax.f32 %v518_v40, 0.0 }
 0x118   :  { %631 = vst.msk [vmem:[%s1147_s3 + $0x34] sm:$0xf] %vm617_vm1, %v718_v41 }
 0x119   :  { %v716_v42 = vpack.c.bf16 %v548_v60, %v548_v60 }
 0x11b   :  { %629 = vst.msk [vmem:[%s1147_s3 + $0x2c] sm:$0xf] %vm617_vm1, %v716_v42 }

// kernel: vae_forward.9
= control target key start
LH: loop header
LB: loop body
LE: loop exit
PB: predicated region body
PF: predicated region fallthrough
CT: control target
= control target key end

     0   :  { %vm372_vm0 = vcmask 523264   ;;  %s884_s1 = inlined_call_operand.vmem [shape: bf16[576,128], index: 1, kind: input, shape index: {}]   ;;  %s885_s0 = inlined_call_operand.vmem [shape: bf16[32,576], index: 0, kind: input, shape index: {}]   ;;  %s886_s2 = inlined_call_operand.vmem [shape: f32[1,128], index: 2, kind: input, shape index: {}]   ;;  %s887_s3 = inlined_call_operand.vmem [shape: f32[32,128], index: 3, kind: output, shape index: {}]  }
   0x1   :  { %v661_v0 = vld [vmem:[%s884_s1 + $0x78] sm:$0xff]   ;;  %v665_v4 = vld [vmem:[%s884_s1 + $0x70] sm:$0xff]   ;;  %v669_v8 = vld [vmem:[%s884_s1 + $0x68] sm:$0xff]  }
   0x2   :  { %v662_v1 = vld [vmem:[%s884_s1 + $0xf8] sm:$0xff]   ;;  %587 = vmatprep.subr.bf16.mxu0 %v661_v0  ;;  %v666_v5 = vld [vmem:[%s884_s1 + $0xf0] sm:$0xff]   ;;  %v670_v9 = vld [vmem:[%s884_s1 + $0xe8] sm:$0xff]  }
   0x3   :  { %v663_v2 = vld [vmem:[%s884_s1 + $0x38] sm:$0xff]   ;;  %615 = vmatprep.subr.bf16.mxu1 %v662_v1  ;;  %v667_v6 = vld [vmem:[%s884_s1 + $0x30] sm:$0xff]   ;;  %v671_v10 = vld [vmem:[%s884_s1 + $0x28] sm:$0xff]  }
   0x4   :  { %v664_v3 = vld [vmem:[%s884_s1 + $0xb8] sm:$0xff]   ;;  %588 = vmatpush3.bf16.msra.mxu0 %v663_v2  ;;  %v668_v7 = vld [vmem:[%s884_s1 + $0xb0] sm:$0xff]   ;;  %v672_v11 = vld [vmem:[%s884_s1 + $0xa8] sm:$0xff]  }
   0x5   :  { %616 = vmatpush3.bf16.msra.mxu1 %v664_v3  ;;  %589 = vmatprep.subr.bf16.mxu0 %v665_v4  ;;  %v673_v12 = vld [vmem:[%s884_s1 + $0x60] sm:$0xff]   ;;  %v677_v16 = vld [vmem:[%s884_s1 + $0x58] sm:$0xff]   ;;  %v681_v20 = vld [vmem:[%s884_s1 + $0x50] sm:$0xff]  }
   0x6   :  { %617 = vmatprep.subr.bf16.mxu1 %v666_v5  ;;  %v674_v13 = vld [vmem:[%s884_s1 + $0xe0] sm:$0xff]   ;;  %v678_v17 = vld [vmem:[%s884_s1 + $0xd8] sm:$0xff]   ;;  %v682_v21 = vld [vmem:[%s884_s1 + $0xd0] sm:$0xff]  }
   0x7   :  { %v675_v14 = vld [vmem:[%s884_s1 + $0x20] sm:$0xff]   ;;  %v679_v18 = vld [vmem:[%s884_s1 + $0x18] sm:$0xff]   ;;  %v683_v22 = vld [vmem:[%s884_s1 + $0x10] sm:$0xff]  }
   0x8   :  { %590 = vmatpush3.bf16.msra.mxu0 %v667_v6  ;;  %v676_v15 = vld [vmem:[%s884_s1 + $0xa0] sm:$0xff]   ;;  %v680_v19 = vld [vmem:[%s884_s1 + $0x98] sm:$0xff]   ;;  %v684_v23 = vld [vmem:[%s884_s1 + $0x90] sm:$0xff]  }
   0x9   :  { %618 = vmatpush3.bf16.msra.mxu1 %v668_v7  ;;  %591 = vmatprep.subr.bf16.mxu0 %v669_v8  ;;  %v685_v24 = vld [vmem:[%s884_s1 + $0x48] sm:$0xff]   ;;  %v689_v28 = vld [vmem:[%s884_s1 + $0x40] sm:$0xff]   ;;  %v699_v36 = vld [vmem:[%s884_s1 + $0x118] sm:$0xff]  }
   0xa   :  { %619 = vmatprep.subr.bf16.mxu1 %v670_v9  ;;  %v686_v25 = vld [vmem:[%s884_s1 + $0xc8] sm:$0xff]   ;;  %v690_v29 = vld [vmem:[%s884_s1 + $0xc0] sm:$0xff]   ;;  %v700_v37 = vld [vmem:[%s884_s1 + $0x110] sm:$0xff]  }
   0xb   :  { %v687_v26 = vld [vmem:[%s884_s1 + $0x8] sm:$0xff]   ;;  %v691_v30 = vld [vmem:[%s884_s1] sm:$0xff]  }
   0xc   :  { %592 = vmatpush3.bf16.msra.mxu0 %v671_v10  ;;  %v688_v27 = vld [vmem:[%s884_s1 + $0x88] sm:$0xff]   ;;  %v692_v31 = vld [vmem:[%s884_s1 + $0x80] sm:$0xff]  }
   0xd   :  { %620 = vmatpush3.bf16.msra.mxu1 %v672_v11  ;;  %593 = vmatprep.subr.bf16.mxu0 %v673_v12  ;;  %v693_v32 = vld [vmem:[%s885_s0] ss:$20 sps:$4 sm:$0xff]   ;;  %v695_v33 = vld [vmem:[%s885_s0 + $0x4] ss:$20 sps:$4 sm:$0xff]   ;;  %v696_v34 = vld [vmem:[%s885_s0 + $0x8] ss:$20 sps:$4 sm:$0xff]  }
   0xe   :  { %621 = vmatprep.subr.bf16.mxu1 %v674_v13  ;;  %v698_v35 = vld [vmem:[%s885_s0 + $0xc] ss:$20 sps:$4 sm:$0xff]   ;;  %411 = vmatprep.mubr.bf16.mxu0 %v695_v33  ;;  %v703_v39 = vld [vmem:[%s885_s0 + $0x34] ss:$20 sps:$4 sm:$0xff]   ;;  %v706_v42 = vld [vmem:[%s885_s0 + $0x30] ss:$20 sps:$4 sm:$0xff]  }
   0xf   :  { %460 = vmatprep.mubr.bf16.mxu1 %v698_v35  ;;  %v701_v38 = vld [vmem:[%s885_s0 + $0x2c] ss:$20 sps:$4 sm:$0xff]   ;;  %v705_v40 = vld [vmem:[%s885_s0 + $0x28] ss:$20 sps:$4 sm:$0xff]   ;;  %v709_v43 = vld [vmem:[%s885_s0 + $0x10] ss:$20 sps:$4 sm:$0xff]  }
  0x10   :  { %594 = vmatpush3.bf16.msra.mxu0 %v675_v14  ;;  %v707_v41 = vld [vmem:[%s884_s1 + $0x108] sm:$0xff]   ;;  %v708_v44 = vld [vmem:[%s884_s1 + $0x100] sm:$0xff]  }
  0x11   :  { %622 = vmatpush3.bf16.msra.mxu1 %v676_v15  ;;  %595 = vmatprep.subr.bf16.mxu0 %v677_v16  ;;  %v710_v45 = vld [vmem:[%s885_s0 + $0x38] ss:$20 sps:$4 sm:$0xff]   ;;  %v538_v58 = vld [vmem:[%s886_s2] ss:$0 sm:$0xff] }
  0x12   :  { %623 = vmatprep.subr.bf16.mxu1 %v678_v17 }
  0x14   :  { %596 = vmatpush3.bf16.msra.mxu0 %v679_v18 }
  0x15   :  { %624 = vmatpush3.bf16.msra.mxu1 %v680_v19  ;;  %597 = vmatprep.subr.bf16.mxu0 %v681_v20 }
  0x16   :  { %625 = vmatprep.subr.bf16.mxu1 %v682_v21 }
  0x18   :  { %598 = vmatpush3.bf16.msra.mxu0 %v683_v22 }
  0x19   :  { %626 = vmatpush3.bf16.msra.mxu1 %v684_v23  ;;  %599 = vmatprep.subr.bf16.mxu0 %v685_v24 }
  0x1a   :  { %627 = vmatprep.subr.bf16.mxu1 %v686_v25 }
  0x1c   :  { %600 = vmatpush3.bf16.msra.mxu0 %v687_v26 }
  0x1d   :  { %628 = vmatpush3.bf16.msra.mxu1 %v688_v27  ;;  %601 = vmatprep.subr.bf16.mxu0 %v689_v28 }
  0x1e   :  { %629 = vmatprep.subr.bf16.mxu1 %v690_v29 }
  0x20   :  { %602 = vmatpush3.bf16.msra.mxu0 %v691_v30 }
  0x21   :  { %630 = vmatpush3.bf16.msra.mxu1 %v692_v31  ;;  %649 = vmatprep.subr.bf16.mxu0 %v699_v36 }
  0x23   :  { %412 = vmatmul.mubr.bf16.vlgmr.msra.gmra.mxu0 %v693_v32 }
  0x24   :  { %461 = vmatmul.mubr.bf16.vlgmr.msra.gmra.mxu1 %v696_v34  ;;  %650 = vmatpush3.bf16.msra.mxu0 %v699_v36 }
  0x25   :  { %651 = vmatprep.subr.bf16.mxu0 %v700_v37  ;;  %419 = vmatprep.mubr.bf16.mxu0 %v701_v38 }
  0x26   :  { %468 = vmatprep.mubr.bf16.mxu1 %v703_v39 }
  0x28   :  { %652 = vmatpush3.bf16.msra.mxu0 %v700_v37 }
  0x29   :  { %653 = vmatprep.subr.bf16.mxu0 %v707_v41 }
  0x2b   :  { %420 = vmatmul.mubr.bf16.gmra.mxu0 %v705_v40 }
  0x2c   :  { %469 = vmatmul.mubr.bf16.gmra.mxu1 %v706_v42  ;;  %657 = vmatprep.mubr.msk.bf16.mxu0 %vm372_vm0, %v709_v43 }
  0x2d   :  { %654 = vmatpush3.bf16.msra.mxu0 %v707_v41 }
  0x2e   :  { %655 = vmatprep.subr.bf16.mxu0 %v708_v44 }
  0x31   :  { %656 = vmatpush3.bf16.msra.mxu0 %v708_v44 }
  0x34   :  { %658 = vmatmul.mubr.msk.bf16.vlgmr.msra.gmra.mxu0 %vm372_vm0, %v710_v45 }
  0xe3   :  { %v603_v46 = vpop.f32.mrf.mxu0 }
  0xe4   :  { %v631_v47 = vpop.f32.mrf.mxu1 }
  0xe5   :  { %v604_v48 = vpop.f32.mrf.mxu0 }
  0xe6   :  { %v632_v49 = vpop.f32.mrf.mxu1  ;;  %v605_v56 = vadd.f32 %v604_v48, %v603_v46 }
  0xe7   :  { %v606_v50 = vpop.f32.mrf.mxu0  ;;  %v633_v2 = vadd.f32 %v632_v49, %v631_v47 }
  0xe8   :  { %v634_v51 = vpop.f32.mrf.mxu1  ;;  %v414_v1 = vadd.f32 %v605_v56, %v538_v58 }
  0xe9   :  { %v607_v52 = vpop.f32.mrf.mxu0 }
  0xea   :  { %v635_v53 = vpop.f32.mrf.mxu1  ;;  %v608_v3 = vadd.f32 %v607_v52, %v606_v50  ;;  %v463_v13 = vadd.f32 %v633_v2, %v414_v1 }
  0xeb   :  { %v609_v54 = vpop.f32.mrf.mxu0  ;;  %v636_v16 = vadd.f32 %v635_v53, %v634_v51 }
  0xec   :  { %v637_v55 = vpop.f32.mrf.mxu1  ;;  %v417_v11 = vadd.f32 %v608_v3, %v538_v58 }
  0xed   :  { %v610_v57 = vpop.f32.mrf.mxu0 }
  0xee   :  { %v611_v59 = vadd.f32 %v610_v57, %v609_v54  ;;  %v638_v60 = vpop.f32.mrf.mxu1  ;;  %v466_v22 = vadd.f32 %v636_v16, %v417_v11 }
  0xef   :  { %v639_v61 = vadd.f32 %v638_v60, %v637_v55  ;;  %v612_v62 = vpop.f32.mrf.mxu0 }
  0xf0   :  { %v422_v63 = vadd.f32 %v611_v59, %v538_v58  ;;  %v640_v0 = vpop.f32.mrf.mxu1 }
  0xf1   :  { %v613_v4 = vpop.f32.mrf.mxu0 }
  0xf2   :  { %v614_v5 = vadd.f32 %v613_v4, %v612_v62  ;;  %v641_v6 = vpop.f32.mrf.mxu1  ;;  %v471_v7 = vadd.f32 %v639_v61, %v422_v63 }
  0xf3   :  { %v642_v9 = vadd.f32 %v641_v6, %v640_v0 }
  0xf4   :  { %v425_v8 = vadd.f32 %v614_v5, %v538_v58  ;;  %v659_v10 = vpop.f32.mrf.mxu0 }
  0xf5   :  { %v520_v12 = vadd.f32 %v659_v10, %v471_v7 }
  0xf6   :  { %v511_v14 = vpop.f32.mrf.mxu0  ;;  %v474_v15 = vadd.f32 %v642_v9, %v425_v8 }
  0xf7   :  { %v528_v17 = vmax.f32 %v520_v12, 0.0  ;;  %v512_v18 = vadd.f32 %v511_v14, %v463_v13 }
  0xf8   :  { %v660_v19 = vpop.f32.mrf.mxu0 }
  0xf9   :  { %532 = vst [vmem:[%s887_s3 + $0x10] sm:$0xff] %v528_v17  ;;  %v526_v20 = vmax.f32 %v512_v18, 0.0  ;;  %v523_v21 = vadd.f32 %v660_v19, %v474_v15 }
  0xfa   :  { %v514_v23 = vpop.f32.mrf.mxu0 }
  0xfb   :  { %530 = vst [vmem:[%s887_s3] sm:$0xff] %v526_v20  ;;  %v529_v24 = vmax.f32 %v523_v21, 0.0  ;;  %v515_v25 = vadd.f32 %v514_v23, %v466_v22 }
  0xfd   :  { %533 = vst [vmem:[%s887_s3 + $0x18] sm:$0xff] %v529_v24  ;;  %v527_v26 = vmax.f32 %v515_v25, 0.0 }
  0xff   :  { %531 = vst [vmem:[%s887_s3 + $0x8] sm:$0xff] %v527_v26 }

// kernel: vae_forward.10
= control target key start
LH: loop header
LB: loop body
LE: loop exit
PB: predicated region body
PF: predicated region fallthrough
CT: control target
= control target key end

     0   :  { %16 = vsyncpa [#allocation3], 0  ;;  %v3314_v30 = vmov 1983009808   ;;  %v309_v32 = vlaneseq  ;;  %s5131_s0 = inlined_call_operand.vmem [shape: f32[2,2048], index: 0, kind: input, shape index: {}]   ;;  %s5132_s1 = inlined_call_operand.vmem [shape: f32[2048,2], index: 1, kind: input, shape index: {}]   ;;  %s5133_s2 = inlined_call_operand.vmem [shape: f32[1,2], index: 2, kind: input, shape index: {}]   ;;  %s5134_s3 = inlined_call_operand.vmem [shape: f32[2048,2], index: 3, kind: input, shape index: {}]   ;;  %s5135_s4 = inlined_call_operand.vmem [shape: f32[1,2], index: 4, kind: input, shape index: {}]   ;;  %s5136_s5 = inlined_call_operand.vmem [shape: f32[2,2], index: 5, kind: input, shape index: {}]   ;;  %s5137_s6 = inlined_call_operand.vmem [shape: f32[2,2048], index: 6, kind: input, shape index: {}]   ;;  %s5138_s7 = inlined_call_operand.vmem [shape: f32[1,2048], index: 7, kind: input, shape index: {}]   ;;  %s5139_s8 = inlined_call_operand.hbm [shape: f32[2,2], index: 8, kind: output, shape index: {0}]   ;;  %s5140_s9 = inlined_call_operand.hbm [shape: f32[2,2], index: 9, kind: output, shape index: {1}]   ;;  %s5141_s10 = inlined_call_operand.vmem [shape: f32[2,2048], index: 10, kind: output, shape index: {2}]  }
   0x1   :  { %v69_v0 = vld [vmem:[%s5132_s1 + $0xf8] sm:$0xff]  ;;  %v68_v4 = vld [vmem:[%s5132_s1 + $0xf0] sm:$0xff]  ;;  %v67_v8 = vld [vmem:[%s5132_s1 + $0xe8] sm:$0xff]  ;;  %v307_v31 = vunpack.c.l.s4 %v3314_v30 }
   0x2   :  { %v101_v1 = vld [vmem:[%s5132_s1 + $0x1f8] sm:$0xff]  ;;  %2696 = vmatprep.subr.mxu0 %v69_v0  ;;  %v100_v5 = vld [vmem:[%s5132_s1 + $0x1f0] sm:$0xff]  ;;  %v99_v9 = vld [vmem:[%s5132_s1 + $0x1e8] sm:$0xff]  ;;  %v3487_v42 = vshrl.u32 %v309_v32, 7 }
   0x3   :  { %v53_v2 = vld [vmem:[%s5132_s1 + $0x78] sm:$0xff]  ;;  %2731 = vmatprep.subr.mxu1 %v101_v1  ;;  %v52_v6 = vld [vmem:[%s5132_s1 + $0x70] sm:$0xff]  ;;  %v51_v10 = vld [vmem:[%s5132_s1 + $0x68] sm:$0xff]  ;;  %v308_v41 = vunpack.c.0.s8 %v307_v31 }
   0x4   :  { %v85_v3 = vld [vmem:[%s5132_s1 + $0x178] sm:$0xff]  ;;  %2697 = vmatpush3.msra.mxu0 %v53_v2  ;;  %v84_v7 = vld [vmem:[%s5132_s1 + $0x170] sm:$0xff]  ;;  %v83_v11 = vld [vmem:[%s5132_s1 + $0x168] sm:$0xff] }
   0x5   :  { %2732 = vmatpush3.msra.mxu1 %v85_v3  ;;  %2698 = vmatprep.subr.mxu0 %v68_v4  ;;  %v66_v12 = vld [vmem:[%s5132_s1 + $0xe0] sm:$0xff]  ;;  %v65_v16 = vld [vmem:[%s5132_s1 + $0xd8] sm:$0xff]  ;;  %v64_v20 = vld [vmem:[%s5132_s1 + $0xd0] sm:$0xff]  ;;  %v3514_v51 = vsub.s32 %v308_v41, %v3487_v42 }
   0x6   :  { %2733 = vmatprep.subr.mxu1 %v100_v5  ;;  %2699 = vmatpush3.msra.mxu0 %v52_v6  ;;  %v98_v13 = vld [vmem:[%s5132_s1 + $0x1e0] sm:$0xff]  ;;  %v97_v17 = vld [vmem:[%s5132_s1 + $0x1d8] sm:$0xff]  ;;  %v96_v21 = vld [vmem:[%s5132_s1 + $0x1d0] sm:$0xff] }
   0x7   :  { %2734 = vmatpush3.msra.mxu1 %v84_v7  ;;  %2700 = vmatprep.subr.mxu0 %v67_v8  ;;  %v50_v14 = vld [vmem:[%s5132_s1 + $0x60] sm:$0xff]  ;;  %v49_v18 = vld [vmem:[%s5132_s1 + $0x58] sm:$0xff]  ;;  %v48_v22 = vld [vmem:[%s5132_s1 + $0x50] sm:$0xff] }
   0x8   :  { %2735 = vmatprep.subr.mxu1 %v99_v9  ;;  %v82_v15 = vld [vmem:[%s5132_s1 + $0x160] sm:$0xff]  ;;  %2701 = vmatpush3.msra.mxu0 %v51_v10  ;;  %v81_v19 = vld [vmem:[%s5132_s1 + $0x158] sm:$0xff]  ;;  %v80_v23 = vld [vmem:[%s5132_s1 + $0x150] sm:$0xff] }
   0x9   :  { %2736 = vmatpush3.msra.mxu1 %v83_v11  ;;  %2702 = vmatprep.subr.mxu0 %v66_v12  ;;  %v63_v24 = vld [vmem:[%s5132_s1 + $0xc8] sm:$0xff]  ;;  %v62_v28 = vld [vmem:[%s5132_s1 + $0xc0] sm:$0xff]  ;;  %v61_v35 = vld [vmem:[%s5132_s1 + $0xb8] sm:$0xff] }
   0xa   :  { %2737 = vmatprep.subr.mxu1 %v98_v13  ;;  %2703 = vmatpush3.msra.mxu0 %v50_v14  ;;  %v95_v25 = vld [vmem:[%s5132_s1 + $0x1c8] sm:$0xff]  ;;  %v94_v29 = vld [vmem:[%s5132_s1 + $0x1c0] sm:$0xff]  ;;  %v93_v36 = vld [vmem:[%s5132_s1 + $0x1b8] sm:$0xff] }
   0xb   :  { %2738 = vmatpush3.msra.mxu1 %v82_v15  ;;  %2704 = vmatprep.subr.mxu0 %v65_v16  ;;  %v47_v26 = vld [vmem:[%s5132_s1 + $0x48] sm:$0xff]  ;;  %v46_v33 = vld [vmem:[%s5132_s1 + $0x40] sm:$0xff]  ;;  %v45_v37 = vld [vmem:[%s5132_s1 + $0x38] sm:$0xff] }
   0xc   :  { %2739 = vmatprep.subr.mxu1 %v97_v17  ;;  %2705 = vmatpush3.msra.mxu0 %v49_v18  ;;  %v79_v27 = vld [vmem:[%s5132_s1 + $0x148] sm:$0xff]  ;;  %v78_v34 = vld [vmem:[%s5132_s1 + $0x140] sm:$0xff]  ;;  %v77_v38 = vld [vmem:[%s5132_s1 + $0x138] sm:$0xff] }
   0xd   :  { %2740 = vmatpush3.msra.mxu1 %v81_v19  ;;  %2706 = vmatprep.subr.mxu0 %v64_v20  ;;  %v60_v39 = vld [vmem:[%s5132_s1 + $0xb0] sm:$0xff]  ;;  %v59_v45 = vld [vmem:[%s5132_s1 + $0xa8] sm:$0xff]  ;;  %v58_v49 = vld [vmem:[%s5132_s1 + $0xa0] sm:$0xff] }
   0xe   :  { %2741 = vmatprep.subr.mxu1 %v96_v21  ;;  %2707 = vmatpush3.msra.mxu0 %v48_v22  ;;  %v92_v40 = vld [vmem:[%s5132_s1 + $0x1b0] sm:$0xff]  ;;  %v91_v46 = vld [vmem:[%s5132_s1 + $0x1a8] sm:$0xff]  ;;  %v90_v50 = vld [vmem:[%s5132_s1 + $0x1a0] sm:$0xff] }
   0xf   :  { %2742 = vmatpush3.msra.mxu1 %v80_v23  ;;  %2708 = vmatprep.subr.mxu0 %v63_v24  ;;  %v44_v43 = vld [vmem:[%s5132_s1 + $0x30] sm:$0xff]  ;;  %v43_v47 = vld [vmem:[%s5132_s1 + $0x28] sm:$0xff]  ;;  %v42_v52 = vld [vmem:[%s5132_s1 + $0x20] sm:$0xff] }
  0x10   :  { %2743 = vmatprep.subr.mxu1 %v95_v25  ;;  %2709 = vmatpush3.msra.mxu0 %v47_v26  ;;  %v76_v44 = vld [vmem:[%s5132_s1 + $0x130] sm:$0xff]  ;;  %v75_v48 = vld [vmem:[%s5132_s1 + $0x128] sm:$0xff]  ;;  %v74_v53 = vld [vmem:[%s5132_s1 + $0x120] sm:$0xff] }
  0x11   :  { %2744 = vmatpush3.msra.mxu1 %v79_v27  ;;  %2710 = vmatprep.subr.mxu0 %v62_v28  ;;  %v34_v54 = vld [vmem:[%s5131_s0] sm:$0xff]  ;;  %v57_v55 = vld [vmem:[%s5132_s1 + $0x98] sm:$0xff]  ;;  %v56_v60 = vld [vmem:[%s5132_s1 + $0x90] sm:$0xff] }
  0x12   :  { %2745 = vmatprep.subr.mxu1 %v94_v29  ;;  %2711 = vmatpush3.msra.mxu0 %v46_v33  ;;  %v89_v56 = vld [vmem:[%s5132_s1 + $0x198] sm:$0xff]  ;;  %v305_v57 = vcombine.high %v34_v54, %v34_v54  ;;  %v88_v61 = vld [vmem:[%s5132_s1 + $0x190] sm:$0xff]  ;;  %v3544_v62 = vrot.slane %v34_v54, %v3514_v51  ;;  %v55_v1 = vld [vmem:[%s5132_s1 + $0x88] sm:$0xff] }
  0x13   :  { %2746 = vmatpush3.msra.mxu1 %v78_v34  ;;  %2712 = vmatprep.subr.mxu0 %v61_v35  ;;  %v41_v58 = vld [vmem:[%s5132_s1 + $0x18] sm:$0xff]  ;;  %v40_v63 = vld [vmem:[%s5132_s1 + $0x10] sm:$0xff]  ;;  %v87_v2 = vld [vmem:[%s5132_s1 + $0x188] sm:$0xff] }
  0x14   :  { %2747 = vmatprep.subr.mxu1 %v93_v36  ;;  %2713 = vmatpush3.msra.mxu0 %v45_v37  ;;  %v73_v59 = vld [vmem:[%s5132_s1 + $0x118] sm:$0xff]  ;;  %v72_v0 = vld [vmem:[%s5132_s1 + $0x110] sm:$0xff]  ;;  %v3559_v3 = vrot.slane %v305_v57, %v3514_v51  ;;  %v39_v4 = vld [vmem:[%s5132_s1 + $0x8] sm:$0xff]  ;;  %v3575_v8 = vcombine.high %v3544_v62, %v3544_v62 }
  0x15   :  { %2748 = vmatpush3.msra.mxu1 %v77_v38  ;;  %2714 = vmatprep.subr.mxu0 %v60_v39  ;;  %v71_v5 = vld [vmem:[%s5132_s1 + $0x108] sm:$0xff]  ;;  %v54_v6 = vld [vmem:[%s5132_s1 + $0x80] sm:$0xff]  ;;  %v133_v12 = vld [vmem:[%s5132_s1 + $0x2f8] sm:$0xff] }
  0x16   :  { %2749 = vmatprep.subr.mxu1 %v92_v40  ;;  %2715 = vmatpush3.msra.mxu0 %v44_v43  ;;  %v86_v7 = vld [vmem:[%s5132_s1 + $0x180] sm:$0xff]  ;;  %v3585_v11 = vcombine.high %v3559_v3, %v3559_v3  ;;  %v165_v13 = vld [vmem:[%s5132_s1 + $0x3f8] sm:$0xff]  ;;  %v132_v16 = vld [vmem:[%s5132_s1 + $0x2f0] sm:$0xff] }
  0x17   :  { %2750 = vmatpush3.msra.mxu1 %v76_v44  ;;  %2716 = vmatprep.subr.mxu0 %v59_v45  ;;  %v38_v9 = vld [vmem:[%s5132_s1] sm:$0xff]  ;;  %v117_v14 = vld [vmem:[%s5132_s1 + $0x278] sm:$0xff]  ;;  %v164_v17 = vld [vmem:[%s5132_s1 + $0x3f0] sm:$0xff] }
  0x18   :  { %2751 = vmatprep.subr.mxu1 %v91_v46  ;;  %2717 = vmatpush3.msra.mxu0 %v43_v47  ;;  %v70_v10 = vld [vmem:[%s5132_s1 + $0x100] sm:$0xff]  ;;  %v149_v15 = vld [vmem:[%s5132_s1 + $0x378] sm:$0xff]  ;;  %v116_v18 = vld [vmem:[%s5132_s1 + $0x270] sm:$0xff] }
  0x19   :  { %2752 = vmatpush3.msra.mxu1 %v75_v48  ;;  %2718 = vmatprep.subr.mxu0 %v58_v49  ;;  %v148_v19 = vld [vmem:[%s5132_s1 + $0x370] sm:$0xff]  ;;  %v131_v20 = vld [vmem:[%s5132_s1 + $0x2e8] sm:$0xff]  ;;  %v130_v24 = vld [vmem:[%s5132_s1 + $0x2e0] sm:$0xff] }
  0x1a   :  { %2753 = vmatprep.subr.mxu1 %v90_v50  ;;  %2719 = vmatpush3.msra.mxu0 %v42_v52  ;;  %v163_v21 = vld [vmem:[%s5132_s1 + $0x3e8] sm:$0xff]  ;;  %v162_v25 = vld [vmem:[%s5132_s1 + $0x3e0] sm:$0xff]  ;;  %v129_v28 = vld [vmem:[%s5132_s1 + $0x2d8] sm:$0xff] }
  0x1b   :  { %2754 = vmatpush3.msra.mxu1 %v74_v53  ;;  %2720 = vmatprep.subr.mxu0 %v57_v55  ;;  %v115_v22 = vld [vmem:[%s5132_s1 + $0x268] sm:$0xff]  ;;  %v114_v26 = vld [vmem:[%s5132_s1 + $0x260] sm:$0xff]  ;;  %v161_v29 = vld [vmem:[%s5132_s1 + $0x3d8] sm:$0xff] }
  0x1c   :  { %2755 = vmatprep.subr.mxu1 %v89_v56  ;;  %2721 = vmatpush3.msra.mxu0 %v41_v58  ;;  %v147_v23 = vld [vmem:[%s5132_s1 + $0x368] sm:$0xff]  ;;  %v146_v27 = vld [vmem:[%s5132_s1 + $0x360] sm:$0xff]  ;;  %v113_v30 = vld [vmem:[%s5132_s1 + $0x258] sm:$0xff] }
  0x1d   :  { %2756 = vmatpush3.msra.mxu1 %v73_v59  ;;  %2722 = vmatprep.subr.mxu0 %v56_v60  ;;  %v145_v31 = vld [vmem:[%s5132_s1 + $0x358] sm:$0xff]  ;;  %v128_v32 = vld [vmem:[%s5132_s1 + $0x2d0] sm:$0xff]  ;;  %v127_v36 = vld [vmem:[%s5132_s1 + $0x2c8] sm:$0xff] }
  0x1e   :  { %2757 = vmatprep.subr.mxu1 %v88_v61  ;;  %2723 = vmatpush3.msra.mxu0 %v40_v63  ;;  %v160_v33 = vld [vmem:[%s5132_s1 + $0x3d0] sm:$0xff]  ;;  %v159_v37 = vld [vmem:[%s5132_s1 + $0x3c8] sm:$0xff]  ;;  %v126_v40 = vld [vmem:[%s5132_s1 + $0x2c0] sm:$0xff] }
  0x1f   :  { %2758 = vmatpush3.msra.mxu1 %v72_v0  ;;  %2724 = vmatprep.subr.mxu0 %v55_v1  ;;  %v112_v34 = vld [vmem:[%s5132_s1 + $0x250] sm:$0xff]  ;;  %v111_v38 = vld [vmem:[%s5132_s1 + $0x248] sm:$0xff]  ;;  %v158_v41 = vld [vmem:[%s5132_s1 + $0x3c0] sm:$0xff] }
  0x20   :  { %2759 = vmatprep.subr.mxu1 %v87_v2  ;;  %2725 = vmatpush3.msra.mxu0 %v39_v4  ;;  %v144_v35 = vld [vmem:[%s5132_s1 + $0x350] sm:$0xff]  ;;  %v143_v39 = vld [vmem:[%s5132_s1 + $0x348] sm:$0xff]  ;;  %v110_v43 = vld [vmem:[%s5132_s1 + $0x240] sm:$0xff] }
  0x21   :  { %2760 = vmatpush3.msra.mxu1 %v71_v5  ;;  %2726 = vmatprep.subr.mxu0 %v54_v6  ;;  %v142_v44 = vld [vmem:[%s5132_s1 + $0x340] sm:$0xff]  ;;  %v125_v45 = vld [vmem:[%s5132_s1 + $0x2b8] sm:$0xff]  ;;  %v124_v49 = vld [vmem:[%s5132_s1 + $0x2b0] sm:$0xff] }
  0x22   :  { %2761 = vmatprep.subr.mxu1 %v86_v7  ;;  %2727 = vmatpush3.msra.mxu0 %v38_v9  ;;  %v157_v46 = vld [vmem:[%s5132_s1 + $0x3b8] sm:$0xff]  ;;  %v156_v50 = vld [vmem:[%s5132_s1 + $0x3b0] sm:$0xff]  ;;  %v123_v54 = vld [vmem:[%s5132_s1 + $0x2a8] sm:$0xff] }
  0x23   :  { %453 = vmatprep.mubr.f32.mxu0 %v3575_v8  ;;  %2762 = vmatpush3.msra.mxu1 %v70_v10  ;;  %v109_v47 = vld [vmem:[%s5132_s1 + $0x238] sm:$0xff]  ;;  %v108_v52 = vld [vmem:[%s5132_s1 + $0x230] sm:$0xff]  ;;  %v155_v55 = vld [vmem:[%s5132_s1 + $0x3a8] sm:$0xff] }
  0x24   :  { %454 = vmatmul.mubr.f32.vlgmr.msra.gmra.mxu0 %v3544_v62  ;;  %523 = vmatprep.mubr.f32.mxu1 %v3585_v11  ;;  %v141_v48 = vld [vmem:[%s5132_s1 + $0x338] sm:$0xff]  ;;  %v140_v53 = vld [vmem:[%s5132_s1 + $0x330] sm:$0xff]  ;;  %v107_v56 = vld [vmem:[%s5132_s1 + $0x228] sm:$0xff] }
  0x25   :  { %2766 = vmatprep.subr.mxu0 %v133_v12  ;;  %2801 = vmatprep.subr.mxu1 %v165_v13  ;;  %v139_v57 = vld [vmem:[%s5132_s1 + $0x328] sm:$0xff]  ;;  %v122_v59 = vld [vmem:[%s5132_s1 + $0x2a0] sm:$0xff]  ;;  %v121_v0 = vld [vmem:[%s5132_s1 + $0x298] sm:$0xff] }
  0x26   :  { %524 = vmatmul.mubr.f32.vlgmr.msra.gmra.mxu1 %v3559_v3  ;;  %2767 = vmatpush3.msra.mxu0 %v117_v14  ;;  %v35_v58 = vld [vmem:[%s5131_s0 + $0x8] sm:$0xff]  ;;  %v154_v60 = vld [vmem:[%s5132_s1 + $0x3a0] sm:$0xff]  ;;  %v153_v1 = vld [vmem:[%s5132_s1 + $0x398] sm:$0xff] }
  0x27   :  { %2802 = vmatpush3.msra.mxu1 %v149_v15  ;;  %2768 = vmatprep.subr.mxu0 %v132_v16  ;;  %v106_v61 = vld [vmem:[%s5132_s1 + $0x220] sm:$0xff]  ;;  %v322_v2 = vcombine.high %v35_v58, %v35_v58  ;;  %v105_v4 = vld [vmem:[%s5132_s1 + $0x218] sm:$0xff]  ;;  %v120_v6 = vld [vmem:[%s5132_s1 + $0x290] sm:$0xff]  ;;  %v3757_v9 = vrot.slane %v35_v58, %v3514_v51 }
  0x28   :  { %2803 = vmatprep.subr.mxu1 %v164_v17  ;;  %2769 = vmatpush3.msra.mxu0 %v116_v18  ;;  %v138_v63 = vld [vmem:[%s5132_s1 + $0x320] sm:$0xff]  ;;  %v137_v5 = vld [vmem:[%s5132_s1 + $0x318] sm:$0xff]  ;;  %v152_v7 = vld [vmem:[%s5132_s1 + $0x390] sm:$0xff] }
  0x29   :  { %2804 = vmatpush3.msra.mxu1 %v148_v19  ;;  %2770 = vmatprep.subr.mxu0 %v131_v20  ;;  %v104_v10 = vld [vmem:[%s5132_s1 + $0x210] sm:$0xff]  ;;  %v119_v13 = vld [vmem:[%s5132_s1 + $0x288] sm:$0xff]  ;;  %v3772_v15 = vrot.slane %v322_v2, %v3514_v51  ;;  %v118_v18 = vld [vmem:[%s5132_s1 + $0x280] sm:$0xff]  ;;  %v3788_v20 = vcombine.high %v3757_v9, %v3757_v9 }
  0x2a   :  { %2805 = vmatprep.subr.mxu1 %v163_v21  ;;  %2771 = vmatpush3.msra.mxu0 %v115_v22  ;;  %v136_v12 = vld [vmem:[%s5132_s1 + $0x310] sm:$0xff]  ;;  %v151_v14 = vld [vmem:[%s5132_s1 + $0x388] sm:$0xff]  ;;  %v150_v19 = vld [vmem:[%s5132_s1 + $0x380] sm:$0xff] }
  0x2b   :  { %2806 = vmatpush3.msra.mxu1 %v147_v23  ;;  %2772 = vmatprep.subr.mxu0 %v130_v24  ;;  %v103_v16 = vld [vmem:[%s5132_s1 + $0x208] sm:$0xff]  ;;  %v102_v21 = vld [vmem:[%s5132_s1 + $0x200] sm:$0xff]  ;;  %v3798_v23 = vcombine.high %v3772_v15, %v3772_v15  ;;  %v197_v24 = vld [vmem:[%s5132_s1 + $0x4f8] sm:$0xff] }
  0x2c   :  { %2807 = vmatprep.subr.mxu1 %v162_v25  ;;  %2773 = vmatpush3.msra.mxu0 %v114_v26  ;;  %v135_v17 = vld [vmem:[%s5132_s1 + $0x308] sm:$0xff]  ;;  %v134_v22 = vld [vmem:[%s5132_s1 + $0x300] sm:$0xff]  ;;  %v229_v25 = vld [vmem:[%s5132_s1 + $0x5f8] sm:$0xff] }
  0x2d   :  { %2808 = vmatpush3.msra.mxu1 %v146_v27  ;;  %2774 = vmatprep.subr.mxu0 %v129_v28  ;;  %v181_v26 = vld [vmem:[%s5132_s1 + $0x478] sm:$0xff]  ;;  %v196_v28 = vld [vmem:[%s5132_s1 + $0x4f0] sm:$0xff] }
  0x2e   :  { %2809 = vmatprep.subr.mxu1 %v161_v29  ;;  %2775 = vmatpush3.msra.mxu0 %v113_v30  ;;  %v213_v27 = vld [vmem:[%s5132_s1 + $0x578] sm:$0xff]  ;;  %v228_v29 = vld [vmem:[%s5132_s1 + $0x5f0] sm:$0xff] }
  0x2f   :  { %2810 = vmatpush3.msra.mxu1 %v145_v31  ;;  %2776 = vmatprep.subr.mxu0 %v128_v32  ;;  %v180_v30 = vld [vmem:[%s5132_s1 + $0x470] sm:$0xff]  ;;  %v195_v32 = vld [vmem:[%s5132_s1 + $0x4e8] sm:$0xff]  ;;  %v189_v58 = vld [vmem:[%s5132_s1 + $0x4b8] sm:$0xff] }
  0x30   :  { %2811 = vmatprep.subr.mxu1 %v160_v33  ;;  %2777 = vmatpush3.msra.mxu0 %v112_v34  ;;  %v212_v31 = vld [vmem:[%s5132_s1 + $0x570] sm:$0xff]  ;;  %v227_v33 = vld [vmem:[%s5132_s1 + $0x5e8] sm:$0xff] }
  0x31   :  { %2812 = vmatpush3.msra.mxu1 %v144_v35  ;;  %2778 = vmatprep.subr.mxu0 %v127_v36  ;;  %v179_v34 = vld [vmem:[%s5132_s1 + $0x468] sm:$0xff]  ;;  %v194_v36 = vld [vmem:[%s5132_s1 + $0x4e0] sm:$0xff]  ;;  %v204_v2 = vld [vmem:[%s5132_s1 + $0x530] sm:$0xff] }
  0x32   :  { %2813 = vmatprep.subr.mxu1 %v159_v37  ;;  %2779 = vmatpush3.msra.mxu0 %v111_v38  ;;  %v211_v35 = vld [vmem:[%s5132_s1 + $0x568] sm:$0xff]  ;;  %v226_v37 = vld [vmem:[%s5132_s1 + $0x5e0] sm:$0xff] }
  0x33   :  { %2814 = vmatpush3.msra.mxu1 %v143_v39  ;;  %2780 = vmatprep.subr.mxu0 %v126_v40  ;;  %v178_v38 = vld [vmem:[%s5132_s1 + $0x460] sm:$0xff]  ;;  %v193_v40 = vld [vmem:[%s5132_s1 + $0x4d8] sm:$0xff] }
  0x34   :  { %2815 = vmatprep.subr.mxu1 %v158_v41  ;;  %2781 = vmatpush3.msra.mxu0 %v110_v43  ;;  %v210_v39 = vld [vmem:[%s5132_s1 + $0x560] sm:$0xff]  ;;  %v225_v41 = vld [vmem:[%s5132_s1 + $0x5d8] sm:$0xff] }
  0x35   :  { %2816 = vmatpush3.msra.mxu1 %v142_v44  ;;  %2782 = vmatprep.subr.mxu0 %v125_v45  ;;  %v177_v43 = vld [vmem:[%s5132_s1 + $0x458] sm:$0xff]  ;;  %v192_v45 = vld [vmem:[%s5132_s1 + $0x4d0] sm:$0xff] }
  0x36   :  { %2817 = vmatprep.subr.mxu1 %v157_v46  ;;  %2783 = vmatpush3.msra.mxu0 %v109_v47  ;;  %v209_v44 = vld [vmem:[%s5132_s1 + $0x558] sm:$0xff]  ;;  %v224_v46 = vld [vmem:[%s5132_s1 + $0x5d0] sm:$0xff] }
  0x37   :  { %2818 = vmatpush3.msra.mxu1 %v141_v48  ;;  %2784 = vmatprep.subr.mxu0 %v124_v49  ;;  %v176_v47 = vld [vmem:[%s5132_s1 + $0x450] sm:$0xff]  ;;  %v191_v49 = vld [vmem:[%s5132_s1 + $0x4c8] sm:$0xff] }
  0x38   :  { %2819 = vmatprep.subr.mxu1 %v156_v50  ;;  %2785 = vmatpush3.msra.mxu0 %v108_v52  ;;  %v208_v48 = vld [vmem:[%s5132_s1 + $0x550] sm:$0xff]  ;;  %v223_v50 = vld [vmem:[%s5132_s1 + $0x5c8] sm:$0xff] }
  0x39   :  { %2820 = vmatpush3.msra.mxu1 %v140_v53  ;;  %2786 = vmatprep.subr.mxu0 %v123_v54  ;;  %v175_v52 = vld [vmem:[%s5132_s1 + $0x448] sm:$0xff]  ;;  %v190_v54 = vld [vmem:[%s5132_s1 + $0x4c0] sm:$0xff] }
  0x3a   :  { %2821 = vmatprep.subr.mxu1 %v155_v55  ;;  %2787 = vmatpush3.msra.mxu0 %v107_v56  ;;  %v207_v53 = vld [vmem:[%s5132_s1 + $0x548] sm:$0xff]  ;;  %v222_v55 = vld [vmem:[%s5132_s1 + $0x5c0] sm:$0xff] }
  0x3b   :  { %2822 = vmatpush3.msra.mxu1 %v139_v57  ;;  %2788 = vmatprep.subr.mxu0 %v122_v59  ;;  %v174_v56 = vld [vmem:[%s5132_s1 + $0x440] sm:$0xff]  ;;  %v221_v59 = vld [vmem:[%s5132_s1 + $0x5b8] sm:$0xff] }
  0x3c   :  { %2823 = vmatprep.subr.mxu1 %v154_v60  ;;  %2789 = vmatpush3.msra.mxu0 %v106_v61  ;;  %v206_v57 = vld [vmem:[%s5132_s1 + $0x540] sm:$0xff]  ;;  %v173_v60 = vld [vmem:[%s5132_s1 + $0x438] sm:$0xff] }
  0x3d   :  { %2824 = vmatpush3.msra.mxu1 %v138_v63  ;;  %2790 = vmatprep.subr.mxu0 %v121_v0  ;;  %v205_v61 = vld [vmem:[%s5132_s1 + $0x538] sm:$0xff]  ;;  %v188_v63 = vld [vmem:[%s5132_s1 + $0x4b0] sm:$0xff] }
  0x3e   :  { %2825 = vmatprep.subr.mxu1 %v153_v1  ;;  %2791 = vmatpush3.msra.mxu0 %v105_v4  ;;  %v220_v0 = vld [vmem:[%s5132_s1 + $0x5b0] sm:$0xff]  ;;  %v187_v4 = vld [vmem:[%s5132_s1 + $0x4a8] sm:$0xff] }
  0x3f   :  { %2826 = vmatpush3.msra.mxu1 %v137_v5  ;;  %2792 = vmatprep.subr.mxu0 %v120_v6  ;;  %v172_v1 = vld [vmem:[%s5132_s1 + $0x430] sm:$0xff]  ;;  %v219_v5 = vld [vmem:[%s5132_s1 + $0x5a8] sm:$0xff] }
  0x40   :  { %2827 = vmatprep.subr.mxu1 %v152_v7  ;;  %2793 = vmatpush3.msra.mxu0 %v104_v10  ;;  %v171_v6 = vld [vmem:[%s5132_s1 + $0x428] sm:$0xff]  ;;  %v36_v10 = vld [vmem:[%s5131_s0 + $0x10] sm:$0xff] }
  0x41   :  { %2828 = vmatpush3.msra.mxu1 %v136_v12  ;;  %2794 = vmatprep.subr.mxu0 %v119_v13  ;;  %v203_v7 = vld [vmem:[%s5132_s1 + $0x528] sm:$0xff]  ;;  %v186_v12 = vld [vmem:[%s5132_s1 + $0x4a0] sm:$0xff] }
  0x42   :  { %2829 = vmatprep.subr.mxu1 %v151_v14  ;;  %2795 = vmatpush3.msra.mxu0 %v103_v16  ;;  %v218_v13 = vld [vmem:[%s5132_s1 + $0x5a0] sm:$0xff] }
  0x43   :  { %2830 = vmatpush3.msra.mxu1 %v135_v17  ;;  %2796 = vmatprep.subr.mxu0 %v118_v18  ;;  %v170_v14 = vld [vmem:[%s5132_s1 + $0x420] sm:$0xff]  ;;  %v185_v17 = vld [vmem:[%s5132_s1 + $0x498] sm:$0xff] }
  0x44   :  { %2831 = vmatprep.subr.mxu1 %v150_v19  ;;  %2797 = vmatpush3.msra.mxu0 %v102_v21  ;;  %v202_v16 = vld [vmem:[%s5132_s1 + $0x520] sm:$0xff]  ;;  %v217_v18 = vld [vmem:[%s5132_s1 + $0x598] sm:$0xff]  ;;  %v339_v19 = vcombine.high %v36_v10, %v36_v10 }
  0x45   :  { %593 = vmatprep.mubr.f32.mxu0 %v3788_v20  ;;  %2832 = vmatpush3.msra.mxu1 %v134_v22  ;;  %v169_v21 = vld [vmem:[%s5132_s1 + $0x418] sm:$0xff] }
  0x46   :  { %594 = vmatmul.mubr.f32.vlgmr.msra.gmra.mxu0 %v3757_v9  ;;  %663 = vmatprep.mubr.f32.mxu1 %v3798_v23  ;;  %v201_v22 = vld [vmem:[%s5132_s1 + $0x518] sm:$0xff] }
  0x47   :  { %2836 = vmatprep.subr.mxu0 %v197_v24  ;;  %2871 = vmatprep.subr.mxu1 %v229_v25  ;;  %v184_v24 = vld [vmem:[%s5132_s1 + $0x490] sm:$0xff] }
  0x48   :  { %664 = vmatmul.mubr.f32.vlgmr.msra.gmra.mxu1 %v3772_v15  ;;  %2837 = vmatpush3.msra.mxu0 %v181_v26  ;;  %v216_v25 = vld [vmem:[%s5132_s1 + $0x590] sm:$0xff]  ;;  %v3970_v26 = vrot.slane %v36_v10, %v3514_v51  ;;  %v254_v10 = vld [vmem:[%s5132_s1 + $0x6c0] sm:$0xff] }
  0x49   :  { %2872 = vmatpush3.msra.mxu1 %v213_v27  ;;  %2838 = vmatprep.subr.mxu0 %v196_v28  ;;  %v168_v27 = vld [vmem:[%s5132_s1 + $0x410] sm:$0xff] }
  0x4a   :  { %2873 = vmatprep.subr.mxu1 %v228_v29  ;;  %2839 = vmatpush3.msra.mxu0 %v180_v30  ;;  %v200_v28 = vld [vmem:[%s5132_s1 + $0x510] sm:$0xff]  ;;  %v183_v29 = vld [vmem:[%s5132_s1 + $0x488] sm:$0xff] }
  0x4b   :  { %2874 = vmatpush3.msra.mxu1 %v212_v31  ;;  %2840 = vmatprep.subr.mxu0 %v195_v32  ;;  %v215_v30 = vld [vmem:[%s5132_s1 + $0x588] sm:$0xff]  ;;  %v3985_v31 = vrot.slane %v339_v19, %v3514_v51  ;;  %v269_v19 = vld [vmem:[%s5132_s1 + $0x738] sm:$0xff] }
  0x4c   :  { %2875 = vmatprep.subr.mxu1 %v227_v33  ;;  %2841 = vmatpush3.msra.mxu0 %v179_v34  ;;  %v167_v32 = vld [vmem:[%s5132_s1 + $0x408] sm:$0xff]  ;;  %v182_v34 = vld [vmem:[%s5132_s1 + $0x480] sm:$0xff] }
  0x4d   :  { %2876 = vmatpush3.msra.mxu1 %v211_v35  ;;  %2842 = vmatprep.subr.mxu0 %v194_v36  ;;  %v199_v33 = vld [vmem:[%s5132_s1 + $0x508] sm:$0xff]  ;;  %v214_v35 = vld [vmem:[%s5132_s1 + $0x580] sm:$0xff]  ;;  %v4001_v36 = vcombine.high %v3970_v26, %v3970_v26 }
  0x4e   :  { %2877 = vmatprep.subr.mxu1 %v226_v37  ;;  %2843 = vmatpush3.msra.mxu0 %v178_v38  ;;  %v166_v37 = vld [vmem:[%s5132_s1 + $0x400] sm:$0xff] }
  0x4f   :  { %2878 = vmatpush3.msra.mxu1 %v210_v39  ;;  %2844 = vmatprep.subr.mxu0 %v193_v40  ;;  %v198_v38 = vld [vmem:[%s5132_s1 + $0x500] sm:$0xff]  ;;  %v4011_v39 = vcombine.high %v3985_v31, %v3985_v31  ;;  %v261_v40 = vld [vmem:[%s5132_s1 + $0x6f8] sm:$0xff] }
  0x50   :  { %2879 = vmatprep.subr.mxu1 %v225_v41  ;;  %2845 = vmatpush3.msra.mxu0 %v177_v43  ;;  %v293_v41 = vld [vmem:[%s5132_s1 + $0x7f8] sm:$0xff] }
  0x51   :  { %2880 = vmatpush3.msra.mxu1 %v209_v44  ;;  %2846 = vmatprep.subr.mxu0 %v192_v45  ;;  %v245_v43 = vld [vmem:[%s5132_s1 + $0x678] sm:$0xff]  ;;  %v260_v45 = vld [vmem:[%s5132_s1 + $0x6f0] sm:$0xff] }
  0x52   :  { %2881 = vmatprep.subr.mxu1 %v224_v46  ;;  %2847 = vmatpush3.msra.mxu0 %v176_v47  ;;  %v277_v44 = vld [vmem:[%s5132_s1 + $0x778] sm:$0xff]  ;;  %v292_v46 = vld [vmem:[%s5132_s1 + $0x7f0] sm:$0xff] }
  0x53   :  { %2882 = vmatpush3.msra.mxu1 %v208_v48  ;;  %2848 = vmatprep.subr.mxu0 %v191_v49  ;;  %v244_v47 = vld [vmem:[%s5132_s1 + $0x670] sm:$0xff]  ;;  %v259_v49 = vld [vmem:[%s5132_s1 + $0x6e8] sm:$0xff] }
  0x54   :  { %2883 = vmatprep.subr.mxu1 %v223_v50  ;;  %2849 = vmatpush3.msra.mxu0 %v175_v52  ;;  %v276_v48 = vld [vmem:[%s5132_s1 + $0x770] sm:$0xff]  ;;  %v291_v50 = vld [vmem:[%s5132_s1 + $0x7e8] sm:$0xff] }
  0x55   :  { %2884 = vmatpush3.msra.mxu1 %v207_v53  ;;  %2850 = vmatprep.subr.mxu0 %v190_v54  ;;  %v243_v52 = vld [vmem:[%s5132_s1 + $0x668] sm:$0xff]  ;;  %v258_v54 = vld [vmem:[%s5132_s1 + $0x6e0] sm:$0xff] }
  0x56   :  { %2885 = vmatprep.subr.mxu1 %v222_v55  ;;  %2851 = vmatpush3.msra.mxu0 %v174_v56  ;;  %v275_v53 = vld [vmem:[%s5132_s1 + $0x768] sm:$0xff]  ;;  %v290_v55 = vld [vmem:[%s5132_s1 + $0x7e0] sm:$0xff] }
  0x57   :  { %2886 = vmatpush3.msra.mxu1 %v206_v57  ;;  %2852 = vmatprep.subr.mxu0 %v189_v58  ;;  %v242_v56 = vld [vmem:[%s5132_s1 + $0x660] sm:$0xff]  ;;  %v257_v58 = vld [vmem:[%s5132_s1 + $0x6d8] sm:$0xff] }
  0x58   :  { %2887 = vmatprep.subr.mxu1 %v221_v59  ;;  %2853 = vmatpush3.msra.mxu0 %v173_v60  ;;  %v274_v57 = vld [vmem:[%s5132_s1 + $0x760] sm:$0xff]  ;;  %v289_v59 = vld [vmem:[%s5132_s1 + $0x7d8] sm:$0xff] }
  0x59   :  { %2888 = vmatpush3.msra.mxu1 %v205_v61  ;;  %2854 = vmatprep.subr.mxu0 %v188_v63  ;;  %v241_v60 = vld [vmem:[%s5132_s1 + $0x658] sm:$0xff]  ;;  %v256_v63 = vld [vmem:[%s5132_s1 + $0x6d0] sm:$0xff] }
  0x5a   :  { %2889 = vmatprep.subr.mxu1 %v220_v0  ;;  %2855 = vmatpush3.msra.mxu0 %v172_v1  ;;  %v273_v61 = vld [vmem:[%s5132_s1 + $0x758] sm:$0xff]  ;;  %v288_v0 = vld [vmem:[%s5132_s1 + $0x7d0] sm:$0xff] }
  0x5b   :  { %2890 = vmatpush3.msra.mxu1 %v204_v2  ;;  %2856 = vmatprep.subr.mxu0 %v187_v4  ;;  %v240_v1 = vld [vmem:[%s5132_s1 + $0x650] sm:$0xff]  ;;  %v255_v4 = vld [vmem:[%s5132_s1 + $0x6c8] sm:$0xff] }
  0x5c   :  { %2891 = vmatprep.subr.mxu1 %v219_v5  ;;  %2857 = vmatpush3.msra.mxu0 %v171_v6  ;;  %v272_v2 = vld [vmem:[%s5132_s1 + $0x750] sm:$0xff]  ;;  %v287_v5 = vld [vmem:[%s5132_s1 + $0x7c8] sm:$0xff] }
  0x5d   :  { %2892 = vmatpush3.msra.mxu1 %v203_v7  ;;  %2858 = vmatprep.subr.mxu0 %v186_v12  ;;  %v239_v6 = vld [vmem:[%s5132_s1 + $0x648] sm:$0xff]  ;;  %v286_v12 = vld [vmem:[%s5132_s1 + $0x7c0] sm:$0xff] }
  0x5e   :  { %2893 = vmatprep.subr.mxu1 %v218_v13  ;;  %2859 = vmatpush3.msra.mxu0 %v170_v14  ;;  %v271_v7 = vld [vmem:[%s5132_s1 + $0x748] sm:$0xff]  ;;  %v238_v13 = vld [vmem:[%s5132_s1 + $0x640] sm:$0xff] }
  0x5f   :  { %2894 = vmatpush3.msra.mxu1 %v202_v16  ;;  %2860 = vmatprep.subr.mxu0 %v185_v17  ;;  %v270_v14 = vld [vmem:[%s5132_s1 + $0x740] sm:$0xff]  ;;  %v253_v16 = vld [vmem:[%s5132_s1 + $0x6b8] sm:$0xff] }
  0x60   :  { %2895 = vmatprep.subr.mxu1 %v217_v18  ;;  %2861 = vmatpush3.msra.mxu0 %v169_v21  ;;  %v285_v17 = vld [vmem:[%s5132_s1 + $0x7b8] sm:$0xff]  ;;  %v252_v21 = vld [vmem:[%s5132_s1 + $0x6b0] sm:$0xff] }
  0x61   :  { %2896 = vmatpush3.msra.mxu1 %v201_v22  ;;  %2862 = vmatprep.subr.mxu0 %v184_v24  ;;  %v237_v18 = vld [vmem:[%s5132_s1 + $0x638] sm:$0xff]  ;;  %v284_v22 = vld [vmem:[%s5132_s1 + $0x7b0] sm:$0xff] }
  0x62   :  { %2897 = vmatprep.subr.mxu1 %v216_v25  ;;  %2863 = vmatpush3.msra.mxu0 %v168_v27  ;;  %v236_v24 = vld [vmem:[%s5132_s1 + $0x630] sm:$0xff]  ;;  %v251_v27 = vld [vmem:[%s5132_s1 + $0x6a8] sm:$0xff] }
  0x63   :  { %2898 = vmatpush3.msra.mxu1 %v200_v28  ;;  %2864 = vmatprep.subr.mxu0 %v183_v29  ;;  %v268_v25 = vld [vmem:[%s5132_s1 + $0x730] sm:$0xff]  ;;  %v283_v28 = vld [vmem:[%s5132_s1 + $0x7a8] sm:$0xff] }
  0x64   :  { %2899 = vmatprep.subr.mxu1 %v215_v30  ;;  %2865 = vmatpush3.msra.mxu0 %v167_v32  ;;  %v235_v29 = vld [vmem:[%s5132_s1 + $0x628] sm:$0xff]  ;;  %v37_v32 = vld [vmem:[%s5131_s0 + $0x18] sm:$0xff] }
  0x65   :  { %2900 = vmatpush3.msra.mxu1 %v199_v33  ;;  %2866 = vmatprep.subr.mxu0 %v182_v34  ;;  %v267_v30 = vld [vmem:[%s5132_s1 + $0x728] sm:$0xff]  ;;  %v250_v33 = vld [vmem:[%s5132_s1 + $0x6a0] sm:$0xff] }
  0x66   :  { %2901 = vmatprep.subr.mxu1 %v214_v35  ;;  %2867 = vmatpush3.msra.mxu0 %v166_v37  ;;  %v282_v34 = vld [vmem:[%s5132_s1 + $0x7a0] sm:$0xff] }
  0x67   :  { %733 = vmatprep.mubr.f32.mxu0 %v4001_v36  ;;  %2902 = vmatpush3.msra.mxu1 %v198_v38  ;;  %v234_v35 = vld [vmem:[%s5132_s1 + $0x620] sm:$0xff]  ;;  %v249_v38 = vld [vmem:[%s5132_s1 + $0x698] sm:$0xff] }
  0x68   :  { %734 = vmatmul.mubr.f32.vlgmr.msra.gmra.mxu0 %v3970_v26  ;;  %803 = vmatprep.mubr.f32.mxu1 %v4011_v39  ;;  %v266_v37 = vld [vmem:[%s5132_s1 + $0x720] sm:$0xff] }
  0x69   :  { %2906 = vmatprep.subr.mxu0 %v261_v40  ;;  %2941 = vmatprep.subr.mxu1 %v293_v41  ;;  %v281_v40 = vld [vmem:[%s5132_s1 + $0x798] sm:$0xff]  ;;  %v356_v41 = vcombine.high %v37_v32, %v37_v32 }
  0x6a   :  { %804 = vmatmul.mubr.f32.vlgmr.msra.gmra.mxu1 %v3985_v31  ;;  %2907 = vmatpush3.msra.mxu0 %v245_v43  ;;  %v233_v43 = vld [vmem:[%s5132_s1 + $0x618] sm:$0xff] }
  0x6b   :  { %2942 = vmatpush3.msra.mxu1 %v277_v44  ;;  %2908 = vmatprep.subr.mxu0 %v260_v45  ;;  %v265_v44 = vld [vmem:[%s5132_s1 + $0x718] sm:$0xff]  ;;  %v248_v45 = vld [vmem:[%s5132_s1 + $0x690] sm:$0xff] }
  0x6c   :  { %2943 = vmatprep.subr.mxu1 %v292_v46  ;;  %2909 = vmatpush3.msra.mxu0 %v244_v47  ;;  %v280_v46 = vld [vmem:[%s5132_s1 + $0x790] sm:$0xff]  ;;  %v4183_v47 = vrot.slane %v37_v32, %v3514_v51  ;;  %v974_v32 = vld [vmem:[%s5134_s3 + $0xc8] sm:$0xff] }
  0x6d   :  { %2944 = vmatpush3.msra.mxu1 %v276_v48  ;;  %2910 = vmatprep.subr.mxu0 %v259_v49  ;;  %v232_v48 = vld [vmem:[%s5132_s1 + $0x610] sm:$0xff] }
  0x6e   :  { %2945 = vmatprep.subr.mxu1 %v291_v50  ;;  %2911 = vmatpush3.msra.mxu0 %v243_v52  ;;  %v264_v49 = vld [vmem:[%s5132_s1 + $0x710] sm:$0xff]  ;;  %v247_v50 = vld [vmem:[%s5132_s1 + $0x688] sm:$0xff] }
  0x6f   :  { %2946 = vmatpush3.msra.mxu1 %v275_v53  ;;  %2912 = vmatprep.subr.mxu0 %v258_v54  ;;  %v279_v52 = vld [vmem:[%s5132_s1 + $0x788] sm:$0xff]  ;;  %v4198_v53 = vrot.slane %v356_v41, %v3514_v51  ;;  %v989_v41 = vld [vmem:[%s5134_s3 + $0x140] sm:$0xff] }
  0x70   :  { %2947 = vmatprep.subr.mxu1 %v290_v55  ;;  %2913 = vmatpush3.msra.mxu0 %v242_v56  ;;  %v231_v54 = vld [vmem:[%s5132_s1 + $0x608] sm:$0xff]  ;;  %v246_v56 = vld [vmem:[%s5132_s1 + $0x680] sm:$0xff] }
  0x71   :  { %2948 = vmatpush3.msra.mxu1 %v274_v57  ;;  %2914 = vmatprep.subr.mxu0 %v257_v58  ;;  %v263_v55 = vld [vmem:[%s5132_s1 + $0x708] sm:$0xff]  ;;  %v278_v57 = vld [vmem:[%s5132_s1 + $0x780] sm:$0xff]  ;;  %v4214_v58 = vcombine.high %v4183_v47, %v4183_v47 }
  0x72   :  { %2949 = vmatprep.subr.mxu1 %v289_v59  ;;  %2915 = vmatpush3.msra.mxu0 %v241_v60  ;;  %v230_v59 = vld [vmem:[%s5132_s1 + $0x600] sm:$0xff] }
  0x73   :  { %2950 = vmatpush3.msra.mxu1 %v273_v61  ;;  %2916 = vmatprep.subr.mxu0 %v256_v63  ;;  %v262_v60 = vld [vmem:[%s5132_s1 + $0x700] sm:$0xff]  ;;  %v4224_v61 = vcombine.high %v4198_v53, %v4198_v53  ;;  %v980_v63 = vld [vmem:[%s5134_s3 + $0xf8] sm:$0xff] }
  0x74   :  { %2951 = vmatprep.subr.mxu1 %v288_v0  ;;  %2917 = vmatpush3.msra.mxu0 %v240_v1  ;;  %v1012_v0 = vld [vmem:[%s5134_s3 + $0x1f8] sm:$0xff] }
  0x75   :  { %2952 = vmatpush3.msra.mxu1 %v272_v2  ;;  %2918 = vmatprep.subr.mxu0 %v255_v4  ;;  %v964_v1 = vld [vmem:[%s5134_s3 + $0x78] sm:$0xff]  ;;  %v979_v4 = vld [vmem:[%s5134_s3 + $0xf0] sm:$0xff] }
  0x76   :  { %2953 = vmatprep.subr.mxu1 %v287_v5  ;;  %2919 = vmatpush3.msra.mxu0 %v239_v6  ;;  %v996_v2 = vld [vmem:[%s5134_s3 + $0x178] sm:$0xff]  ;;  %v1011_v5 = vld [vmem:[%s5134_s3 + $0x1f0] sm:$0xff] }
  0x77   :  { %2954 = vmatpush3.msra.mxu1 %v271_v7  ;;  %2920 = vmatprep.subr.mxu0 %v254_v10  ;;  %v963_v6 = vld [vmem:[%s5134_s3 + $0x70] sm:$0xff]  ;;  %v978_v10 = vld [vmem:[%s5134_s3 + $0xe8] sm:$0xff] }
  0x78   :  { %2955 = vmatprep.subr.mxu1 %v286_v12  ;;  %2921 = vmatpush3.msra.mxu0 %v238_v13  ;;  %v995_v7 = vld [vmem:[%s5134_s3 + $0x170] sm:$0xff]  ;;  %v1010_v12 = vld [vmem:[%s5134_s3 + $0x1e8] sm:$0xff] }
  0x79   :  { %2956 = vmatpush3.msra.mxu1 %v270_v14  ;;  %2922 = vmatprep.subr.mxu0 %v253_v16  ;;  %v962_v13 = vld [vmem:[%s5134_s3 + $0x68] sm:$0xff]  ;;  %v977_v16 = vld [vmem:[%s5134_s3 + $0xe0] sm:$0xff] }
  0x7a   :  { %2957 = vmatprep.subr.mxu1 %v285_v17  ;;  %2923 = vmatpush3.msra.mxu0 %v237_v18  ;;  %v994_v14 = vld [vmem:[%s5134_s3 + $0x168] sm:$0xff]  ;;  %v1009_v17 = vld [vmem:[%s5134_s3 + $0x1e0] sm:$0xff] }
  0x7b   :  { %2958 = vmatpush3.msra.mxu1 %v269_v19  ;;  %2924 = vmatprep.subr.mxu0 %v252_v21  ;;  %v961_v18 = vld [vmem:[%s5134_s3 + $0x60] sm:$0xff]  ;;  %v976_v21 = vld [vmem:[%s5134_s3 + $0xd8] sm:$0xff] }
  0x7c   :  { %2959 = vmatprep.subr.mxu1 %v284_v22  ;;  %2925 = vmatpush3.msra.mxu0 %v236_v24  ;;  %v993_v19 = vld [vmem:[%s5134_s3 + $0x160] sm:$0xff]  ;;  %v1008_v22 = vld [vmem:[%s5134_s3 + $0x1d8] sm:$0xff] }
  0x7d   :  { %2960 = vmatpush3.msra.mxu1 %v268_v25  ;;  %2926 = vmatprep.subr.mxu0 %v251_v27  ;;  %v960_v24 = vld [vmem:[%s5134_s3 + $0x58] sm:$0xff]  ;;  %v975_v27 = vld [vmem:[%s5134_s3 + $0xd0] sm:$0xff] }
  0x7e   :  { %2961 = vmatprep.subr.mxu1 %v283_v28  ;;  %2927 = vmatpush3.msra.mxu0 %v235_v29  ;;  %v992_v25 = vld [vmem:[%s5134_s3 + $0x158] sm:$0xff]  ;;  %v1007_v28 = vld [vmem:[%s5134_s3 + $0x1d0] sm:$0xff] }
  0x7f   :  { %2962 = vmatpush3.msra.mxu1 %v267_v30  ;;  %2928 = vmatprep.subr.mxu0 %v250_v33  ;;  %v959_v29 = vld [vmem:[%s5134_s3 + $0x50] sm:$0xff]  ;;  %v1006_v33 = vld [vmem:[%s5134_s3 + $0x1c8] sm:$0xff] }
  0x80   :  { %2963 = vmatprep.subr.mxu1 %v282_v34  ;;  %2929 = vmatpush3.msra.mxu0 %v234_v35  ;;  %v991_v30 = vld [vmem:[%s5134_s3 + $0x150] sm:$0xff]  ;;  %v958_v34 = vld [vmem:[%s5134_s3 + $0x48] sm:$0xff] }
  0x81   :  { %2964 = vmatpush3.msra.mxu1 %v266_v37  ;;  %2930 = vmatprep.subr.mxu0 %v249_v38  ;;  %v990_v35 = vld [vmem:[%s5134_s3 + $0x148] sm:$0xff]  ;;  %v973_v37 = vld [vmem:[%s5134_s3 + $0xc0] sm:$0xff] }
  0x82   :  { %2965 = vmatprep.subr.mxu1 %v281_v40  ;;  %2931 = vmatpush3.msra.mxu0 %v233_v43  ;;  %v1005_v38 = vld [vmem:[%s5134_s3 + $0x1c0] sm:$0xff]  ;;  %v972_v43 = vld [vmem:[%s5134_s3 + $0xb8] sm:$0xff] }
  0x83   :  { %2966 = vmatpush3.msra.mxu1 %v265_v44  ;;  %2932 = vmatprep.subr.mxu0 %v248_v45  ;;  %v957_v40 = vld [vmem:[%s5134_s3 + $0x40] sm:$0xff]  ;;  %v1004_v44 = vld [vmem:[%s5134_s3 + $0x1b8] sm:$0xff] }
  0x84   :  { %2967 = vmatprep.subr.mxu1 %v280_v46  ;;  %2933 = vmatpush3.msra.mxu0 %v232_v48  ;;  %v956_v45 = vld [vmem:[%s5134_s3 + $0x38] sm:$0xff]  ;;  %v971_v48 = vld [vmem:[%s5134_s3 + $0xb0] sm:$0xff] }
  0x85   :  { %2968 = vmatpush3.msra.mxu1 %v264_v49  ;;  %2934 = vmatprep.subr.mxu0 %v247_v50  ;;  %v988_v46 = vld [vmem:[%s5134_s3 + $0x138] sm:$0xff]  ;;  %v1003_v49 = vld [vmem:[%s5134_s3 + $0x1b0] sm:$0xff] }
  0x86   :  { %2969 = vmatprep.subr.mxu1 %v279_v52  ;;  %2935 = vmatpush3.msra.mxu0 %v231_v54  ;;  %v955_v50 = vld [vmem:[%s5134_s3 + $0x30] sm:$0xff]  ;;  %v970_v54 = vld [vmem:[%s5134_s3 + $0xa8] sm:$0xff] }
  0x87   :  { %2970 = vmatpush3.msra.mxu1 %v263_v55  ;;  %2936 = vmatprep.subr.mxu0 %v246_v56  ;;  %v987_v52 = vld [vmem:[%s5134_s3 + $0x130] sm:$0xff]  ;;  %v1002_v55 = vld [vmem:[%s5134_s3 + $0x1a8] sm:$0xff] }
  0x88   :  { %2971 = vmatprep.subr.mxu1 %v278_v57  ;;  %2937 = vmatpush3.msra.mxu0 %v230_v59  ;;  %v954_v56 = vld [vmem:[%s5134_s3 + $0x28] sm:$0xff]  ;;  %v969_v59 = vld [vmem:[%s5134_s3 + $0xa0] sm:$0xff] }
  0x89   :  { %873 = vmatprep.mubr.f32.mxu0 %v4214_v58  ;;  %2972 = vmatpush3.msra.mxu1 %v262_v60  ;;  %v986_v57 = vld [vmem:[%s5134_s3 + $0x128] sm:$0xff]  ;;  %v1001_v60 = vld [vmem:[%s5134_s3 + $0x1a0] sm:$0xff] }
  0x8a   :  { %874 = vmatmul.mubr.f32.vlgmr.msra.gmra.mxu0 %v4183_v47  ;;  %943 = vmatprep.mubr.f32.mxu1 %v4224_v61 }
  0x8b   :  { %2976 = vmatprep.subr.mxu0 %v980_v63  ;;  %3011 = vmatprep.subr.mxu1 %v1012_v0  ;;  %v953_v63 = vld [vmem:[%s5134_s3 + $0x20] sm:$0xff] }
  0x8c   :  { %944 = vmatmul.mubr.f32.vlgmr.msra.gmra.mxu1 %v4198_v53  ;;  %2977 = vmatpush3.msra.mxu0 %v964_v1  ;;  %v985_v0 = vld [vmem:[%s5134_s3 + $0x120] sm:$0xff]  ;;  %v968_v1 = vld [vmem:[%s5134_s3 + $0x98] sm:$0xff] }
  0x8d   :  { %3012 = vmatpush3.msra.mxu1 %v996_v2  ;;  %2978 = vmatprep.subr.mxu0 %v979_v4  ;;  %v1000_v2 = vld [vmem:[%s5134_s3 + $0x198] sm:$0xff] }
  0x8e   :  { %3013 = vmatprep.subr.mxu1 %v1011_v5  ;;  %2979 = vmatpush3.msra.mxu0 %v963_v6  ;;  %v952_v4 = vld [vmem:[%s5134_s3 + $0x18] sm:$0xff]  ;;  %v967_v6 = vld [vmem:[%s5134_s3 + $0x90] sm:$0xff] }
  0x8f   :  { %3014 = vmatpush3.msra.mxu1 %v995_v7  ;;  %2980 = vmatprep.subr.mxu0 %v978_v10  ;;  %v984_v5 = vld [vmem:[%s5134_s3 + $0x118] sm:$0xff]  ;;  %v999_v7 = vld [vmem:[%s5134_s3 + $0x190] sm:$0xff] }
  0x90   :  { %3015 = vmatprep.subr.mxu1 %v1010_v12  ;;  %2981 = vmatpush3.msra.mxu0 %v962_v13  ;;  %v951_v10 = vld [vmem:[%s5134_s3 + $0x10] sm:$0xff]  ;;  %v966_v13 = vld [vmem:[%s5134_s3 + $0x88] sm:$0xff] }
  0x91   :  { %3016 = vmatpush3.msra.mxu1 %v994_v14  ;;  %2982 = vmatprep.subr.mxu0 %v977_v16  ;;  %v983_v12 = vld [vmem:[%s5134_s3 + $0x110] sm:$0xff]  ;;  %v998_v14 = vld [vmem:[%s5134_s3 + $0x188] sm:$0xff] }
  0x92   :  { %3017 = vmatprep.subr.mxu1 %v1009_v17  ;;  %2983 = vmatpush3.msra.mxu0 %v961_v18  ;;  %v950_v16 = vld [vmem:[%s5134_s3 + $0x8] sm:$0xff]  ;;  %v965_v18 = vld [vmem:[%s5134_s3 + $0x80] sm:$0xff] }
  0x93   :  { %3018 = vmatpush3.msra.mxu1 %v993_v19  ;;  %2984 = vmatprep.subr.mxu0 %v976_v21  ;;  %v982_v17 = vld [vmem:[%s5134_s3 + $0x108] sm:$0xff]  ;;  %v997_v19 = vld [vmem:[%s5134_s3 + $0x180] sm:$0xff] }
  0x94   :  { %3019 = vmatprep.subr.mxu1 %v1008_v22  ;;  %2985 = vmatpush3.msra.mxu0 %v960_v24  ;;  %v949_v21 = vld [vmem:[%s5134_s3] sm:$0xff]  ;;  %v1044_v24 = vld [vmem:[%s5134_s3 + $0x2f8] sm:$0xff] }
  0x95   :  { %3020 = vmatpush3.msra.mxu1 %v992_v25  ;;  %2986 = vmatprep.subr.mxu0 %v975_v27  ;;  %v981_v22 = vld [vmem:[%s5134_s3 + $0x100] sm:$0xff]  ;;  %v1076_v25 = vld [vmem:[%s5134_s3 + $0x3f8] sm:$0xff] }
  0x96   :  { %3021 = vmatprep.subr.mxu1 %v1007_v28  ;;  %2987 = vmatpush3.msra.mxu0 %v959_v29  ;;  %v1028_v27 = vld [vmem:[%s5134_s3 + $0x278] sm:$0xff]  ;;  %v1075_v29 = vld [vmem:[%s5134_s3 + $0x3f0] sm:$0xff] }
  0x97   :  { %3022 = vmatpush3.msra.mxu1 %v991_v30  ;;  %2988 = vmatprep.subr.mxu0 %v974_v32  ;;  %v1060_v28 = vld [vmem:[%s5134_s3 + $0x378] sm:$0xff]  ;;  %v1042_v30 = vld [vmem:[%s5134_s3 + $0x2e8] sm:$0xff] }
  0x98   :  { %3023 = vmatprep.subr.mxu1 %v1006_v33  ;;  %2989 = vmatpush3.msra.mxu0 %v958_v34  ;;  %v1074_v32 = vld [vmem:[%s5134_s3 + $0x3e8] sm:$0xff] }
  0x99   :  { %3024 = vmatpush3.msra.mxu1 %v990_v35  ;;  %2990 = vmatprep.subr.mxu0 %v973_v37 }
  0x9a   :  { %3025 = vmatprep.subr.mxu1 %v1005_v38  ;;  %2991 = vmatpush3.msra.mxu0 %v957_v40 }
  0x9b   :  { %3026 = vmatpush3.msra.mxu1 %v989_v41  ;;  %2992 = vmatprep.subr.mxu0 %v972_v43 }
  0x9c   :  { %3027 = vmatprep.subr.mxu1 %v1004_v44  ;;  %2993 = vmatpush3.msra.mxu0 %v956_v45 }
  0x9d   :  { %3028 = vmatpush3.msra.mxu1 %v988_v46  ;;  %2994 = vmatprep.subr.mxu0 %v971_v48 }
  0x9e   :  { %3029 = vmatprep.subr.mxu1 %v1003_v49  ;;  %2995 = vmatpush3.msra.mxu0 %v955_v50 }
  0x9f   :  { %3030 = vmatpush3.msra.mxu1 %v987_v52  ;;  %2996 = vmatprep.subr.mxu0 %v970_v54 }
  0xa0   :  { %3031 = vmatprep.subr.mxu1 %v1002_v55  ;;  %2997 = vmatpush3.msra.mxu0 %v954_v56 }
  0xa1   :  { %3032 = vmatpush3.msra.mxu1 %v986_v57  ;;  %2998 = vmatprep.subr.mxu0 %v969_v59 }
  0xa2   :  { %3033 = vmatprep.subr.mxu1 %v1001_v60  ;;  %2999 = vmatpush3.msra.mxu0 %v953_v63 }
  0xa3   :  { %3034 = vmatpush3.msra.mxu1 %v985_v0  ;;  %3000 = vmatprep.subr.mxu0 %v968_v1 }
  0xa4   :  { %3035 = vmatprep.subr.mxu1 %v1000_v2  ;;  %3001 = vmatpush3.msra.mxu0 %v952_v4 }
  0xa5   :  { %3036 = vmatpush3.msra.mxu1 %v984_v5  ;;  %3002 = vmatprep.subr.mxu0 %v967_v6 }
  0xa6   :  { %3037 = vmatprep.subr.mxu1 %v999_v7  ;;  %3003 = vmatpush3.msra.mxu0 %v951_v10 }
  0xa7   :  { %3038 = vmatpush3.msra.mxu1 %v983_v12  ;;  %3004 = vmatprep.subr.mxu0 %v966_v13 }
  0xa8   :  { %3039 = vmatprep.subr.mxu1 %v998_v14  ;;  %3005 = vmatpush3.msra.mxu0 %v950_v16 }
  0xa9   :  { %3040 = vmatpush3.msra.mxu1 %v982_v17  ;;  %3006 = vmatprep.subr.mxu0 %v965_v18 }
  0xaa   :  { %3041 = vmatprep.subr.mxu1 %v997_v19  ;;  %3007 = vmatpush3.msra.mxu0 %v949_v21 }
  0xab   :  { %1276 = vmatprep.mubr.f32.mxu0 %v3575_v8  ;;  %3042 = vmatpush3.msra.mxu1 %v981_v22  ;;  %v1043_v8 = vld [vmem:[%s5134_s3 + $0x2f0] sm:$0xff] }
  0xac   :  { %1277 = vmatmul.mubr.f32.vlgmr.msra.gmra.mxu0 %v3544_v62  ;;  %1346 = vmatprep.mubr.f32.mxu1 %v3585_v11  ;;  %v1027_v62 = vld [vmem:[%s5134_s3 + $0x270] sm:$0xff] }
  0xad   :  { %3046 = vmatprep.subr.mxu0 %v1044_v24  ;;  %3081 = vmatprep.subr.mxu1 %v1076_v25  ;;  %v1059_v11 = vld [vmem:[%s5134_s3 + $0x370] sm:$0xff] }
  0xae   :  { %1347 = vmatmul.mubr.f32.vlgmr.msra.gmra.mxu1 %v3559_v3  ;;  %3047 = vmatpush3.msra.mxu0 %v1028_v27 }
  0xaf   :  { %3082 = vmatpush3.msra.mxu1 %v1060_v28 }
  0xb0   :  { %17 = vsyncpa [#allocation5], 0  ;;  %3048 = vmatprep.subr.mxu0 %v1043_v8  ;;  %3083 = vmatprep.subr.mxu1 %v1075_v29  ;;  %v1026_v3 = vld [vmem:[%s5134_s3 + $0x268] sm:$0xff]  ;;  %v1041_v34 = vld [vmem:[%s5134_s3 + $0x2e0] sm:$0xff]  ;;  %vm2543_vm0 = vcmask 9216   ;;  %vm1942_vm1 = vcmask 1041408  }
  0xb1   :  { %v1058_v33 = vld [vmem:[%s5134_s3 + $0x368] sm:$0xff]  ;;  %3049 = vmatpush3.msra.mxu0 %v1027_v62  ;;  %3084 = vmatpush3.msra.mxu1 %v1059_v11  ;;  %v1073_v35 = vld [vmem:[%s5134_s3 + $0x3e0] sm:$0xff]  ;;  %v1040_v40 = vld [vmem:[%s5134_s3 + $0x2d8] sm:$0xff]  ;;  %vm1938_vm2 = vcmask 15360   ;;  %s3317_s26 = smov [#allocation4]  }
  0xb2   :  { %3050 = vmatprep.subr.mxu0 %v1042_v30  ;;  %3085 = vmatprep.subr.mxu1 %v1074_v32  ;;  %v1025_v37 = vld [vmem:[%s5134_s3 + $0x260] sm:$0xff]  ;;  %v1072_v41 = vld [vmem:[%s5134_s3 + $0x3d8] sm:$0xff]  ;;  %v1039_v45 = vld [vmem:[%s5134_s3 + $0x2d0] sm:$0xff]  ;;  %s2654_s27 = sshll.u32 %s3317_s26, 4  ;;  %s2655_s27 = int_to_ptr.vmem [resolvable:$true] %s2654_s27 }
  0xb3   :  { %v1057_v38 = vld [vmem:[%s5134_s3 + $0x360] sm:$0xff]  ;;  %3051 = vmatpush3.msra.mxu0 %v1026_v3  ;;  %3086 = vmatpush3.msra.mxu1 %v1058_v33  ;;  %v1024_v43 = vld [vmem:[%s5134_s3 + $0x258] sm:$0xff]  ;;  %v1071_v46 = vld [vmem:[%s5134_s3 + $0x3d0] sm:$0xff] }
  0xb4   :  { %3052 = vmatprep.subr.mxu0 %v1041_v34  ;;  %3087 = vmatprep.subr.mxu1 %v1073_v35  ;;  %v1056_v44 = vld [vmem:[%s5134_s3 + $0x358] sm:$0xff]  ;;  %v1023_v48 = vld [vmem:[%s5134_s3 + $0x250] sm:$0xff]  ;;  %v1038_v50 = vld [vmem:[%s5134_s3 + $0x2c8] sm:$0xff] }
  0xb5   :  { %3053 = vmatpush3.msra.mxu0 %v1025_v37  ;;  %3088 = vmatpush3.msra.mxu1 %v1057_v38  ;;  %v1055_v49 = vld [vmem:[%s5134_s3 + $0x350] sm:$0xff]  ;;  %v1070_v52 = vld [vmem:[%s5134_s3 + $0x3c8] sm:$0xff]  ;;  %v1037_v56 = vld [vmem:[%s5134_s3 + $0x2c0] sm:$0xff] }
  0xb6   :  { %3054 = vmatprep.subr.mxu0 %v1040_v40  ;;  %3089 = vmatprep.subr.mxu1 %v1072_v41  ;;  %v1022_v54 = vld [vmem:[%s5134_s3 + $0x248] sm:$0xff]  ;;  %v1069_v57 = vld [vmem:[%s5134_s3 + $0x3c0] sm:$0xff]  ;;  %v1036_v63 = vld [vmem:[%s5134_s3 + $0x2b8] sm:$0xff] }
  0xb7   :  { %3055 = vmatpush3.msra.mxu0 %v1024_v43  ;;  %3090 = vmatpush3.msra.mxu1 %v1056_v44  ;;  %v1054_v55 = vld [vmem:[%s5134_s3 + $0x348] sm:$0xff]  ;;  %v1021_v59 = vld [vmem:[%s5134_s3 + $0x240] sm:$0xff]  ;;  %v1068_v0 = vld [vmem:[%s5134_s3 + $0x3b8] sm:$0xff] }
  0xb8   :  { %3056 = vmatprep.subr.mxu0 %v1039_v45  ;;  %3091 = vmatprep.subr.mxu1 %v1071_v46  ;;  %v1053_v60 = vld [vmem:[%s5134_s3 + $0x340] sm:$0xff]  ;;  %v1020_v1 = vld [vmem:[%s5134_s3 + $0x238] sm:$0xff]  ;;  %v1035_v4 = vld [vmem:[%s5134_s3 + $0x2b0] sm:$0xff] }
  0xb9   :  { %3057 = vmatpush3.msra.mxu0 %v1023_v48  ;;  %3092 = vmatpush3.msra.mxu1 %v1055_v49  ;;  %v1052_v2 = vld [vmem:[%s5134_s3 + $0x338] sm:$0xff]  ;;  %v1067_v5 = vld [vmem:[%s5134_s3 + $0x3b0] sm:$0xff]  ;;  %v1034_v10 = vld [vmem:[%s5134_s3 + $0x2a8] sm:$0xff] }
  0xba   :  { %3058 = vmatprep.subr.mxu0 %v1038_v50  ;;  %3093 = vmatprep.subr.mxu1 %v1070_v52  ;;  %v1019_v6 = vld [vmem:[%s5134_s3 + $0x230] sm:$0xff]  ;;  %v1066_v12 = vld [vmem:[%s5134_s3 + $0x3a8] sm:$0xff]  ;;  %v1033_v16 = vld [vmem:[%s5134_s3 + $0x2a0] sm:$0xff] }
  0xbb   :  { %3059 = vmatpush3.msra.mxu0 %v1022_v54  ;;  %3094 = vmatpush3.msra.mxu1 %v1054_v55  ;;  %v1051_v7 = vld [vmem:[%s5134_s3 + $0x330] sm:$0xff]  ;;  %v1018_v13 = vld [vmem:[%s5134_s3 + $0x228] sm:$0xff]  ;;  %v1065_v17 = vld [vmem:[%s5134_s3 + $0x3a0] sm:$0xff] }
  0xbc   :  { %3060 = vmatprep.subr.mxu0 %v1037_v56  ;;  %3095 = vmatprep.subr.mxu1 %v1069_v57  ;;  %v1050_v14 = vld [vmem:[%s5134_s3 + $0x328] sm:$0xff]  ;;  %v1017_v18 = vld [vmem:[%s5134_s3 + $0x220] sm:$0xff]  ;;  %v1032_v21 = vld [vmem:[%s5134_s3 + $0x298] sm:$0xff] }
  0xbd   :  { %3061 = vmatpush3.msra.mxu0 %v1021_v59  ;;  %3096 = vmatpush3.msra.mxu1 %v1053_v60  ;;  %v1049_v19 = vld [vmem:[%s5134_s3 + $0x320] sm:$0xff]  ;;  %v1064_v22 = vld [vmem:[%s5134_s3 + $0x398] sm:$0xff]  ;;  %v1031_v27 = vld [vmem:[%s5134_s3 + $0x290] sm:$0xff] }
  0xbe   :  { %3062 = vmatprep.subr.mxu0 %v1036_v63  ;;  %3097 = vmatprep.subr.mxu1 %v1068_v0  ;;  %v1016_v24 = vld [vmem:[%s5134_s3 + $0x218] sm:$0xff]  ;;  %v1063_v28 = vld [vmem:[%s5134_s3 + $0x390] sm:$0xff]  ;;  %v1030_v62 = vld [vmem:[%s5134_s3 + $0x288] sm:$0xff] }
  0xbf   :  { %3063 = vmatpush3.msra.mxu0 %v1020_v1  ;;  %3098 = vmatpush3.msra.mxu1 %v1052_v2  ;;  %v1048_v25 = vld [vmem:[%s5134_s3 + $0x318] sm:$0xff]  ;;  %v1015_v8 = vld [vmem:[%s5134_s3 + $0x210] sm:$0xff]  ;;  %v1062_v11 = vld [vmem:[%s5134_s3 + $0x388] sm:$0xff] }
  0xc0   :  { %3064 = vmatprep.subr.mxu0 %v1035_v4  ;;  %3099 = vmatprep.subr.mxu1 %v1067_v5  ;;  %v1047_v29 = vld [vmem:[%s5134_s3 + $0x310] sm:$0xff]  ;;  %v1014_v30 = vld [vmem:[%s5134_s3 + $0x208] sm:$0xff]  ;;  %v1029_v3 = vld [vmem:[%s5134_s3 + $0x280] sm:$0xff] }
  0xc1   :  { %3065 = vmatpush3.msra.mxu0 %v1019_v6  ;;  %3100 = vmatpush3.msra.mxu1 %v1051_v7  ;;  %v1046_v32 = vld [vmem:[%s5134_s3 + $0x308] sm:$0xff]  ;;  %v1061_v33 = vld [vmem:[%s5134_s3 + $0x380] sm:$0xff]  ;;  %v1108_v37 = vld [vmem:[%s5134_s3 + $0x4f8] sm:$0xff] }
  0xc2   :  { %3066 = vmatprep.subr.mxu0 %v1034_v10  ;;  %3101 = vmatprep.subr.mxu1 %v1066_v12  ;;  %v1013_v34 = vld [vmem:[%s5134_s3 + $0x200] sm:$0xff]  ;;  %v1140_v38 = vld [vmem:[%s5134_s3 + $0x5f8] sm:$0xff]  ;;  %v1139_v43 = vld [vmem:[%s5134_s3 + $0x5f0] sm:$0xff] }
  0xc3   :  { %3067 = vmatpush3.msra.mxu0 %v1018_v13  ;;  %3102 = vmatpush3.msra.mxu1 %v1050_v14  ;;  %v1045_v35 = vld [vmem:[%s5134_s3 + $0x300] sm:$0xff]  ;;  %v1092_v40 = vld [vmem:[%s5134_s3 + $0x478] sm:$0xff]  ;;  %v1106_v44 = vld [vmem:[%s5134_s3 + $0x4e8] sm:$0xff] }
  0xc4   :  { %3068 = vmatprep.subr.mxu0 %v1033_v16  ;;  %3103 = vmatprep.subr.mxu1 %v1065_v17  ;;  %v1124_v41 = vld [vmem:[%s5134_s3 + $0x578] sm:$0xff]  ;;  %v1138_v45 = vld [vmem:[%s5134_s3 + $0x5e8] sm:$0xff]  ;;  %v1105_v48 = vld [vmem:[%s5134_s3 + $0x4e0] sm:$0xff] }
  0xc5   :  { %3069 = vmatpush3.msra.mxu0 %v1017_v18  ;;  %3104 = vmatpush3.msra.mxu1 %v1049_v19  ;;  %v1122_v46 = vld [vmem:[%s5134_s3 + $0x568] sm:$0xff]  ;;  %v1137_v49 = vld [vmem:[%s5134_s3 + $0x5e0] sm:$0xff]  ;;  %v1104_v54 = vld [vmem:[%s5134_s3 + $0x4d8] sm:$0xff] }
  0xc6   :  { %3070 = vmatprep.subr.mxu0 %v1032_v21  ;;  %3105 = vmatprep.subr.mxu1 %v1064_v22  ;;  %v1089_v50 = vld [vmem:[%s5134_s3 + $0x460] sm:$0xff]  ;;  %v1136_v55 = vld [vmem:[%s5134_s3 + $0x5d8] sm:$0xff]  ;;  %v1103_v59 = vld [vmem:[%s5134_s3 + $0x4d0] sm:$0xff] }
  0xc7   :  { %3071 = vmatpush3.msra.mxu0 %v1016_v24  ;;  %3106 = vmatpush3.msra.mxu1 %v1048_v25  ;;  %v1121_v52 = vld [vmem:[%s5134_s3 + $0x560] sm:$0xff]  ;;  %v1088_v56 = vld [vmem:[%s5134_s3 + $0x458] sm:$0xff]  ;;  %v1135_v60 = vld [vmem:[%s5134_s3 + $0x5d0] sm:$0xff] }
  0xc8   :  { %3072 = vmatprep.subr.mxu0 %v1031_v27  ;;  %3107 = vmatprep.subr.mxu1 %v1063_v28  ;;  %v1120_v57 = vld [vmem:[%s5134_s3 + $0x558] sm:$0xff]  ;;  %v1087_v63 = vld [vmem:[%s5134_s3 + $0x450] sm:$0xff]  ;;  %v1102_v1 = vld [vmem:[%s5134_s3 + $0x4c8] sm:$0xff] }
  0xc9   :  { %3073 = vmatpush3.msra.mxu0 %v1015_v8  ;;  %3108 = vmatpush3.msra.mxu1 %v1047_v29  ;;  %v1119_v0 = vld [vmem:[%s5134_s3 + $0x550] sm:$0xff]  ;;  %v1134_v2 = vld [vmem:[%s5134_s3 + $0x5c8] sm:$0xff]  ;;  %v1101_v6 = vld [vmem:[%s5134_s3 + $0x4c0] sm:$0xff] }
  0xca   :  { %3074 = vmatprep.subr.mxu0 %v1030_v62  ;;  %3109 = vmatprep.subr.mxu1 %v1062_v11  ;;  %v1086_v4 = vld [vmem:[%s5134_s3 + $0x448] sm:$0xff]  ;;  %v1133_v7 = vld [vmem:[%s5134_s3 + $0x5c0] sm:$0xff]  ;;  %v1100_v13 = vld [vmem:[%s5134_s3 + $0x4b8] sm:$0xff] }
  0xcb   :  { %3075 = vmatpush3.msra.mxu0 %v1014_v30  ;;  %3110 = vmatpush3.msra.mxu1 %v1046_v32  ;;  %v1118_v5 = vld [vmem:[%s5134_s3 + $0x548] sm:$0xff]  ;;  %v1085_v10 = vld [vmem:[%s5134_s3 + $0x440] sm:$0xff]  ;;  %v1132_v14 = vld [vmem:[%s5134_s3 + $0x5b8] sm:$0xff] }
  0xcc   :  { %3076 = vmatprep.subr.mxu0 %v1029_v3  ;;  %3111 = vmatprep.subr.mxu1 %v1061_v33  ;;  %v1117_v12 = vld [vmem:[%s5134_s3 + $0x540] sm:$0xff]  ;;  %v1084_v16 = vld [vmem:[%s5134_s3 + $0x438] sm:$0xff]  ;;  %v1099_v18 = vld [vmem:[%s5134_s3 + $0x4b0] sm:$0xff] }
  0xcd   :  { %3077 = vmatpush3.msra.mxu0 %v1013_v34  ;;  %1416 = vmatprep.mubr.f32.mxu0 %v3788_v20  ;;  %v1107_v20 = vld [vmem:[%s5134_s3 + $0x4f0] sm:$0xff]  ;;  %v1116_v17 = vld [vmem:[%s5134_s3 + $0x538] sm:$0xff]  ;;  %v1098_v24 = vld [vmem:[%s5134_s3 + $0x4a8] sm:$0xff] }
  0xce   :  { %3112 = vmatpush3.msra.mxu1 %v1045_v35  ;;  %1417 = vmatmul.mubr.f32.vlgmr.msra.gmra.mxu0 %v3757_v9  ;;  %v1091_v9 = vld [vmem:[%s5134_s3 + $0x470] sm:$0xff]  ;;  %v1130_v25 = vld [vmem:[%s5134_s3 + $0x5a8] sm:$0xff]  ;;  %v1097_v8 = vld [vmem:[%s5134_s3 + $0x4a0] sm:$0xff] }
  0xcf   :  { %1486 = vmatprep.mubr.f32.mxu1 %v3798_v23  ;;  %3116 = vmatprep.subr.mxu0 %v1108_v37  ;;  %v1123_v23 = vld [vmem:[%s5134_s3 + $0x570] sm:$0xff]  ;;  %v1082_v27 = vld [vmem:[%s5134_s3 + $0x428] sm:$0xff]  ;;  %v1129_v29 = vld [vmem:[%s5134_s3 + $0x5a0] sm:$0xff] }
  0xd0   :  { %3151 = vmatprep.subr.mxu1 %v1140_v38  ;;  %1487 = vmatmul.mubr.f32.vlgmr.msra.gmra.mxu1 %v3772_v15  ;;  %v1090_v15 = vld [vmem:[%s5134_s3 + $0x468] sm:$0xff]  ;;  %v1131_v19 = vld [vmem:[%s5134_s3 + $0x5b0] sm:$0xff]  ;;  %v1081_v62 = vld [vmem:[%s5134_s3 + $0x420] sm:$0xff] }
  0xd1   :  { %3117 = vmatpush3.msra.mxu0 %v1092_v40  ;;  %3152 = vmatpush3.msra.mxu1 %v1124_v41  ;;  %v1083_v21 = vld [vmem:[%s5134_s3 + $0x430] sm:$0xff]  ;;  %v1114_v28 = vld [vmem:[%s5134_s3 + $0x528] sm:$0xff]  ;;  %v1113_v11 = vld [vmem:[%s5134_s3 + $0x520] sm:$0xff] }
  0xd2   :  { %3118 = vmatprep.subr.mxu0 %v1107_v20  ;;  %3153 = vmatprep.subr.mxu1 %v1139_v43  ;;  %v1115_v22 = vld [vmem:[%s5134_s3 + $0x530] sm:$0xff]  ;;  %v1096_v30 = vld [vmem:[%s5134_s3 + $0x498] sm:$0xff]  ;;  %v1094_v40 = vld [vmem:[%s5134_s3 + $0x488] sm:$0xff] }
  0xd3   :  { %3119 = vmatpush3.msra.mxu0 %v1091_v9  ;;  %3154 = vmatpush3.msra.mxu1 %v1123_v23  ;;  %v1128_v32 = vld [vmem:[%s5134_s3 + $0x598] sm:$0xff]  ;;  %v1095_v34 = vld [vmem:[%s5134_s3 + $0x490] sm:$0xff]  ;;  %v1126_v41 = vld [vmem:[%s5134_s3 + $0x588] sm:$0xff] }
  0xd4   :  { %3120 = vmatprep.subr.mxu0 %v1106_v44  ;;  %3155 = vmatprep.subr.mxu1 %v1138_v45  ;;  %v1080_v3 = vld [vmem:[%s5134_s3 + $0x418] sm:$0xff]  ;;  %v1127_v35 = vld [vmem:[%s5134_s3 + $0x590] sm:$0xff]  ;;  %v1078_v20 = vld [vmem:[%s5134_s3 + $0x408] sm:$0xff] }
  0xd5   :  { %3121 = vmatpush3.msra.mxu0 %v1090_v15  ;;  %3156 = vmatpush3.msra.mxu1 %v1122_v46  ;;  %v1112_v33 = vld [vmem:[%s5134_s3 + $0x518] sm:$0xff]  ;;  %v1079_v37 = vld [vmem:[%s5134_s3 + $0x410] sm:$0xff]  ;;  %v1110_v43 = vld [vmem:[%s5134_s3 + $0x508] sm:$0xff] }
  0xd6   :  { %3122 = vmatprep.subr.mxu0 %v1105_v48  ;;  %3157 = vmatprep.subr.mxu1 %v1137_v49  ;;  %v1111_v38 = vld [vmem:[%s5134_s3 + $0x510] sm:$0xff]  ;;  %v1093_v9 = vld [vmem:[%s5134_s3 + $0x480] sm:$0xff]  ;;  %v1172_v15 = vld [vmem:[%s5134_s3 + $0x6f8] sm:$0xff] }
  0xd7   :  { %3123 = vmatpush3.msra.mxu0 %v1089_v50  ;;  %3158 = vmatpush3.msra.mxu1 %v1121_v52  ;;  %v1125_v23 = vld [vmem:[%s5134_s3 + $0x580] sm:$0xff]  ;;  %v1204_v46 = vld [vmem:[%s5134_s3 + $0x7f8] sm:$0xff]  ;;  %v1203_v50 = vld [vmem:[%s5134_s3 + $0x7f0] sm:$0xff] }
  0xd8   :  { %3124 = vmatprep.subr.mxu0 %v1104_v54  ;;  %3159 = vmatprep.subr.mxu1 %v1136_v55  ;;  %v1077_v44 = vld [vmem:[%s5134_s3 + $0x400] sm:$0xff]  ;;  %v1156_v48 = vld [vmem:[%s5134_s3 + $0x678] sm:$0xff]  ;;  %v1170_v52 = vld [vmem:[%s5134_s3 + $0x6e8] sm:$0xff] }
  0xd9   :  { %3125 = vmatpush3.msra.mxu0 %v1088_v56  ;;  %3160 = vmatpush3.msra.mxu1 %v1120_v57  ;;  %v1109_v45 = vld [vmem:[%s5134_s3 + $0x500] sm:$0xff]  ;;  %v1188_v49 = vld [vmem:[%s5134_s3 + $0x778] sm:$0xff]  ;;  %v1202_v54 = vld [vmem:[%s5134_s3 + $0x7e8] sm:$0xff] }
  0xda   :  { %3126 = vmatprep.subr.mxu0 %v1103_v59  ;;  %3161 = vmatprep.subr.mxu1 %v1135_v60  ;;  %v1186_v55 = vld [vmem:[%s5134_s3 + $0x768] sm:$0xff]  ;;  %v1169_v56 = vld [vmem:[%s5134_s3 + $0x6e0] sm:$0xff] }
  0xdb   :  { %3127 = vmatpush3.msra.mxu0 %v1087_v63  ;;  %3162 = vmatpush3.msra.mxu1 %v1119_v0  ;;  %v1201_v57 = vld [vmem:[%s5134_s3 + $0x7e0] sm:$0xff]  ;;  %v1168_v63 = vld [vmem:[%s5134_s3 + $0x6d8] sm:$0xff] }
  0xdc   :  { %3128 = vmatprep.subr.mxu0 %v1102_v1  ;;  %3163 = vmatprep.subr.mxu1 %v1134_v2  ;;  %v1153_v59 = vld [vmem:[%s5134_s3 + $0x660] sm:$0xff]  ;;  %v1200_v0 = vld [vmem:[%s5134_s3 + $0x7d8] sm:$0xff] }
  0xdd   :  { %3129 = vmatpush3.msra.mxu0 %v1086_v4  ;;  %3164 = vmatpush3.msra.mxu1 %v1118_v5  ;;  %v1185_v60 = vld [vmem:[%s5134_s3 + $0x760] sm:$0xff]  ;;  %v1152_v1 = vld [vmem:[%s5134_s3 + $0x658] sm:$0xff]  ;;  %v1167_v4 = vld [vmem:[%s5134_s3 + $0x6d0] sm:$0xff] }
  0xde   :  { %3130 = vmatprep.subr.mxu0 %v1101_v6  ;;  %3165 = vmatprep.subr.mxu1 %v1133_v7  ;;  %v1184_v2 = vld [vmem:[%s5134_s3 + $0x758] sm:$0xff]  ;;  %v1199_v5 = vld [vmem:[%s5134_s3 + $0x7d0] sm:$0xff] }
  0xdf   :  { %3131 = vmatpush3.msra.mxu0 %v1085_v10  ;;  %3166 = vmatpush3.msra.mxu1 %v1117_v12  ;;  %v1151_v6 = vld [vmem:[%s5134_s3 + $0x650] sm:$0xff]  ;;  %v1166_v10 = vld [vmem:[%s5134_s3 + $0x6c8] sm:$0xff] }
  0xe0   :  { %3132 = vmatprep.subr.mxu0 %v1100_v13  ;;  %3167 = vmatprep.subr.mxu1 %v1132_v14  ;;  %v1183_v7 = vld [vmem:[%s5134_s3 + $0x750] sm:$0xff]  ;;  %v1198_v12 = vld [vmem:[%s5134_s3 + $0x7c8] sm:$0xff] }
  0xe1   :  { %3133 = vmatpush3.msra.mxu0 %v1084_v16  ;;  %3168 = vmatpush3.msra.mxu1 %v1116_v17  ;;  %v1150_v13 = vld [vmem:[%s5134_s3 + $0x648] sm:$0xff]  ;;  %v1165_v16 = vld [vmem:[%s5134_s3 + $0x6c0] sm:$0xff] }
  0xe2   :  { %3134 = vmatprep.subr.mxu0 %v1099_v18  ;;  %3169 = vmatprep.subr.mxu1 %v1131_v19  ;;  %v1182_v14 = vld [vmem:[%s5134_s3 + $0x748] sm:$0xff]  ;;  %v1197_v17 = vld [vmem:[%s5134_s3 + $0x7c0] sm:$0xff] }
  0xe3   :  { %3135 = vmatpush3.msra.mxu0 %v1083_v21  ;;  %3170 = vmatpush3.msra.mxu1 %v1115_v22  ;;  %v1149_v18 = vld [vmem:[%s5134_s3 + $0x640] sm:$0xff]  ;;  %v1164_v21 = vld [vmem:[%s5134_s3 + $0x6b8] sm:$0xff] }
  0xe4   :  { %3136 = vmatprep.subr.mxu0 %v1098_v24  ;;  %3171 = vmatprep.subr.mxu1 %v1130_v25  ;;  %v1181_v19 = vld [vmem:[%s5134_s3 + $0x740] sm:$0xff]  ;;  %v1196_v22 = vld [vmem:[%s5134_s3 + $0x7b8] sm:$0xff] }
  0xe5   :  { %3137 = vmatpush3.msra.mxu0 %v1082_v27  ;;  %3172 = vmatpush3.msra.mxu1 %v1114_v28  ;;  %v1148_v24 = vld [vmem:[%s5134_s3 + $0x638] sm:$0xff]  ;;  %v1163_v27 = vld [vmem:[%s5134_s3 + $0x6b0] sm:$0xff] }
  0xe6   :  { %3138 = vmatprep.subr.mxu0 %v1097_v8  ;;  %3173 = vmatprep.subr.mxu1 %v1129_v29  ;;  %v1180_v25 = vld [vmem:[%s5134_s3 + $0x738] sm:$0xff]  ;;  %v1195_v28 = vld [vmem:[%s5134_s3 + $0x7b0] sm:$0xff] }
  0xe7   :  { %3139 = vmatpush3.msra.mxu0 %v1081_v62  ;;  %3174 = vmatpush3.msra.mxu1 %v1113_v11  ;;  %v1147_v8 = vld [vmem:[%s5134_s3 + $0x630] sm:$0xff]  ;;  %v1162_v62 = vld [vmem:[%s5134_s3 + $0x6a8] sm:$0xff] }
  0xe8   :  { %3140 = vmatprep.subr.mxu0 %v1096_v30  ;;  %3175 = vmatprep.subr.mxu1 %v1128_v32  ;;  %v1179_v29 = vld [vmem:[%s5134_s3 + $0x730] sm:$0xff]  ;;  %v1194_v11 = vld [vmem:[%s5134_s3 + $0x7a8] sm:$0xff] }
  0xe9   :  { %3141 = vmatpush3.msra.mxu0 %v1080_v3  ;;  %3176 = vmatpush3.msra.mxu1 %v1112_v33  ;;  %v1146_v30 = vld [vmem:[%s5134_s3 + $0x628] sm:$0xff]  ;;  %v1161_v3 = vld [vmem:[%s5134_s3 + $0x6a0] sm:$0xff] }
  0xea   :  { %3142 = vmatprep.subr.mxu0 %v1095_v34  ;;  %3177 = vmatprep.subr.mxu1 %v1127_v35  ;;  %v1178_v32 = vld [vmem:[%s5134_s3 + $0x728] sm:$0xff]  ;;  %v1193_v33 = vld [vmem:[%s5134_s3 + $0x7a0] sm:$0xff] }
  0xeb   :  { %3143 = vmatpush3.msra.mxu0 %v1079_v37  ;;  %3178 = vmatpush3.msra.mxu1 %v1111_v38  ;;  %v1145_v34 = vld [vmem:[%s5134_s3 + $0x620] sm:$0xff]  ;;  %v1160_v37 = vld [vmem:[%s5134_s3 + $0x698] sm:$0xff] }
  0xec   :  { %3144 = vmatprep.subr.mxu0 %v1094_v40  ;;  %3179 = vmatprep.subr.mxu1 %v1126_v41  ;;  %v1177_v35 = vld [vmem:[%s5134_s3 + $0x720] sm:$0xff]  ;;  %v1192_v38 = vld [vmem:[%s5134_s3 + $0x798] sm:$0xff] }
  0xed   :  { %3145 = vmatpush3.msra.mxu0 %v1078_v20  ;;  %3180 = vmatpush3.msra.mxu1 %v1110_v43  ;;  %v1144_v40 = vld [vmem:[%s5134_s3 + $0x618] sm:$0xff]  ;;  %v1159_v20 = vld [vmem:[%s5134_s3 + $0x690] sm:$0xff] }
  0xee   :  { %3146 = vmatprep.subr.mxu0 %v1093_v9  ;;  %3181 = vmatprep.subr.mxu1 %v1125_v23  ;;  %v1176_v41 = vld [vmem:[%s5134_s3 + $0x718] sm:$0xff]  ;;  %v1191_v43 = vld [vmem:[%s5134_s3 + $0x790] sm:$0xff] }
  0xef   :  { %3147 = vmatpush3.msra.mxu0 %v1077_v44  ;;  %1556 = vmatprep.mubr.f32.mxu0 %v4001_v36  ;;  %v1171_v36 = vld [vmem:[%s5134_s3 + $0x6f0] sm:$0xff]  ;;  %v1158_v44 = vld [vmem:[%s5134_s3 + $0x688] sm:$0xff] }
  0xf0   :  { %3182 = vmatpush3.msra.mxu1 %v1109_v45  ;;  %1557 = vmatmul.mubr.f32.vlgmr.msra.gmra.mxu0 %v3970_v26  ;;  %v1155_v26 = vld [vmem:[%s5134_s3 + $0x670] sm:$0xff]  ;;  %v1190_v45 = vld [vmem:[%s5134_s3 + $0x788] sm:$0xff] }
  0xf1   :  { %1626 = vmatprep.mubr.f32.mxu1 %v4011_v39  ;;  %3186 = vmatprep.subr.mxu0 %v1172_v15  ;;  %v1187_v39 = vld [vmem:[%s5134_s3 + $0x770] sm:$0xff]  ;;  %v1142_v15 = vld [vmem:[%s5134_s3 + $0x608] sm:$0xff] }
  0xf2   :  { %3221 = vmatprep.subr.mxu1 %v1204_v46  ;;  %1627 = vmatmul.mubr.f32.vlgmr.msra.gmra.mxu1 %v3985_v31  ;;  %v1154_v31 = vld [vmem:[%s5134_s3 + $0x668] sm:$0xff]  ;;  %v1143_v9 = vld [vmem:[%s5134_s3 + $0x610] sm:$0xff] }
  0xf3   :  { %3187 = vmatpush3.msra.mxu0 %v1156_v48  ;;  %3222 = vmatpush3.msra.mxu1 %v1188_v49  ;;  %v1175_v23 = vld [vmem:[%s5134_s3 + $0x710] sm:$0xff]  ;;  %v1174_v46 = vld [vmem:[%s5134_s3 + $0x708] sm:$0xff]  ;;  %v1157_v48 = vld [vmem:[%s5134_s3 + $0x680] sm:$0xff] }
  0xf4   :  { %3188 = vmatprep.subr.mxu0 %v1171_v36  ;;  %3223 = vmatprep.subr.mxu1 %v1203_v50  ;;  %v1189_v49 = vld [vmem:[%s5134_s3 + $0x780] sm:$0xff] }
  0xf5   :  { %3189 = vmatpush3.msra.mxu0 %v1155_v26  ;;  %3224 = vmatpush3.msra.mxu1 %v1187_v39  ;;  %v1141_v36 = vld [vmem:[%s5134_s3 + $0x600] sm:$0xff]  ;;  %v2728_v26 = vpop.f32.mrf.mxu0  ;;  %v2763_v39 = vpop.f32.mrf.mxu1 }
  0xf6   :  { %3190 = vmatprep.subr.mxu0 %v1170_v52  ;;  %3225 = vmatprep.subr.mxu1 %v1202_v54  ;;  %v1173_v50 = vld [vmem:[%s5134_s3 + $0x700] sm:$0xff] }
  0xf7   :  { %3191 = vmatpush3.msra.mxu0 %v1154_v31  ;;  %3226 = vmatpush3.msra.mxu1 %v1186_v55  ;;  %v2729_v52 = vpop.f32.mrf.mxu0  ;;  %v2670_v55 = vld [vmem:[%s5133_s2] ss:$0 sm:$0xff] }
  0xf8   :  { %3192 = vmatprep.subr.mxu0 %v1169_v56  ;;  %3227 = vmatprep.subr.mxu1 %v1201_v57  ;;  %v2730_v31 = vadd.f32 %v2729_v52, %v2728_v26  ;;  %v2764_v56 = vpop.f32.mrf.mxu1 }
  0xf9   :  { %3193 = vmatpush3.msra.mxu0 %v1153_v59  ;;  %3228 = vmatpush3.msra.mxu1 %v1185_v60  ;;  %v2765_v60 = vadd.f32 %v2764_v56, %v2763_v39 }
  0xfa   :  { %3194 = vmatprep.subr.mxu0 %v1168_v63  ;;  %3229 = vmatprep.subr.mxu1 %v1200_v0 }
  0xfb   :  { %3195 = vmatpush3.msra.mxu0 %v1152_v1  ;;  %3230 = vmatpush3.msra.mxu1 %v1184_v2 }
  0xfc   :  { %3196 = vmatprep.subr.mxu0 %v1167_v4  ;;  %3231 = vmatprep.subr.mxu1 %v1199_v5 }
  0xfd   :  { %3197 = vmatpush3.msra.mxu0 %v1151_v6  ;;  %3232 = vmatpush3.msra.mxu1 %v1183_v7 }
  0xfe   :  { %3198 = vmatprep.subr.mxu0 %v1166_v10  ;;  %3233 = vmatprep.subr.mxu1 %v1198_v12 }
  0xff   :  { %3199 = vmatpush3.msra.mxu0 %v1150_v13  ;;  %3234 = vmatpush3.msra.mxu1 %v1182_v14 }
 0x100   :  { %3200 = vmatprep.subr.mxu0 %v1165_v16  ;;  %3235 = vmatprep.subr.mxu1 %v1197_v17 }
 0x101   :  { %3201 = vmatpush3.msra.mxu0 %v1149_v18  ;;  %3236 = vmatpush3.msra.mxu1 %v1181_v19 }
 0x102   :  { %3202 = vmatprep.subr.mxu0 %v1164_v21  ;;  %3237 = vmatprep.subr.mxu1 %v1196_v22 }
 0x103   :  { %3203 = vmatpush3.msra.mxu0 %v1148_v24  ;;  %3238 = vmatpush3.msra.mxu1 %v1180_v25  ;;  %v1778_v25 = vld [vmem:[%s5137_s6] sm:$0xff] }
 0x104   :  { %3204 = vmatprep.subr.mxu0 %v1163_v27  ;;  %3239 = vmatprep.subr.mxu1 %v1195_v28  ;;  %v1870_v27 = vcombine.high %v1778_v25, %v1778_v25  ;;  %v1877_v28 = vrot.slane %v1778_v25, %v3514_v51 }
 0x105   :  { %3205 = vmatpush3.msra.mxu0 %v1147_v8  ;;  %3240 = vmatpush3.msra.mxu1 %v1179_v29  ;;  %v1779_v29 = vld [vmem:[%s5137_s6 + $0x8] sm:$0xff] }
 0x106   :  { %3206 = vmatprep.subr.mxu0 %v1162_v62  ;;  %3241 = vmatprep.subr.mxu1 %v1194_v11  ;;  %v2798_v54 = vpop.f32.mrf.mxu0  ;;  %v1884_v8 = vrot.slane %v1870_v27, %v3514_v51  ;;  %v1885_v62 = vcombine.high %v1877_v28, %v1877_v28 }
 0x107   :  { %3207 = vmatpush3.msra.mxu0 %v1146_v30  ;;  %3242 = vmatpush3.msra.mxu1 %v1178_v32  ;;  %v1887_v30 = vcombine.high %v1779_v29, %v1779_v29  ;;  %v5032_v32 = vrot.slane %v1779_v29, %v3514_v51 }
 0x108   :  { %3208 = vmatprep.subr.mxu0 %v1161_v3  ;;  %3243 = vmatprep.subr.mxu1 %v1193_v33  ;;  %v2833_v57 = vpop.f32.mrf.mxu1  ;;  %v2799_v59 = vpop.f32.mrf.mxu0  ;;  %v1886_v11 = vcombine.high %v1884_v8, %v1884_v8  ;;  %v3315_v33 = vmov 0.0  }
 0x109   :  { %3209 = vmatpush3.msra.mxu0 %v1145_v34  ;;  %3244 = vmatpush3.msra.mxu1 %v1177_v35  ;;  %v5035_v3 = vrot.slane %v1887_v30, %v3514_v51  ;;  %v1902_v34 = vcombine.high %v5032_v32, %v5032_v32 }
 0x10a   :  { %3210 = vmatprep.subr.mxu0 %v1160_v37  ;;  %3245 = vmatprep.subr.mxu1 %v1192_v38  ;;  %v2834_v0 = vpop.f32.mrf.mxu1 }
 0x10b   :  { %3211 = vmatpush3.msra.mxu0 %v1144_v40  ;;  %3246 = vmatpush3.msra.mxu1 %v1176_v41  ;;  %v2835_v4 = vadd.f32 %v2834_v0, %v2833_v57  ;;  %v1903_v35 = vcombine.high %v5035_v3, %v5035_v3 }
 0x10c   :  { %3212 = vmatprep.subr.mxu0 %v1159_v20  ;;  %3247 = vmatprep.subr.mxu1 %v1191_v43  ;;  %v2671_v43 = vld [vmem:[%s5135_s4] ss:$0 sm:$0xff] }
 0x10d   :  { %3213 = vmatpush3.msra.mxu0 %v1143_v9  ;;  %3248 = vmatpush3.msra.mxu1 %v1175_v23 }
 0x10e   :  { %3214 = vmatprep.subr.mxu0 %v1158_v44  ;;  %3249 = vmatprep.subr.mxu1 %v1190_v45 }
 0x10f   :  { %3215 = vmatpush3.msra.mxu0 %v1142_v15  ;;  %3250 = vmatpush3.msra.mxu1 %v1174_v46 }
 0x110   :  { %3216 = vmatprep.subr.mxu0 %v1157_v48  ;;  %3251 = vmatprep.subr.mxu1 %v1189_v49 }
 0x111   :  { %3217 = vmatpush3.msra.mxu0 %v1141_v36  ;;  %1696 = vmatprep.mubr.f32.mxu0 %v4214_v58  ;;  %v456_v58 = vadd.f32 %v2730_v31, %v2670_v55 }
 0x112   :  { %3252 = vmatpush3.msra.mxu1 %v1173_v50  ;;  %1766 = vmatprep.mubr.f32.mxu1 %v4224_v61  ;;  %v2800_v61 = vadd.f32 %v2799_v59, %v2798_v54 }
 0x113   :  { %1697 = vmatmul.mubr.f32.vlgmr.msra.gmra.mxu0 %v4183_v47  ;;  %1767 = vmatmul.mubr.f32.vlgmr.msra.gmra.mxu1 %v4198_v53  ;;  %v526_v47 = vadd.f32 %v2765_v60, %v456_v58 }
 0x114   :  { %2672 = vmatprep.subr.msk.mxu0 %vm1942_vm1, %v1885_v62  ;;  %2675 = vmatprep.subr.msk.mxu1 %vm1942_vm1, %v1886_v11 }
 0x115   :  { %v596_v2 = vadd.f32 %v2800_v61, %v526_v47  ;;  %2673 = vmatpush1.msk.msra.mxu0 %vm1942_vm1, %v1877_v28  ;;  %2676 = vmatpush1.msk.msra.mxu1 %vm1942_vm1, %v1884_v8 }
 0x116   :  { %2039 = vmatprep.mubr.f32.mxu0 %v3315_v33  ;;  %2110 = vmatprep.mubr.f32.mxu1 %v3315_v33 }
 0x117   :  { %v666_v7 = vadd.f32 %v2835_v4, %v596_v2  ;;  %2678 = vmatprep.subr.msk.mxu0 %vm1942_vm1, %v1902_v34  ;;  %2681 = vmatprep.subr.msk.mxu1 %vm1942_vm1, %v1903_v35 }
 0x128   :  { %v2868_v63 = vpop.f32.mrf.mxu0 }
 0x12a   :  { %v2903_v1 = vpop.f32.mrf.mxu1  ;;  %v2869_v53 = vpop.f32.mrf.mxu0 }
 0x12b   :  { %v2870_v5 = vadd.f32 %v2869_v53, %v2868_v63 }
 0x12c   :  { %v2904_v6 = vpop.f32.mrf.mxu1 }
 0x12d   :  { %v736_v10 = vadd.f32 %v2870_v5, %v666_v7  ;;  %v2905_v12 = vadd.f32 %v2904_v6, %v2903_v1  ;;  %v1780_v5 = vld [vmem:[%s5137_s6 + $0x10] sm:$0xff]  ;;  %v1781_v7 = vld [vmem:[%s5137_s6 + $0x18] sm:$0xff] }
 0x12e   :  { %v1904_v6 = vcombine.high %v1780_v5, %v1780_v5 }
 0x12f   :  { %v806_v17 = vadd.f32 %v2905_v12, %v736_v10  ;;  %v1772_v10 = vld [vmem:[%s5136_s5] sm:$0x3]  ;;  %s3316_s5 = smov [#allocation2]  }
 0x130   :  { %s2644_s6 = sshll.u32 %s3316_s5, 4  ;;  %s2645_s6 = int_to_ptr.vmem [resolvable:$true] %s2644_s6 }
 0x131   :  { %s3270_s28 = scalar_lea.vmem %s2645_s6, 32  ;;  %p3275_p1 = scmp.lt.s32.totalorder %s2645_s6, %s2645_s6 }
 0x132   :  { %p3271_p0 = scmp.ne.s32.totalorder %s2645_s6, %s3270_s28  ;;  %p3276_p2 = scmp.lt.s32.totalorder %s3270_s28, %s3270_s28 }
 0x134   :  { %p3277_p3 = por %p3276_p2, %p3275_p1 }
 0x136   :  { %p3278_p4 = pnand %p3277_p3, %p3271_p0 }
 0x14a   :  { %v2938_v13 = vpop.f32.mrf.mxu0 }
 0x14c   :  { %v2973_v14 = vpop.f32.mrf.mxu1  ;;  %v2939_v16 = vpop.f32.mrf.mxu0 }
 0x14d   :  { %v2940_v18 = vadd.f32 %v2939_v16, %v2938_v13  ;;  %v1911_v13 = vrot.slane %v1780_v5, %v3514_v51  ;;  %v1921_v16 = vcombine.high %v1781_v7, %v1781_v7 }
 0x14e   :  { %v2974_v19 = vpop.f32.mrf.mxu1 }
 0x14f   :  { %v876_v21 = vadd.f32 %v2940_v18, %v806_v17  ;;  %v2975_v22 = vadd.f32 %v2974_v19, %v2973_v14  ;;  %v1918_v14 = vrot.slane %v1904_v6, %v3514_v51  ;;  %v1919_v19 = vcombine.high %v1911_v13, %v1911_v13 }
 0x150   :  { %v1935_v25 = vrot.slane %v1921_v16, %v3514_v51 }
 0x151   :  { %v5017_v24 = vadd.f32 %v2975_v22, %v876_v21  ;;  %v1920_v21 = vcombine.high %v1918_v14, %v1918_v14  ;;  %v1928_v22 = vrot.slane %v1781_v7, %v3514_v51 }
 0x152   :  { %v1937_v27 = vcombine.high %v1935_v25, %v1935_v25 }
 0x153   :  { %2544 = vst.msk [vmem:[#allocation2] sm:$0x3] %vm2543_vm0, %v5017_v24 }
 0x16c   :  { %v3008_v37 = vpop.f32.mrf.mxu0 }
 0x16e   :  { %v3043_v38 = vpop.f32.mrf.mxu1  ;;  %v3009_v40 = vpop.f32.mrf.mxu0 }
 0x16f   :  { %v3010_v20 = vadd.f32 %v3009_v40, %v3008_v37 }
 0x170   :  { %v3044_v9 = vpop.f32.mrf.mxu1 }
 0x171   :  { %v1279_v45 = vadd.f32 %v3010_v20, %v2671_v43  ;;  %v3045_v15 = vadd.f32 %v3044_v9, %v3043_v38 }
 0x173   :  { %v1349_v36 = vadd.f32 %v3045_v15, %v1279_v45 }
 0x18e   :  { %v3078_v41 = vpop.f32.mrf.mxu0 }
 0x190   :  { %v3113_v23 = vpop.f32.mrf.mxu1  ;;  %v3079_v44 = vpop.f32.mrf.mxu0 }
 0x191   :  { %v3080_v48 = vadd.f32 %v3079_v44, %v3078_v41 }
 0x192   :  { %v3114_v49 = vpop.f32.mrf.mxu1 }
 0x193   :  { %v1419_v39 = vadd.f32 %v3080_v48, %v1349_v36  ;;  %v3115_v52 = vadd.f32 %v3114_v49, %v3113_v23 }
 0x195   :  { %v1489_v55 = vadd.f32 %v3115_v52, %v1419_v39 }
 0x1b0   :  { %v3148_v46 = vpop.f32.mrf.mxu0 }
 0x1b2   :  { %v3183_v50 = vpop.f32.mrf.mxu1  ;;  %v3149_v26 = vpop.f32.mrf.mxu0 }
 0x1b3   :  { %v3150_v54 = vadd.f32 %v3149_v26, %v3148_v46 }
 0x1b4   :  { %v3184_v31 = vpop.f32.mrf.mxu1 }
 0x1b5   :  { %v1559_v56 = vadd.f32 %v3150_v54, %v1489_v55  ;;  %v3185_v57 = vadd.f32 %v3184_v31, %v3183_v50 }
 0x1b7   :  { %v1629_v61 = vadd.f32 %v3185_v57, %v1559_v56 }
 0x1d3   :  { %v3218_v59 = vpop.f32.mrf.mxu0  ;;  %v3253_v58 = vpop.f32.mrf.mxu1 }
 0x1d5   :  { %v3219_v60 = vpop.f32.mrf.mxu0  ;;  %v3254_v63 = vpop.f32.mrf.mxu1 }
 0x1d6   :  { %v3220_v0 = vadd.f32 %v3219_v60, %v3218_v59  ;;  %v3255_v1 = vadd.f32 %v3254_v63, %v3253_v58 }
 0x1d8   :  { %v1699_v47 = vadd.f32 %v3220_v0, %v1629_v61 }
 0x1da   :  { %v1769_v53 = vadd.f32 %v3255_v1, %v1699_v47 }
 0x1dc   :  { %v1773_v2 = vmul.f32 0.5, %v1769_v53  ;;  %2545 = vst.msk [vmem:[#allocation4] sm:$0x3] %vm2543_vm0, %v1769_v53 }
 0x1de   :  { %v1774_v4 = vmul.f32 1.442695, %v1773_v2 }
 0x1e0   :  { %3268 = vpow2.f32 %v1774_v4 }
 0x1ed   :  { %v3269_v12 = vpop.eup %3268 }
 0x1ee   :  { %v1776_v17 = vmul.f32 %v3269_v12, %v1772_v10 }
 0x1f0   :  { %v1777_v18 = vadd.f32 %v1776_v17, %v5017_v24  ;;  %v1936_v24 = vcombine.high %v1928_v22, %v1928_v22 }
 0x1f2   :  { %2674 = vmatmul.mubr.msk.f32.vlgmr.msra.gmra.mxu0 %vm1938_vm2, %v1777_v18  ;;  %2677 = vmatmul.mubr.msk.f32.vlgmr.msra.gmra.mxu1 %vm1938_vm2, %v1777_v18 }
 0x1f3   :  { %2679 = vmatpush1.msk.msra.mxu0 %vm1942_vm1, %v5032_v32  ;;  %2682 = vmatpush1.msk.msra.mxu1 %vm1942_vm1, %v5035_v3 }
 0x1f4   :  { %2181 = vmatprep.mubr.f32.mxu0 %v3315_v33  ;;  %2252 = vmatprep.mubr.f32.mxu1 %v3315_v33 }
 0x1f5   :  { %2684 = vmatprep.subr.msk.mxu0 %vm1942_vm1, %v1919_v19  ;;  %2687 = vmatprep.subr.msk.mxu1 %vm1942_vm1, %v1920_v21 }
 0x1f6   :  { %2680 = vmatmul.mubr.msk.f32.vlgmr.msra.gmra.mxu0 %vm1938_vm2, %v1777_v18  ;;  %2683 = vmatmul.mubr.msk.f32.vlgmr.msra.gmra.mxu1 %vm1938_vm2, %v1777_v18 }
 0x1f7   :  { %2685 = vmatpush1.msk.msra.mxu0 %vm1942_vm1, %v1911_v13  ;;  %2688 = vmatpush1.msk.msra.mxu1 %vm1942_vm1, %v1918_v14 }
 0x1f8   :  { %2323 = vmatprep.mubr.f32.mxu0 %v3315_v33  ;;  %2394 = vmatprep.mubr.f32.mxu1 %v3315_v33 }
 0x1f9   :  { %2690 = vmatprep.subr.msk.mxu0 %vm1942_vm1, %v1936_v24  ;;  %2693 = vmatprep.subr.msk.mxu1 %vm1942_vm1, %v1937_v27 }
 0x1fa   :  { %2686 = vmatmul.mubr.msk.f32.vlgmr.msra.gmra.mxu0 %vm1938_vm2, %v1777_v18  ;;  %2689 = vmatmul.mubr.msk.f32.vlgmr.msra.gmra.mxu1 %vm1938_vm2, %v1777_v18 }
 0x1fb   :  { %2691 = vmatpush1.msk.msra.mxu0 %vm1942_vm1, %v1928_v22  ;;  %2694 = vmatpush1.msk.msra.mxu1 %vm1942_vm1, %v1935_v25 }
 0x1fc   :  { %2465 = vmatprep.mubr.f32.mxu0 %v3315_v33  ;;  %2536 = vmatprep.mubr.f32.mxu1 %v3315_v33 }
 0x1fe   :  { %2692 = vmatmul.mubr.msk.f32.vlgmr.msra.gmra.mxu0 %vm1938_vm2, %v1777_v18  ;;  %2695 = vmatmul.mubr.msk.f32.vlgmr.msra.gmra.mxu1 %vm1938_vm2, %v1777_v18 }
 0x1ff   :  { %3281 = shalt.err (!%p3278_p4)
}
 0x200   :  { %2647 = dma.vmem_to_hbm [thread:$0]  %s2645_s6, 32, %s5139_s8, [#allocation3]  }
 0x201   :  { %s3290_s11 = scalar_lea.vmem %s2655_s27, 32  ;;  %p3295_p6 = scmp.lt.s32.totalorder %s2655_s27, %s2655_s27 }
 0x202   :  { %p3291_p5 = scmp.ne.s32.totalorder %s2655_s27, %s3290_s11  ;;  %p3296_p7 = scmp.lt.s32.totalorder %s3290_s11, %s3290_s11 }
 0x204   :  { %p3297_p8 = por %p3296_p7, %p3295_p6 }
 0x206   :  { %p3298_p9 = pnand %p3297_p8, %p3291_p5 }
 0x208   :  { %3301 = shalt.err (!%p3298_p9)
}
 0x209   :  { %2657 = dma.vmem_to_hbm [thread:$0]  %s2655_s27, 32, %s5140_s9, [#allocation5]   ;;  %v1788_v28 = vsub.s32 0, %v3487_v42  ;;  %v1796_v8 = vsub.s32 2, %v3487_v42  ;;  %v1792_v29 = vsub.s32 1, %v3487_v42  ;;  %v1800_v62 = vsub.s32 3, %v3487_v42 }
 0x20a   :  { %v1782_v11 = vld [vmem:[%s5138_s7] sm:$0xff]  ;;  %v1804_v30 = vsub.s32 4, %v3487_v42  ;;  %v1812_v32 = vsub.s32 6, %v3487_v42  ;;  %v1808_v3 = vsub.s32 5, %v3487_v42  ;;  %v1816_v33 = vsub.s32 7, %v3487_v42  ;;  %v1783_v15 = vld [vmem:[%s5138_s7 + $0x8] sm:$0xff] }
 0x20b   :  { %v1789_v34 = vrot.slane %v1782_v11, %v1788_v28  ;;  %v1797_v35 = vrot.slane %v1782_v11, %v1796_v8  ;;  %v1793_v37 = vrot.slane %v1782_v11, %v1792_v29  ;;  %v1801_v38 = vrot.slane %v1782_v11, %v1800_v62 }
 0x20c   :  { %v1805_v9 = vrot.slane %v1782_v11, %v1804_v30  ;;  %v1813_v23 = vrot.slane %v1782_v11, %v1812_v32  ;;  %v1809_v44 = vrot.slane %v1782_v11, %v1808_v3  ;;  %v1817_v45 = vrot.slane %v1782_v11, %v1816_v33 }
 0x20d   :  { %v1821_v52 = vrot.slane %v1783_v15, %v1788_v28  ;;  %v1829_v54 = vrot.slane %v1783_v15, %v1796_v8  ;;  %v1825_v59 = vrot.slane %v1783_v15, %v1792_v29  ;;  %v1833_v58 = vrot.slane %v1783_v15, %v1800_v62 }
 0x20e   :  { %v1837_v53 = vrot.slane %v1783_v15, %v1804_v30  ;;  %v1845_v6 = vrot.slane %v1783_v15, %v1812_v32  ;;  %v1841_v14 = vrot.slane %v1783_v15, %v1808_v3  ;;  %v1849_v16 = vrot.slane %v1783_v15, %v1816_v33 }
 0x2b2   :  { %v2041_v40 = vpop.f32.mrf.mxu0  ;;  %v2112_v41 = vpop.f32.mrf.mxu1 }
 0x2b3   :  { %v2042_v46 = vadd.f32 %v2041_v40, %v1789_v34  ;;  %v2113_v48 = vadd.f32 %v2112_v41, %v1797_v35 }
 0x2b4   :  { %v2043_v20 = vpop.f32.mrf.mxu0  ;;  %v2114_v43 = vpop.f32.mrf.mxu1 }
 0x2b5   :  { %v2044_v49 = vadd.f32 %v2043_v20, %v1793_v37  ;;  %v2115_v42 = vadd.f32 %v2114_v43, %v1801_v38 }
 0x2b6   :  { %v2183_v36 = vpop.f32.mrf.mxu0  ;;  %v2254_v50 = vpop.f32.mrf.mxu1 }
 0x2b7   :  { %v2562_v26 = vcombine.low %v2042_v46, %v2044_v49  ;;  %v2563_v39 = vcombine.low %v2113_v48, %v2115_v42  ;;  %v2184_v31 = vadd.f32 %v2183_v36, %v1805_v9  ;;  %v2255_v55 = vadd.f32 %v2254_v50, %v1813_v23 }
 0x2b8   :  { %v2185_v56 = vpop.f32.mrf.mxu0  ;;  %v2256_v57 = vpop.f32.mrf.mxu1 }
 0x2b9   :  { %v2570_v60 = vrot.slane %v2562_v26, %v3514_v51  ;;  %v2577_v63 = vrot.slane %v2563_v39, %v3514_v51  ;;  %v2186_v61 = vadd.f32 %v2185_v56, %v1809_v44  ;;  %v2257_v0 = vadd.f32 %v2256_v57, %v1817_v45 }
 0x2ba   :  { %v2325_v47 = vpop.f32.mrf.mxu0  ;;  %v2396_v1 = vpop.f32.mrf.mxu1 }
 0x2bb   :  { %v2578_v2 = vcombine.low %v2570_v60, %v2577_v63  ;;  %v2579_v4 = vcombine.low %v2184_v31, %v2186_v61  ;;  %v2580_v5 = vcombine.low %v2255_v55, %v2257_v0  ;;  %v2326_v7 = vadd.f32 %v2325_v47, %v1821_v52 }
 0x2bc   :  { %v2397_v10 = vadd.f32 %v2396_v1, %v1829_v54  ;;  %v2327_v12 = vpop.f32.mrf.mxu0  ;;  %v2398_v13 = vpop.f32.mrf.mxu1 }
 0x2bd   :  { %2634 = vst [vmem:[%s5141_s10] sm:$0xff] %v2578_v2  ;;  %v2587_v17 = vrot.slane %v2579_v4, %v3514_v51  ;;  %v2594_v18 = vrot.slane %v2580_v5, %v3514_v51  ;;  %v2328_v19 = vadd.f32 %v2327_v12, %v1825_v59  ;;  %v2399_v21 = vadd.f32 %v2398_v13, %v1833_v58 }
 0x2be   :  { %v2467_v22 = vpop.f32.mrf.mxu0  ;;  %v2538_v25 = vpop.f32.mrf.mxu1 }
 0x2bf   :  { %v2595_v24 = vcombine.low %v2587_v17, %v2594_v18  ;;  %v2596_v27 = vcombine.low %v2326_v7, %v2328_v19  ;;  %v2597_v28 = vcombine.low %v2397_v10, %v2399_v21  ;;  %v2468_v8 = vadd.f32 %v2467_v22, %v1837_v53 }
 0x2c0   :  { %v2539_v29 = vadd.f32 %v2538_v25, %v1845_v6  ;;  %v2469_v62 = vpop.f32.mrf.mxu0  ;;  %v2540_v11 = vpop.f32.mrf.mxu1 }
 0x2c1   :  { %2635 = vst [vmem:[%s5141_s10 + $0x8] sm:$0xff] %v2595_v24  ;;  %v2604_v30 = vrot.slane %v2596_v27, %v3514_v51  ;;  %v2611_v32 = vrot.slane %v2597_v28, %v3514_v51  ;;  %v2470_v3 = vadd.f32 %v2469_v62, %v1841_v14  ;;  %v2541_v33 = vadd.f32 %v2540_v11, %v1849_v16 }
 0x2c3   :  { %v2612_v34 = vcombine.low %v2604_v30, %v2611_v32  ;;  %v2613_v35 = vcombine.low %v2468_v8, %v2470_v3  ;;  %v2614_v37 = vcombine.low %v2539_v29, %v2541_v33 }
 0x2c5   :  { %2636 = vst [vmem:[%s5141_s10 + $0x10] sm:$0xff] %v2612_v34  ;;  %v2621_v38 = vrot.slane %v2613_v35, %v3514_v51  ;;  %v2628_v40 = vrot.slane %v2614_v37, %v3514_v51 }
 0x2c7   :  { %v2629_v41 = vcombine.low %v2621_v38, %v2628_v40 }
 0x2c9   :  { %2637 = vst [vmem:[%s5141_s10 + $0x18] sm:$0xff] %v2629_v41 }
 0x2ca   :  { %3310 = dma.done.wait [#allocation3], 32  }
 0x2cb   :  { %3311 = vsyncadd [#allocation3], 4294967264 }
 0x2cc   :  { %3312 = dma.done.wait [#allocation5], 32  }
 0x2cd   :  { %3313 = vsyncadd [#allocation5], 4294967264 }
 0x2ce   :  { %2668 = vsyncpa [#allocation3], 1 }
 0x2cf   :  { %2669 = vsyncpa [#allocation5], 1 }

// kernel: tile.18
= control target key start
LH: loop header
LB: loop body
LE: loop exit
PB: predicated region body
PF: predicated region fallthrough
CT: control target
= control target key end

     0   :  { %s22_s0 = inlined_call_operand.vmem [shape: f32[64], index: 0, kind: input, shape index: {}]   ;;  %s23_s1 = inlined_call_operand.vmem [shape: f32[4,64], index: 1, kind: output, shape index: {}]  }
   0x1   :  { %v4_v0 = vld [vmem:[%s22_s0] ss:$0 sm:$0xff] }
   0x2   :  { %5 = vst [vmem:[%s23_s1] sm:$0xf] %v4_v0 }

// kernel: tile.19
= control target key start
LH: loop header
LB: loop body
LE: loop exit
PB: predicated region body
PF: predicated region fallthrough
CT: control target
= control target key end

     0   :  { %s7_s8 = smov 3  ;;  %vm9_vm0 = vcmask 523264   ;;  %s34_s9 = smov 64   ;;  %vm16_vm1 = vcmask 1048064   ;;  %s54_s0 = inlined_call_operand.vmem [shape: f32[4,64], index: 0, kind: input, shape index: {}]   ;;  %s55_s1 = inlined_call_operand.vmem [shape: f32[1,256], index: 1, kind: output, shape index: {}]  }
   0x1   :  { %v5_v0 = vld [vmem:[%s54_s0] sm:$0xf]  ;;  %s12_s0 = smov 3 }
   0x2   :  { %6 = vst [vmem:[#allocation1] sm:$0xf] %v5_v0 }
   0x9   :  { %v13_v1 = vld [vmem:[#allocation1 + $0x1] ss:$2 sm:%s12_s0]   ;;  %v8_v2 = vld [vmem:[#allocation1] ss:$2 sm:%s7_s8]  }
   0xa   :  { %14 = vrot.lane.b32.xlu0 %v13_v1, %s34_s9  ;;  %10 = vst.msk [vmem:[#allocation0] ss:$8 sm:$0x3] %vm9_vm0, %v8_v2  }
  0x7c   :  { %v15_v3 = vpop.permute.xlu0 %14  }
  0x7d   :  { %17 = vst.msk [vmem:[#allocation0] ss:$8 sm:$0x3] %vm16_vm1, %v15_v3  }
  0x84   :  { %v22_v4 = vld [vmem:[#allocation0] sm:$0x1]  ;;  %v27_v5 = vld [vmem:[#allocation0 + $0x8] sm:$0x1] }
  0x85   :  { %25 = vst [vmem:[%s55_s1] sm:$0x1] %v22_v4  ;;  %32 = vst [vmem:[%s55_s1 + $0x1] sm:$0x1] %v27_v5 }

// kernel: vae_forward.11
= control target key start
LH: loop header
LB: loop body
LE: loop exit
PB: predicated region body
PF: predicated region fallthrough
CT: control target
= control target key end

     0   :  { %s1043_s1 = inlined_call_operand.vmem [shape: bf16[512,256], index: 1, kind: input, shape index: {}]   ;;  %s1044_s0 = inlined_call_operand.vmem [shape: bf16[32,512], index: 0, kind: input, shape index: {}]   ;;  %s1045_s2 = inlined_call_operand.vmem [shape: f32[1,256], index: 2, kind: input, shape index: {}]   ;;  %s1046_s3 = inlined_call_operand.vmem [shape: bf16[32,256], index: 3, kind: output, shape index: {}]  }
   0x1   :  { %v684_v0 = vld [vmem:[%s1043_s1 + $0x74] ss:$8 sps:$4 sm:$0xff]   ;;  %v688_v2 = vld [vmem:[%s1043_s1 + $0x70] ss:$8 sps:$4 sm:$0xff]   ;;  %v690_v4 = vld [vmem:[%s1043_s1 + $0x64] ss:$8 sps:$4 sm:$0xff]  }
   0x2   :  { %v686_v1 = vld [vmem:[%s1043_s1 + $0x174] ss:$8 sps:$4 sm:$0xff]   ;;  %458 = vmatprep.subr.bf16.mxu0 %v684_v0  ;;  %v689_v3 = vld [vmem:[%s1043_s1 + $0x170] ss:$8 sps:$4 sm:$0xff]   ;;  %v692_v5 = vld [vmem:[%s1043_s1 + $0x164] ss:$8 sps:$4 sm:$0xff]  }
   0x3   :  { %511 = vmatprep.subr.bf16.mxu1 %v686_v1  ;;  %459 = vmatpush1.bf16.msra.mxu0 %v688_v2  ;;  %v694_v6 = vld [vmem:[%s1043_s1 + $0x60] ss:$8 sps:$4 sm:$0xff]   ;;  %v696_v8 = vld [vmem:[%s1043_s1 + $0x54] ss:$8 sps:$4 sm:$0xff]   ;;  %v700_v10 = vld [vmem:[%s1043_s1 + $0x50] ss:$8 sps:$4 sm:$0xff]  }
   0x4   :  { %512 = vmatpush1.bf16.msra.mxu1 %v689_v3  ;;  %460 = vmatprep.subr.bf16.mxu0 %v690_v4  ;;  %v695_v7 = vld [vmem:[%s1043_s1 + $0x160] ss:$8 sps:$4 sm:$0xff]   ;;  %v698_v9 = vld [vmem:[%s1043_s1 + $0x154] ss:$8 sps:$4 sm:$0xff]   ;;  %v701_v11 = vld [vmem:[%s1043_s1 + $0x150] ss:$8 sps:$4 sm:$0xff]  }
   0x5   :  { %513 = vmatprep.subr.bf16.mxu1 %v692_v5  ;;  %v702_v12 = vld [vmem:[%s1043_s1 + $0x44] ss:$8 sps:$4 sm:$0xff]   ;;  %v706_v14 = vld [vmem:[%s1043_s1 + $0x40] ss:$8 sps:$4 sm:$0xff]   ;;  %v708_v16 = vld [vmem:[%s1043_s1 + $0x34] ss:$8 sps:$4 sm:$0xff]  }
   0x6   :  { %v704_v13 = vld [vmem:[%s1043_s1 + $0x144] ss:$8 sps:$4 sm:$0xff]   ;;  %v707_v15 = vld [vmem:[%s1043_s1 + $0x140] ss:$8 sps:$4 sm:$0xff]   ;;  %v710_v17 = vld [vmem:[%s1043_s1 + $0x134] ss:$8 sps:$4 sm:$0xff]  }
   0x7   :  { %461 = vmatpush1.bf16.msra.mxu0 %v694_v6  ;;  %v712_v18 = vld [vmem:[%s1043_s1 + $0x30] ss:$8 sps:$4 sm:$0xff]   ;;  %v714_v20 = vld [vmem:[%s1043_s1 + $0x24] ss:$8 sps:$4 sm:$0xff]   ;;  %v718_v22 = vld [vmem:[%s1043_s1 + $0x20] ss:$8 sps:$4 sm:$0xff]  }
   0x8   :  { %514 = vmatpush1.bf16.msra.mxu1 %v695_v7  ;;  %462 = vmatprep.subr.bf16.mxu0 %v696_v8  ;;  %v713_v19 = vld [vmem:[%s1043_s1 + $0x130] ss:$8 sps:$4 sm:$0xff]   ;;  %v716_v21 = vld [vmem:[%s1043_s1 + $0x124] ss:$8 sps:$4 sm:$0xff]   ;;  %v719_v23 = vld [vmem:[%s1043_s1 + $0x120] ss:$8 sps:$4 sm:$0xff]   ;;  %v88_v8 = vlaneseq }
   0x9   :  { %515 = vmatprep.subr.bf16.mxu1 %v698_v9  ;;  %v720_v24 = vld [vmem:[%s1043_s1 + $0x14] ss:$8 sps:$4 sm:$0xff]   ;;  %v724_v26 = vld [vmem:[%s1043_s1 + $0x10] ss:$8 sps:$4 sm:$0xff]   ;;  %v726_v28 = vld [vmem:[%s1043_s1 + $0x4] ss:$8 sps:$4 sm:$0xff]  }
   0xa   :  { %v722_v25 = vld [vmem:[%s1043_s1 + $0x114] ss:$8 sps:$4 sm:$0xff]   ;;  %v725_v27 = vld [vmem:[%s1043_s1 + $0x110] ss:$8 sps:$4 sm:$0xff]   ;;  %v728_v29 = vld [vmem:[%s1043_s1 + $0x104] ss:$8 sps:$4 sm:$0xff]  }
   0xb   :  { %463 = vmatpush1.bf16.msra.mxu0 %v700_v10  ;;  %v730_v30 = vld [vmem:[%s1043_s1] ss:$8 sps:$4 sm:$0xff]   ;;  %v732_v32 = vld [vmem:[%s1043_s1 + $0xf4] ss:$8 sps:$4 sm:$0xff]   ;;  %v736_v34 = vld [vmem:[%s1043_s1 + $0xf0] ss:$8 sps:$4 sm:$0xff]  }
   0xc   :  { %516 = vmatpush1.bf16.msra.mxu1 %v701_v11  ;;  %464 = vmatprep.subr.bf16.mxu0 %v702_v12  ;;  %v731_v31 = vld [vmem:[%s1043_s1 + $0x100] ss:$8 sps:$4 sm:$0xff]   ;;  %v734_v33 = vld [vmem:[%s1043_s1 + $0x1f4] ss:$8 sps:$4 sm:$0xff]   ;;  %v737_v35 = vld [vmem:[%s1043_s1 + $0x1f0] ss:$8 sps:$4 sm:$0xff]  }
   0xd   :  { %517 = vmatprep.subr.bf16.mxu1 %v704_v13  ;;  %v738_v36 = vld [vmem:[%s1043_s1 + $0xe4] ss:$8 sps:$4 sm:$0xff]   ;;  %v742_v38 = vld [vmem:[%s1043_s1 + $0xe0] ss:$8 sps:$4 sm:$0xff]   ;;  %v744_v40 = vld [vmem:[%s1043_s1 + $0xd4] ss:$8 sps:$4 sm:$0xff]  }
   0xe   :  { %v740_v37 = vld [vmem:[%s1043_s1 + $0x1e4] ss:$8 sps:$4 sm:$0xff]   ;;  %v743_v39 = vld [vmem:[%s1043_s1 + $0x1e0] ss:$8 sps:$4 sm:$0xff]   ;;  %v746_v41 = vld [vmem:[%s1043_s1 + $0x1d4] ss:$8 sps:$4 sm:$0xff]  }
   0xf   :  { %465 = vmatpush1.bf16.msra.mxu0 %v706_v14  ;;  %v748_v42 = vld [vmem:[%s1043_s1 + $0xd0] ss:$8 sps:$4 sm:$0xff]   ;;  %v750_v44 = vld [vmem:[%s1043_s1 + $0xc4] ss:$8 sps:$4 sm:$0xff]   ;;  %v754_v46 = vld [vmem:[%s1043_s1 + $0xc0] ss:$8 sps:$4 sm:$0xff]  }
  0x10   :  { %518 = vmatpush1.bf16.msra.mxu1 %v707_v15  ;;  %466 = vmatprep.subr.bf16.mxu0 %v708_v16  ;;  %v749_v43 = vld [vmem:[%s1043_s1 + $0x1d0] ss:$8 sps:$4 sm:$0xff]   ;;  %v752_v45 = vld [vmem:[%s1043_s1 + $0x1c4] ss:$8 sps:$4 sm:$0xff]   ;;  %v755_v47 = vld [vmem:[%s1043_s1 + $0x1c0] ss:$8 sps:$4 sm:$0xff]  }
  0x11   :  { %519 = vmatprep.subr.bf16.mxu1 %v710_v17  ;;  %v756_v48 = vld [vmem:[%s1043_s1 + $0xb4] ss:$8 sps:$4 sm:$0xff]   ;;  %v760_v52 = vld [vmem:[%s1043_s1 + $0xb0] ss:$8 sps:$4 sm:$0xff]   ;;  %v762_v54 = vld [vmem:[%s1043_s1 + $0xa4] ss:$8 sps:$4 sm:$0xff]  }
  0x12   :  { %v782_v49 = vld [vmem:[%s1044_s0 + $0x4] ss:$16 sps:$4 sm:$0xff]   ;;  %v785_v51 = vld [vmem:[%s1044_s0 + $0xc] ss:$16 sps:$4 sm:$0xff]   ;;  %v761_v53 = vld [vmem:[%s1043_s1 + $0x1b0] ss:$8 sps:$4 sm:$0xff]  }
  0x13   :  { %467 = vmatpush1.bf16.msra.mxu0 %v712_v18  ;;  %v758_v50 = vld [vmem:[%s1043_s1 + $0x1b4] ss:$8 sps:$4 sm:$0xff]   ;;  %490 = vmatprep.mubr.bf16.mxu0 %v782_v49  ;;  %v764_v55 = vld [vmem:[%s1043_s1 + $0x1a4] ss:$8 sps:$4 sm:$0xff]   ;;  %v766_v56 = vld [vmem:[%s1043_s1 + $0xa0] ss:$8 sps:$4 sm:$0xff]  }
  0x14   :  { %520 = vmatpush1.bf16.msra.mxu1 %v713_v19  ;;  %468 = vmatprep.subr.bf16.mxu0 %v714_v20  ;;  %v767_v57 = vld [vmem:[%s1043_s1 + $0x1a0] ss:$8 sps:$4 sm:$0xff]   ;;  %v768_v58 = vld [vmem:[%s1043_s1 + $0x94] ss:$8 sps:$4 sm:$0xff]   ;;  %v772_v60 = vld [vmem:[%s1043_s1 + $0x90] ss:$8 sps:$4 sm:$0xff]  }
  0x15   :  { %521 = vmatprep.subr.bf16.mxu1 %v716_v21  ;;  %543 = vmatprep.mubr.bf16.mxu1 %v785_v51  ;;  %v770_v59 = vld [vmem:[%s1043_s1 + $0x194] ss:$8 sps:$4 sm:$0xff]   ;;  %v773_v61 = vld [vmem:[%s1043_s1 + $0x190] ss:$8 sps:$4 sm:$0xff]   ;;  %v774_v62 = vld [vmem:[%s1043_s1 + $0x84] ss:$8 sps:$4 sm:$0xff]  }
  0x16   :  { %v776_v63 = vld [vmem:[%s1043_s1 + $0x184] ss:$8 sps:$4 sm:$0xff]   ;;  %v778_v0 = vld [vmem:[%s1043_s1 + $0x80] ss:$8 sps:$4 sm:$0xff]   ;;  %v89_v9 = vshrl.u32 %v88_v8, 7 }
  0x17   :  { %469 = vmatpush1.bf16.msra.mxu0 %v718_v22  ;;  %v779_v1 = vld [vmem:[%s1043_s1 + $0x180] ss:$8 sps:$4 sm:$0xff]   ;;  %v786_v4 = vld [vmem:[%s1044_s0 + $0x24] ss:$16 sps:$4 sm:$0xff]   ;;  %v788_v5 = vld [vmem:[%s1044_s0 + $0x2c] ss:$16 sps:$4 sm:$0xff]  }
  0x18   :  { %522 = vmatpush1.bf16.msra.mxu1 %v719_v23  ;;  %470 = vmatprep.subr.bf16.mxu0 %v720_v24  ;;  %v780_v2 = vld [vmem:[%s1044_s0] ss:$16 sps:$4 sm:$0xff]   ;;  %v783_v3 = vld [vmem:[%s1044_s0 + $0x8] ss:$16 sps:$4 sm:$0xff]   ;;  %v90_v10 = vsub.s32 0, %v89_v9  ;;  %v94_v12 = vsub.s32 1, %v89_v9 }
  0x19   :  { %523 = vmatprep.subr.bf16.mxu1 %v722_v25  ;;  %v790_v6 = vld [vmem:[%s1044_s0 + $0x20] ss:$16 sps:$4 sm:$0xff]   ;;  %v791_v7 = vld [vmem:[%s1044_s0 + $0x28] ss:$16 sps:$4 sm:$0xff]  }
  0x1a   :  { %v86_v11 = vld [vmem:[%s1045_s2] sm:$0x3] }
  0x1b   :  { %471 = vmatpush1.bf16.msra.mxu0 %v724_v26  ;;  %v91_v13 = vrot.slane %v86_v11, %v90_v10  ;;  %v95_v14 = vrot.slane %v86_v11, %v94_v12 }
  0x1c   :  { %524 = vmatpush1.bf16.msra.mxu1 %v725_v27  ;;  %472 = vmatprep.subr.bf16.mxu0 %v726_v28 }
  0x1d   :  { %525 = vmatprep.subr.bf16.mxu1 %v728_v29 }
  0x1f   :  { %473 = vmatpush1.bf16.msra.mxu0 %v730_v30 }
  0x20   :  { %526 = vmatpush1.bf16.msra.mxu1 %v731_v31  ;;  %474 = vmatprep.subr.bf16.mxu0 %v732_v32 }
  0x21   :  { %527 = vmatprep.subr.bf16.mxu1 %v734_v33 }
  0x23   :  { %475 = vmatpush2.bf16.msra.mxu0 %v736_v34 }
  0x24   :  { %528 = vmatpush2.bf16.msra.mxu1 %v737_v35  ;;  %476 = vmatprep.subr.bf16.mxu0 %v738_v36 }
  0x25   :  { %529 = vmatprep.subr.bf16.mxu1 %v740_v37 }
  0x27   :  { %477 = vmatpush2.bf16.msra.mxu0 %v742_v38 }
  0x28   :  { %530 = vmatpush2.bf16.msra.mxu1 %v743_v39  ;;  %478 = vmatprep.subr.bf16.mxu0 %v744_v40 }
  0x29   :  { %531 = vmatprep.subr.bf16.mxu1 %v746_v41 }
  0x2b   :  { %479 = vmatpush2.bf16.msra.mxu0 %v748_v42 }
  0x2c   :  { %532 = vmatpush2.bf16.msra.mxu1 %v749_v43  ;;  %480 = vmatprep.subr.bf16.mxu0 %v750_v44 }
  0x2d   :  { %533 = vmatprep.subr.bf16.mxu1 %v752_v45 }
  0x2f   :  { %481 = vmatpush2.bf16.msra.mxu0 %v754_v46 }
  0x30   :  { %534 = vmatpush2.bf16.msra.mxu1 %v755_v47  ;;  %482 = vmatprep.subr.bf16.mxu0 %v756_v48 }
  0x31   :  { %535 = vmatprep.subr.bf16.mxu1 %v758_v50 }
  0x33   :  { %483 = vmatpush2.bf16.msra.mxu0 %v760_v52 }
  0x34   :  { %536 = vmatpush2.bf16.msra.mxu1 %v761_v53  ;;  %484 = vmatprep.subr.bf16.mxu0 %v762_v54 }
  0x35   :  { %537 = vmatprep.subr.bf16.mxu1 %v764_v55 }
  0x37   :  { %485 = vmatpush2.bf16.msra.mxu0 %v766_v56 }
  0x38   :  { %538 = vmatpush2.bf16.msra.mxu1 %v767_v57  ;;  %486 = vmatprep.subr.bf16.mxu0 %v768_v58 }
  0x39   :  { %539 = vmatprep.subr.bf16.mxu1 %v770_v59 }
  0x3b   :  { %487 = vmatpush2.bf16.msra.mxu0 %v772_v60 }
  0x3c   :  { %540 = vmatpush2.bf16.msra.mxu1 %v773_v61  ;;  %488 = vmatprep.subr.bf16.mxu0 %v774_v62 }
  0x3d   :  { %541 = vmatprep.subr.bf16.mxu1 %v776_v63 }
  0x3f   :  { %489 = vmatpush2.bf16.msra.mxu0 %v778_v0 }
  0x40   :  { %542 = vmatpush2.bf16.msra.mxu1 %v779_v1 }
  0x42   :  { %491 = vmatmul.mubr.bf16.vlgmr.msra.gmra.mxu0 %v780_v2 }
  0x43   :  { %544 = vmatmul.mubr.bf16.vlgmr.msra.gmra.mxu1 %v783_v3  ;;  %500 = vmatprep.mubr.bf16.mxu0 %v786_v4 }
  0x44   :  { %553 = vmatprep.mubr.bf16.mxu1 %v788_v5 }
  0x4a   :  { %501 = vmatmul.mubr.bf16.gmra.mxu0 %v790_v6 }
  0x4b   :  { %554 = vmatmul.mubr.bf16.gmra.mxu1 %v791_v7 }
 0x102   :  { %v492_v15 = vpop.f32.mrf.mxu0 }
 0x103   :  { %v545_v16 = vpop.f32.mrf.mxu1  ;;  %v493_v17 = vadd.f32 %v492_v15, %v91_v13 }
 0x104   :  { %v494_v18 = vpop.f32.mrf.mxu0 }
 0x105   :  { %v547_v19 = vpop.f32.mrf.mxu1  ;;  %v546_v20 = vadd.f32 %v545_v16, %v493_v17  ;;  %v495_v21 = vadd.f32 %v494_v18, %v95_v14 }
 0x106   :  { %v496_v22 = vpop.f32.mrf.mxu0 }
 0x107   :  { %v549_v23 = vpop.f32.mrf.mxu1  ;;  %v548_v24 = vadd.f32 %v547_v19, %v495_v21  ;;  %v497_v25 = vadd.f32 %v496_v22, %v91_v13  ;;  %v564_v28 = vmax.f32 %v546_v20, 0.0 }
 0x108   :  { %v498_v26 = vpop.f32.mrf.mxu0 }
 0x109   :  { %v551_v27 = vpop.f32.mrf.mxu1  ;;  %v565_v29 = vmax.f32 %v548_v24, 0.0  ;;  %v550_v30 = vadd.f32 %v549_v23, %v497_v25  ;;  %v499_v31 = vadd.f32 %v498_v26, %v95_v14 }
 0x10a   :  { %v502_v32 = vpop.f32.mrf.mxu0 }
 0x10b   :  { %v555_v33 = vpop.f32.mrf.mxu1  ;;  %v680_v34 = vpack.c.bf16 %v565_v29, %v564_v28  ;;  %v552_v35 = vadd.f32 %v551_v27, %v499_v31  ;;  %v503_v36 = vadd.f32 %v502_v32, %v91_v13  ;;  %v566_v39 = vmax.f32 %v550_v30, 0.0 }
 0x10c   :  { %v504_v37 = vpop.f32.mrf.mxu0 }
 0x10d   :  { %v557_v38 = vpop.f32.mrf.mxu1  ;;  %596 = vst [vmem:[%s1046_s3] sm:$0xff] %v680_v34  ;;  %v567_v40 = vmax.f32 %v552_v35, 0.0  ;;  %v556_v41 = vadd.f32 %v555_v33, %v503_v36  ;;  %v505_v42 = vadd.f32 %v504_v37, %v95_v14 }
 0x10e   :  { %v506_v43 = vpop.f32.mrf.mxu0 }
 0x10f   :  { %v559_v44 = vpop.f32.mrf.mxu1  ;;  %v681_v45 = vpack.c.bf16 %v567_v40, %v566_v39  ;;  %v558_v46 = vadd.f32 %v557_v38, %v505_v42  ;;  %v507_v47 = vadd.f32 %v506_v43, %v91_v13  ;;  %v568_v49 = vmax.f32 %v556_v41, 0.0 }
 0x110   :  { %v508_v48 = vpop.f32.mrf.mxu0 }
 0x111   :  { %597 = vst [vmem:[%s1046_s3 + $0x8] sm:$0xff] %v681_v45  ;;  %v569_v50 = vmax.f32 %v558_v46, 0.0  ;;  %v560_v51 = vadd.f32 %v559_v44, %v507_v47  ;;  %v509_v52 = vadd.f32 %v508_v48, %v95_v14  ;;  %v561_v53 = vpop.f32.mrf.mxu1 }
 0x113   :  { %v682_v54 = vpack.c.bf16 %v569_v50, %v568_v49  ;;  %v562_v55 = vadd.f32 %v561_v53, %v509_v52  ;;  %v570_v56 = vmax.f32 %v560_v51, 0.0 }
 0x115   :  { %598 = vst [vmem:[%s1046_s3 + $0x10] sm:$0xff] %v682_v54  ;;  %v571_v57 = vmax.f32 %v562_v55, 0.0 }
 0x117   :  { %v683_v58 = vpack.c.bf16 %v571_v57, %v570_v56 }
 0x119   :  { %599 = vst [vmem:[%s1046_s3 + $0x18] sm:$0xff] %v683_v58 }

// kernel: tile.23
= control target key start
LH: loop header
LB: loop body
LE: loop exit
PB: predicated region body
PF: predicated region fallthrough
CT: control target
= control target key end

     0   :  { %s22_s0 = inlined_call_operand.vmem [shape: f32[32], index: 0, kind: input, shape index: {}]   ;;  %s23_s1 = inlined_call_operand.vmem [shape: f32[4,32], index: 1, kind: output, shape index: {}]  }
   0x1   :  { %v4_v0 = vld [vmem:[%s22_s0] ss:$0 sm:$0xff] }
   0x2   :  { %5 = vst [vmem:[%s23_s1] sm:$0xf] %v4_v0 }

// kernel: tile.24
= control target key start
LH: loop header
LB: loop body
LE: loop exit
PB: predicated region body
PF: predicated region fallthrough
CT: control target
= control target key end

     0   :  { %vm8_vm0 = vcmask 261120   ;;  %s40_s8 = smov 32   ;;  %s41_s9 = smov 64   ;;  %vm14_vm1 = vcmask 1048320   ;;  %vm20_vm2 = vcmask 785920   ;;  %vm26_vm3 = vcmask 523520   ;;  %s58_s0 = inlined_call_operand.vmem [shape: f32[4,32], index: 0, kind: input, shape index: {}]   ;;  %s59_s1 = inlined_call_operand.vmem [shape: f32[1,128], index: 1, kind: output, shape index: {}]  }
   0x1   :  { %v5_v0 = vld [vmem:[%s58_s0] sm:$0xf]  ;;  %s39_s0 = smov 96  }
   0x2   :  { %6 = vst [vmem:[#allocation1] sm:$0xf] %v5_v0 }
   0x9   :  { %v11_v1 = vld [vmem:[#allocation1 + $0x3] sm:$0x1]   ;;  %v23_v2 = vld [vmem:[#allocation1 + $0x1] sm:$0x1]   ;;  %v7_v3 = vld [vmem:[#allocation1] sm:$0x1]  }
   0xa   :  { %12 = vrot.lane.b32.xlu0 %v11_v1, %s39_s0  ;;  %24 = vrot.lane.b32.xlu1 %v23_v2, %s40_s8  ;;  %v17_v4 = vld [vmem:[#allocation1 + $0x2] sm:$0x1]   ;;  %9 = vst.msk [vmem:[#allocation0] sm:$0x1] %vm8_vm0, %v7_v3  }
   0xe   :  { %18 = vrot.lane.b32.xlu0 %v17_v4, %s41_s9 }
  0x7c   :  { %v13_v5 = vpop.permute.xlu0 %12   ;;  %v25_v6 = vpop.permute.xlu1 %24  }
  0x7d   :  { %15 = vst.msk [vmem:[#allocation0] sm:$0x1] %vm14_vm1, %v13_v5  }
  0x80   :  { %v19_v7 = vpop.permute.xlu0 %18  }
  0x81   :  { %21 = vst.msk [vmem:[#allocation0] sm:$0x1] %vm20_vm2, %v19_v7  }
  0x82   :  { %27 = vst.msk [vmem:[#allocation0] sm:$0x1] %vm26_vm3, %v25_v6  }
  0x89   :  { %v32_v8 = vld [vmem:[#allocation0] sm:$0x1] }
  0x8a   :  { %35 = vst [vmem:[%s59_s1] sm:$0x1] %v32_v8 }

// kernel: vae_forward.12
= control target key start
LH: loop header
LB: loop body
LE: loop exit
PB: predicated region body
PF: predicated region fallthrough
CT: control target
= control target key end

     0   :  { %s836_s1 = inlined_call_operand.vmem [shape: bf16[256,128], index: 1, kind: input, shape index: {}]   ;;  %s837_s0 = inlined_call_operand.vmem [shape: bf16[128,256], index: 0, kind: input, shape index: {}]   ;;  %s838_s2 = inlined_call_operand.vmem [shape: f32[1,128], index: 2, kind: input, shape index: {}]   ;;  %s839_s3 = inlined_call_operand.vmem [shape: bf16[128,128], index: 3, kind: output, shape index: {}]  }
   0x1   :  { %v635_v0 = vld [vmem:[%s836_s1 + $0x78] sm:$0xff]   ;;  %v637_v2 = vld [vmem:[%s836_s1 + $0x70] sm:$0xff]   ;;  %v639_v4 = vld [vmem:[%s836_s1 + $0x68] sm:$0xff]  }
   0x2   :  { %v636_v1 = vld [vmem:[%s836_s1 + $0x38] sm:$0xff]   ;;  %555 = vmatprep.subr.bf16.mxu0 %v635_v0  ;;  %619 = vmatprep.subr.bf16.mxu1 %v635_v0  ;;  %v638_v3 = vld [vmem:[%s836_s1 + $0x30] sm:$0xff]   ;;  %v640_v5 = vld [vmem:[%s836_s1 + $0x28] sm:$0xff]  }
   0x3   :  { %556 = vmatpush3.bf16.msra.mxu0 %v636_v1  ;;  %627 = vmatpush3.bf16.msra.mxu1 %v636_v1  ;;  %v641_v6 = vld [vmem:[%s836_s1 + $0x60] sm:$0xff]   ;;  %v643_v8 = vld [vmem:[%s836_s1 + $0x58] sm:$0xff]   ;;  %v645_v10 = vld [vmem:[%s836_s1 + $0x50] sm:$0xff]  }
   0x4   :  { %557 = vmatprep.subr.bf16.mxu0 %v637_v2  ;;  %620 = vmatprep.subr.bf16.mxu1 %v637_v2  ;;  %v642_v7 = vld [vmem:[%s836_s1 + $0x20] sm:$0xff]   ;;  %v644_v9 = vld [vmem:[%s836_s1 + $0x18] sm:$0xff]   ;;  %v646_v13 = vld [vmem:[%s836_s1 + $0x10] sm:$0xff]  }
   0x5   :  { %v653_v11 = vld [vmem:[%s837_s0 + $0x4] ss:$8 sps:$4 sm:$0xff]   ;;  %v651_v18 = vld [vmem:[%s837_s0] ss:$8 sps:$4 sm:$0xff]   ;;  %v657_v20 = vld [vmem:[%s837_s0 + $0x14] ss:$8 sps:$4 sm:$0xff]  }
   0x6   :  { %v656_v12 = vld [vmem:[%s837_s0 + $0x44] ss:$8 sps:$4 sm:$0xff]   ;;  %278 = vmatprep.mubr.bf16.mxu0 %v653_v11  ;;  %v654_v19 = vld [vmem:[%s837_s0 + $0x40] ss:$8 sps:$4 sm:$0xff]   ;;  %v659_v21 = vld [vmem:[%s837_s0 + $0x54] ss:$8 sps:$4 sm:$0xff]  }
   0x7   :  { %558 = vmatpush3.bf16.msra.mxu0 %v638_v3  ;;  %628 = vmatpush3.bf16.msra.mxu1 %v638_v3  ;;  %v647_v14 = vld [vmem:[%s836_s1 + $0x48] sm:$0xff]   ;;  %v649_v16 = vld [vmem:[%s836_s1 + $0x40] sm:$0xff]   ;;  %v661_v22 = vld [vmem:[%s837_s0 + $0x10] ss:$8 sps:$4 sm:$0xff]  }
   0x8   :  { %559 = vmatprep.subr.bf16.mxu0 %v639_v4  ;;  %621 = vmatprep.subr.bf16.mxu1 %v639_v4  ;;  %v648_v15 = vld [vmem:[%s836_s1 + $0x8] sm:$0xff]   ;;  %v650_v17 = vld [vmem:[%s836_s1] sm:$0xff]   ;;  %v662_v23 = vld [vmem:[%s837_s0 + $0x50] ss:$8 sps:$4 sm:$0xff]  }
   0x9   :  { %310 = vmatprep.mubr.bf16.mxu1 %v656_v12  ;;  %v663_v24 = vld [vmem:[%s837_s0 + $0x24] ss:$8 sps:$4 sm:$0xff]   ;;  %v667_v26 = vld [vmem:[%s837_s0 + $0x20] ss:$8 sps:$4 sm:$0xff]   ;;  %v669_v28 = vld [vmem:[%s837_s0 + $0x34] ss:$8 sps:$4 sm:$0xff]  }
   0xa   :  { %v665_v25 = vld [vmem:[%s837_s0 + $0x64] ss:$8 sps:$4 sm:$0xff]   ;;  %v668_v27 = vld [vmem:[%s837_s0 + $0x60] ss:$8 sps:$4 sm:$0xff]   ;;  %v671_v29 = vld [vmem:[%s837_s0 + $0x74] ss:$8 sps:$4 sm:$0xff]  }
   0xb   :  { %560 = vmatpush3.bf16.msra.mxu0 %v640_v5  ;;  %629 = vmatpush3.bf16.msra.mxu1 %v640_v5  ;;  %v673_v30 = vld [vmem:[%s837_s0 + $0x30] ss:$8 sps:$4 sm:$0xff]   ;;  %v794_v36 = vld [vmem:[%s838_s2] ss:$0 sm:$0xff] }
   0xc   :  { %561 = vmatprep.subr.bf16.mxu0 %v641_v6  ;;  %622 = vmatprep.subr.bf16.mxu1 %v641_v6  ;;  %v674_v31 = vld [vmem:[%s837_s0 + $0x70] ss:$8 sps:$4 sm:$0xff]  }
   0xf   :  { %562 = vmatpush3.bf16.msra.mxu0 %v642_v7  ;;  %630 = vmatpush3.bf16.msra.mxu1 %v642_v7 }
  0x10   :  { %563 = vmatprep.subr.bf16.mxu0 %v643_v8  ;;  %623 = vmatprep.subr.bf16.mxu1 %v643_v8 }
  0x13   :  { %564 = vmatpush3.bf16.msra.mxu0 %v644_v9  ;;  %631 = vmatpush3.bf16.msra.mxu1 %v644_v9 }
  0x14   :  { %565 = vmatprep.subr.bf16.mxu0 %v645_v10  ;;  %624 = vmatprep.subr.bf16.mxu1 %v645_v10 }
  0x17   :  { %566 = vmatpush3.bf16.msra.mxu0 %v646_v13  ;;  %632 = vmatpush3.bf16.msra.mxu1 %v646_v13 }
  0x18   :  { %567 = vmatprep.subr.bf16.mxu0 %v647_v14  ;;  %625 = vmatprep.subr.bf16.mxu1 %v647_v14 }
  0x1b   :  { %568 = vmatpush3.bf16.msra.mxu0 %v648_v15  ;;  %633 = vmatpush3.bf16.msra.mxu1 %v648_v15 }
  0x1c   :  { %569 = vmatprep.subr.bf16.mxu0 %v649_v16  ;;  %626 = vmatprep.subr.bf16.mxu1 %v649_v16 }
  0x1f   :  { %570 = vmatpush3.bf16.msra.mxu0 %v650_v17  ;;  %634 = vmatpush3.bf16.msra.mxu1 %v650_v17 }
  0x22   :  { %279 = vmatmul.mubr.bf16.vlgmr.msra.gmra.mxu0 %v651_v18  ;;  %311 = vmatmul.mubr.bf16.vlgmr.msra.gmra.mxu1 %v654_v19 }
  0x23   :  { %286 = vmatprep.mubr.bf16.mxu0 %v657_v20  ;;  %318 = vmatprep.mubr.bf16.mxu1 %v659_v21 }
  0x2a   :  { %287 = vmatmul.mubr.bf16.gmra.mxu0 %v661_v22  ;;  %319 = vmatmul.mubr.bf16.gmra.mxu1 %v662_v23 }
  0x2b   :  { %294 = vmatprep.mubr.bf16.mxu0 %v663_v24  ;;  %326 = vmatprep.mubr.bf16.mxu1 %v665_v25 }
  0x32   :  { %295 = vmatmul.mubr.bf16.gmra.mxu0 %v667_v26  ;;  %327 = vmatmul.mubr.bf16.gmra.mxu1 %v668_v27 }
  0x33   :  { %302 = vmatprep.mubr.bf16.mxu0 %v669_v28  ;;  %334 = vmatprep.mubr.bf16.mxu1 %v671_v29 }
  0x3a   :  { %303 = vmatmul.mubr.bf16.gmra.mxu0 %v673_v30  ;;  %335 = vmatmul.mubr.bf16.gmra.mxu1 %v674_v31 }
  0xe2   :  { %v571_v32 = vpop.f32.mrf.mxu0  ;;  %v595_v33 = vpop.f32.mrf.mxu1 }
  0xe4   :  { %v572_v34 = vpop.f32.mrf.mxu0  ;;  %v596_v35 = vpop.f32.mrf.mxu1 }
  0xe5   :  { %v573_v37 = vadd.f32 %v572_v34, %v571_v32  ;;  %v597_v38 = vadd.f32 %v596_v35, %v595_v33 }
  0xe6   :  { %v574_v39 = vpop.f32.mrf.mxu0  ;;  %v598_v40 = vpop.f32.mrf.mxu1 }
  0xe7   :  { %v281_v41 = vadd.f32 %v573_v37, %v794_v36  ;;  %v313_v42 = vadd.f32 %v597_v38, %v794_v36 }
  0xe8   :  { %v575_v43 = vpop.f32.mrf.mxu0  ;;  %v599_v44 = vpop.f32.mrf.mxu1 }
  0xe9   :  { %v576_v45 = vadd.f32 %v575_v43, %v574_v39  ;;  %v600_v46 = vadd.f32 %v599_v44, %v598_v40  ;;  %v343_v51 = vmax.f32 %v281_v41, 0.0  ;;  %v351_v52 = vmax.f32 %v313_v42, 0.0 }
  0xea   :  { %v577_v47 = vpop.f32.mrf.mxu0  ;;  %v601_v48 = vpop.f32.mrf.mxu1 }
  0xeb   :  { %v284_v49 = vadd.f32 %v576_v45, %v794_v36  ;;  %v316_v50 = vadd.f32 %v600_v46, %v794_v36 }
  0xec   :  { %v578_v53 = vpop.f32.mrf.mxu0  ;;  %v602_v54 = vpop.f32.mrf.mxu1 }
  0xed   :  { %v344_v55 = vmax.f32 %v284_v49, 0.0  ;;  %v352_v56 = vmax.f32 %v316_v50, 0.0  ;;  %v579_v57 = vadd.f32 %v578_v53, %v577_v47  ;;  %v603_v58 = vadd.f32 %v602_v54, %v601_v48 }
  0xee   :  { %v580_v59 = vpop.f32.mrf.mxu0  ;;  %v604_v60 = vpop.f32.mrf.mxu1 }
  0xef   :  { %v511_v61 = vpack.c.bf16 %v344_v55, %v343_v51  ;;  %v531_v62 = vpack.c.bf16 %v352_v56, %v351_v52  ;;  %v289_v63 = vadd.f32 %v579_v57, %v794_v36  ;;  %v321_v0 = vadd.f32 %v603_v58, %v794_v36 }
  0xf0   :  { %v581_v1 = vpop.f32.mrf.mxu0  ;;  %v605_v2 = vpop.f32.mrf.mxu1 }
  0xf1   :  { %512 = vst [vmem:[%s839_s3] sm:$0xff] %v511_v61   ;;  %551 = vst [vmem:[%s839_s3 + $0x20] sm:$0xff] %v531_v62   ;;  %v582_v3 = vadd.f32 %v581_v1, %v580_v59  ;;  %v606_v4 = vadd.f32 %v605_v2, %v604_v60  ;;  %v345_v9 = vmax.f32 %v289_v63, 0.0  ;;  %v353_v10 = vmax.f32 %v321_v0, 0.0 }
  0xf2   :  { %v583_v5 = vpop.f32.mrf.mxu0  ;;  %v607_v6 = vpop.f32.mrf.mxu1 }
  0xf3   :  { %v292_v7 = vadd.f32 %v582_v3, %v794_v36  ;;  %v324_v8 = vadd.f32 %v606_v4, %v794_v36 }
  0xf4   :  { %v584_v11 = vpop.f32.mrf.mxu0  ;;  %v608_v12 = vpop.f32.mrf.mxu1 }
  0xf5   :  { %v346_v13 = vmax.f32 %v292_v7, 0.0  ;;  %v354_v14 = vmax.f32 %v324_v8, 0.0  ;;  %v585_v15 = vadd.f32 %v584_v11, %v583_v5  ;;  %v609_v16 = vadd.f32 %v608_v12, %v607_v6 }
  0xf6   :  { %v586_v17 = vpop.f32.mrf.mxu0  ;;  %v610_v18 = vpop.f32.mrf.mxu1 }
  0xf7   :  { %v516_v19 = vpack.c.bf16 %v346_v13, %v345_v9  ;;  %v536_v20 = vpack.c.bf16 %v354_v14, %v353_v10  ;;  %v297_v21 = vadd.f32 %v585_v15, %v794_v36  ;;  %v329_v22 = vadd.f32 %v609_v16, %v794_v36 }
  0xf8   :  { %v587_v23 = vpop.f32.mrf.mxu0  ;;  %v611_v24 = vpop.f32.mrf.mxu1 }
  0xf9   :  { %548 = vst [vmem:[%s839_s3 + $0x8] sm:$0xff] %v516_v19   ;;  %552 = vst [vmem:[%s839_s3 + $0x28] sm:$0xff] %v536_v20   ;;  %v588_v25 = vadd.f32 %v587_v23, %v586_v17  ;;  %v612_v26 = vadd.f32 %v611_v24, %v610_v18  ;;  %v347_v31 = vmax.f32 %v297_v21, 0.0  ;;  %v355_v32 = vmax.f32 %v329_v22, 0.0 }
  0xfa   :  { %v589_v27 = vpop.f32.mrf.mxu0  ;;  %v613_v28 = vpop.f32.mrf.mxu1 }
  0xfb   :  { %v300_v29 = vadd.f32 %v588_v25, %v794_v36  ;;  %v332_v30 = vadd.f32 %v612_v26, %v794_v36 }
  0xfc   :  { %v590_v33 = vpop.f32.mrf.mxu0  ;;  %v614_v34 = vpop.f32.mrf.mxu1 }
  0xfd   :  { %v348_v35 = vmax.f32 %v300_v29, 0.0  ;;  %v356_v37 = vmax.f32 %v332_v30, 0.0  ;;  %v591_v38 = vadd.f32 %v590_v33, %v589_v27  ;;  %v615_v39 = vadd.f32 %v614_v34, %v613_v28 }
  0xfe   :  { %v592_v40 = vpop.f32.mrf.mxu0  ;;  %v616_v41 = vpop.f32.mrf.mxu1 }
  0xff   :  { %v521_v42 = vpack.c.bf16 %v348_v35, %v347_v31  ;;  %v541_v43 = vpack.c.bf16 %v356_v37, %v355_v32  ;;  %v305_v46 = vadd.f32 %v591_v38, %v794_v36  ;;  %v337_v47 = vadd.f32 %v615_v39, %v794_v36 }
 0x100   :  { %v593_v44 = vpop.f32.mrf.mxu0  ;;  %v617_v45 = vpop.f32.mrf.mxu1 }
 0x101   :  { %549 = vst [vmem:[%s839_s3 + $0x10] sm:$0xff] %v521_v42   ;;  %553 = vst [vmem:[%s839_s3 + $0x30] sm:$0xff] %v541_v43   ;;  %v594_v48 = vadd.f32 %v593_v44, %v592_v40  ;;  %v618_v49 = vadd.f32 %v617_v45, %v616_v41  ;;  %v349_v52 = vmax.f32 %v305_v46, 0.0  ;;  %v357_v53 = vmax.f32 %v337_v47, 0.0 }
 0x103   :  { %v308_v50 = vadd.f32 %v594_v48, %v794_v36  ;;  %v340_v51 = vadd.f32 %v618_v49, %v794_v36 }
 0x105   :  { %v350_v54 = vmax.f32 %v308_v50, 0.0  ;;  %v358_v55 = vmax.f32 %v340_v51, 0.0 }
 0x107   :  { %v526_v56 = vpack.c.bf16 %v350_v54, %v349_v52  ;;  %v546_v57 = vpack.c.bf16 %v358_v55, %v357_v53 }
 0x109   :  { %550 = vst [vmem:[%s839_s3 + $0x18] sm:$0xff] %v526_v56   ;;  %554 = vst [vmem:[%s839_s3 + $0x38] sm:$0xff] %v546_v57  }

// kernel: vae_forward.13
= control target key start
LH: loop header
LB: loop body
LE: loop exit
PB: predicated region body
PF: predicated region fallthrough
CT: control target
= control target key end

     0   :  { %vm1015_vm0 = vcmask 31744   ;;  %s2098_s1 = inlined_call_operand.vmem [shape: bf16[128,4], index: 1, kind: input, shape index: {}]   ;;  %s2099_s0 = inlined_call_operand.vmem [shape: bf16[512,128], index: 0, kind: input, shape index: {}]   ;;  %s2100_s2 = inlined_call_operand.vmem [shape: f32[1,4], index: 2, kind: input, shape index: {}]   ;;  %s2101_s3 = inlined_call_operand.vmem [shape: f32[512,4], index: 3, kind: output, shape index: {}]  }
   0x1   :  { %v1325_v0 = vld [vmem:[%s2098_s1 + $0x38] sm:$0xff]   ;;  %v1326_v1 = vld [vmem:[%s2098_s1 + $0x30] sm:$0xff]   ;;  %v1327_v2 = vld [vmem:[%s2098_s1 + $0x28] sm:$0xff]  }
   0x2   :  { %1229 = vmatprep.subr.bf16.mxu0 %v1325_v0  ;;  %1309 = vmatprep.subr.bf16.mxu1 %v1325_v0  ;;  %v1328_v3 = vld [vmem:[%s2098_s1 + $0x20] sm:$0xff]   ;;  %v1329_v6 = vld [vmem:[%s2098_s1 + $0x18] sm:$0xff]   ;;  %v1330_v7 = vld [vmem:[%s2098_s1 + $0x10] sm:$0xff]  }
   0x3   :  { %1230 = vmatpush3.bf16.msra.mxu0 %v1325_v0  ;;  %1317 = vmatpush3.bf16.msra.mxu1 %v1325_v0  ;;  %v1333_v4 = vld [vmem:[%s2099_s0] sm:$0xff]   ;;  %v1331_v8 = vld [vmem:[%s2098_s1 + $0x8] sm:$0xff]   ;;  %v1337_v12 = vld [vmem:[%s2099_s0 + $0x10] sm:$0xff]  }
   0x4   :  { %1231 = vmatprep.subr.bf16.mxu0 %v1326_v1  ;;  %1310 = vmatprep.subr.bf16.mxu1 %v1326_v1  ;;  %v1334_v5 = vld [vmem:[%s2099_s0 + $0x80] sm:$0xff]   ;;  %v1335_v10 = vld [vmem:[%s2099_s0 + $0x8] sm:$0xff]   ;;  %v1338_v13 = vld [vmem:[%s2099_s0 + $0x90] sm:$0xff]  }
   0x5   :  { %1245 = vmatprep.mubr.bf16.mxu0 %v1333_v4  ;;  %1277 = vmatprep.mubr.bf16.mxu1 %v1334_v5  ;;  %v1332_v9 = vld [vmem:[%s2098_s1] sm:$0xff]   ;;  %v1336_v11 = vld [vmem:[%s2099_s0 + $0x88] sm:$0xff]   ;;  %v1339_v14 = vld [vmem:[%s2099_s0 + $0x18] sm:$0xff]  }
   0x6   :  { %v1340_v15 = vld [vmem:[%s2099_s0 + $0x98] sm:$0xff]   ;;  %v1341_v16 = vld [vmem:[%s2099_s0 + $0x20] sm:$0xff]   ;;  %v1343_v18 = vld [vmem:[%s2099_s0 + $0x28] sm:$0xff]  }
   0x7   :  { %1232 = vmatpush3.bf16.msra.mxu0 %v1326_v1  ;;  %1318 = vmatpush3.bf16.msra.mxu1 %v1326_v1  ;;  %v1342_v17 = vld [vmem:[%s2099_s0 + $0xa0] sm:$0xff]   ;;  %v1344_v19 = vld [vmem:[%s2099_s0 + $0xa8] sm:$0xff]   ;;  %v1345_v20 = vld [vmem:[%s2099_s0 + $0x30] sm:$0xff]  }
   0x8   :  { %1233 = vmatprep.subr.bf16.mxu0 %v1327_v2  ;;  %1311 = vmatprep.subr.bf16.mxu1 %v1327_v2  ;;  %v1346_v21 = vld [vmem:[%s2099_s0 + $0xb0] sm:$0xff]   ;;  %v1347_v22 = vld [vmem:[%s2099_s0 + $0x38] sm:$0xff]   ;;  %v1349_v24 = vld [vmem:[%s2099_s0 + $0x40] sm:$0xff]  }
   0x9   :  { %v1348_v23 = vld [vmem:[%s2099_s0 + $0xb8] sm:$0xff]   ;;  %v1350_v25 = vld [vmem:[%s2099_s0 + $0xc0] sm:$0xff]   ;;  %v1351_v26 = vld [vmem:[%s2099_s0 + $0x48] sm:$0xff]  }
   0xa   :  { %v1352_v27 = vld [vmem:[%s2099_s0 + $0xc8] sm:$0xff]   ;;  %v1353_v28 = vld [vmem:[%s2099_s0 + $0x50] sm:$0xff]   ;;  %v1355_v30 = vld [vmem:[%s2099_s0 + $0x58] sm:$0xff]  }
   0xb   :  { %1234 = vmatpush3.bf16.msra.mxu0 %v1327_v2  ;;  %1319 = vmatpush3.bf16.msra.mxu1 %v1327_v2  ;;  %v1354_v29 = vld [vmem:[%s2099_s0 + $0xd0] sm:$0xff]   ;;  %v1356_v31 = vld [vmem:[%s2099_s0 + $0xd8] sm:$0xff]   ;;  %v1357_v32 = vld [vmem:[%s2099_s0 + $0x60] sm:$0xff]  }
   0xc   :  { %1235 = vmatprep.subr.bf16.mxu0 %v1328_v3  ;;  %1312 = vmatprep.subr.bf16.mxu1 %v1328_v3  ;;  %v1358_v33 = vld [vmem:[%s2099_s0 + $0xe0] sm:$0xff]   ;;  %v1359_v34 = vld [vmem:[%s2099_s0 + $0x68] sm:$0xff]   ;;  %v1361_v36 = vld [vmem:[%s2099_s0 + $0x70] sm:$0xff]  }
   0xd   :  { %v1360_v35 = vld [vmem:[%s2099_s0 + $0xe8] sm:$0xff]   ;;  %v1362_v37 = vld [vmem:[%s2099_s0 + $0xf0] sm:$0xff]   ;;  %v1363_v38 = vld [vmem:[%s2099_s0 + $0x78] sm:$0xff]  }
   0xe   :  { %v1364_v39 = vld [vmem:[%s2099_s0 + $0xf8] sm:$0xff]   ;;  %v1764_v40 = vld [vmem:[%s2100_s2] ss:$0 sm:$0xff] }
   0xf   :  { %1236 = vmatpush3.bf16.msra.mxu0 %v1328_v3  ;;  %1320 = vmatpush3.bf16.msra.mxu1 %v1328_v3 }
  0x10   :  { %1237 = vmatprep.subr.bf16.mxu0 %v1329_v6  ;;  %1313 = vmatprep.subr.bf16.mxu1 %v1329_v6 }
  0x13   :  { %1238 = vmatpush3.bf16.msra.mxu0 %v1329_v6  ;;  %1321 = vmatpush3.bf16.msra.mxu1 %v1329_v6 }
  0x14   :  { %1239 = vmatprep.subr.bf16.mxu0 %v1330_v7  ;;  %1314 = vmatprep.subr.bf16.mxu1 %v1330_v7 }
  0x17   :  { %1240 = vmatpush3.bf16.msra.mxu0 %v1330_v7  ;;  %1322 = vmatpush3.bf16.msra.mxu1 %v1330_v7 }
  0x18   :  { %1241 = vmatprep.subr.bf16.mxu0 %v1331_v8  ;;  %1315 = vmatprep.subr.bf16.mxu1 %v1331_v8 }
  0x1b   :  { %1242 = vmatpush3.bf16.msra.mxu0 %v1331_v8  ;;  %1323 = vmatpush3.bf16.msra.mxu1 %v1331_v8 }
  0x1c   :  { %1243 = vmatprep.subr.bf16.mxu0 %v1332_v9  ;;  %1316 = vmatprep.subr.bf16.mxu1 %v1332_v9 }
  0x1f   :  { %1244 = vmatpush3.bf16.msra.mxu0 %v1332_v9  ;;  %1324 = vmatpush3.bf16.msra.mxu1 %v1332_v9 }
  0x22   :  { %1246 = vmatmul.mubr.bf16.vlgmr.msra.gmra.mxu0 %v1335_v10  ;;  %1278 = vmatmul.mubr.bf16.vlgmr.msra.gmra.mxu1 %v1336_v11 }
  0x23   :  { %1249 = vmatprep.mubr.bf16.mxu0 %v1337_v12  ;;  %1281 = vmatprep.mubr.bf16.mxu1 %v1338_v13 }
  0x2a   :  { %1250 = vmatmul.mubr.bf16.gmra.mxu0 %v1339_v14  ;;  %1282 = vmatmul.mubr.bf16.gmra.mxu1 %v1340_v15 }
  0x2b   :  { %1253 = vmatprep.mubr.bf16.mxu0 %v1341_v16  ;;  %1285 = vmatprep.mubr.bf16.mxu1 %v1342_v17 }
  0x32   :  { %1254 = vmatmul.mubr.bf16.gmra.mxu0 %v1343_v18  ;;  %1286 = vmatmul.mubr.bf16.gmra.mxu1 %v1344_v19 }
  0x33   :  { %1257 = vmatprep.mubr.bf16.mxu0 %v1345_v20  ;;  %1289 = vmatprep.mubr.bf16.mxu1 %v1346_v21 }
  0x3a   :  { %1258 = vmatmul.mubr.bf16.gmra.mxu0 %v1347_v22  ;;  %1290 = vmatmul.mubr.bf16.gmra.mxu1 %v1348_v23 }
  0x3b   :  { %1261 = vmatprep.mubr.bf16.mxu0 %v1349_v24  ;;  %1293 = vmatprep.mubr.bf16.mxu1 %v1350_v25 }
  0x42   :  { %1262 = vmatmul.mubr.bf16.gmra.mxu0 %v1351_v26  ;;  %1294 = vmatmul.mubr.bf16.gmra.mxu1 %v1352_v27 }
  0x43   :  { %1265 = vmatprep.mubr.bf16.mxu0 %v1353_v28  ;;  %1297 = vmatprep.mubr.bf16.mxu1 %v1354_v29 }
  0x4a   :  { %1266 = vmatmul.mubr.bf16.gmra.mxu0 %v1355_v30  ;;  %1298 = vmatmul.mubr.bf16.gmra.mxu1 %v1356_v31 }
  0x4b   :  { %1269 = vmatprep.mubr.bf16.mxu0 %v1357_v32  ;;  %1301 = vmatprep.mubr.bf16.mxu1 %v1358_v33 }
  0x52   :  { %1270 = vmatmul.mubr.bf16.gmra.mxu0 %v1359_v34  ;;  %1302 = vmatmul.mubr.bf16.gmra.mxu1 %v1360_v35 }
  0x53   :  { %1273 = vmatprep.mubr.bf16.mxu0 %v1361_v36  ;;  %1305 = vmatprep.mubr.bf16.mxu1 %v1362_v37 }
  0x5a   :  { %1274 = vmatmul.mubr.bf16.gmra.mxu0 %v1363_v38  ;;  %1306 = vmatmul.mubr.bf16.gmra.mxu1 %v1364_v39 }
  0xe2   :  { %v1247_v41 = vpop.f32.mrf.mxu0  ;;  %v1279_v42 = vpop.f32.mrf.mxu1 }
  0xe3   :  { %v385_v43 = vadd.f32 %v1247_v41, %v1764_v40  ;;  %v513_v44 = vadd.f32 %v1279_v42, %v1764_v40 }
  0xe4   :  { %v376_v45 = vpop.f32.mrf.mxu0  ;;  %v504_v46 = vpop.f32.mrf.mxu1 }
  0xe5   :  { %v1127_v47 = vmul.f32 -1.442695, %v385_v43  ;;  %v1159_v48 = vmul.f32 -1.442695, %v513_v44  ;;  %v377_v49 = vadd.f32 %v1764_v40, %v376_v45  ;;  %v505_v50 = vadd.f32 %v1764_v40, %v504_v46 }
  0xe6   :  { %v1248_v51 = vpop.f32.mrf.mxu0  ;;  %v1280_v52 = vpop.f32.mrf.mxu1 }
  0xe7   :  { %1365 = vpow2.f32 %v1127_v47  ;;  %v1125_v53 = vmul.f32 -1.442695, %v377_v49  ;;  %v1157_v54 = vmul.f32 -1.442695, %v505_v50  ;;  %v388_v55 = vadd.f32 %v1248_v51, %v1764_v40 }
  0xe8   :  { %1367 = vpow2.f32 %v1159_v48  ;;  %v516_v56 = vadd.f32 %v1280_v52, %v1764_v40  ;;  %v379_v57 = vpop.f32.mrf.mxu0  ;;  %v507_v58 = vpop.f32.mrf.mxu1 }
  0xe9   :  { %1369 = vpow2.f32 %v1125_v53  ;;  %v1128_v59 = vmul.f32 -1.442695, %v388_v55  ;;  %v380_v60 = vadd.f32 %v1764_v40, %v379_v57  ;;  %v508_v61 = vadd.f32 %v1764_v40, %v507_v58 }
  0xea   :  { %1371 = vpow2.f32 %v1157_v54  ;;  %v1160_v62 = vmul.f32 -1.442695, %v516_v56  ;;  %v1251_v63 = vpop.f32.mrf.mxu0  ;;  %v1283_v0 = vpop.f32.mrf.mxu1 }
  0xeb   :  { %1373 = vpow2.f32 %v1128_v59  ;;  %v1126_v1 = vmul.f32 -1.442695, %v380_v60  ;;  %v1158_v2 = vmul.f32 -1.442695, %v508_v61  ;;  %v401_v3 = vadd.f32 %v1251_v63, %v1764_v40 }
  0xec   :  { %1375 = vpow2.f32 %v1160_v62  ;;  %v529_v4 = vadd.f32 %v1283_v0, %v1764_v40  ;;  %v392_v5 = vpop.f32.mrf.mxu0  ;;  %v520_v6 = vpop.f32.mrf.mxu1 }
  0xed   :  { %1377 = vpow2.f32 %v1126_v1  ;;  %v1131_v7 = vmul.f32 -1.442695, %v401_v3  ;;  %v393_v8 = vadd.f32 %v1764_v40, %v392_v5  ;;  %v521_v9 = vadd.f32 %v1764_v40, %v520_v6 }
  0xee   :  { %1379 = vpow2.f32 %v1158_v2  ;;  %v1163_v10 = vmul.f32 -1.442695, %v529_v4  ;;  %v1252_v11 = vpop.f32.mrf.mxu0  ;;  %v1284_v12 = vpop.f32.mrf.mxu1 }
  0xef   :  { %1381 = vpow2.f32 %v1131_v7  ;;  %v1129_v13 = vmul.f32 -1.442695, %v393_v8  ;;  %v1161_v14 = vmul.f32 -1.442695, %v521_v9  ;;  %v404_v15 = vadd.f32 %v1252_v11, %v1764_v40 }
  0xf0   :  { %1383 = vpow2.f32 %v1163_v10  ;;  %v532_v16 = vadd.f32 %v1284_v12, %v1764_v40  ;;  %v395_v17 = vpop.f32.mrf.mxu0  ;;  %v523_v18 = vpop.f32.mrf.mxu1 }
  0xf1   :  { %1385 = vpow2.f32 %v1129_v13  ;;  %v1132_v19 = vmul.f32 -1.442695, %v404_v15  ;;  %v396_v20 = vadd.f32 %v1764_v40, %v395_v17  ;;  %v524_v21 = vadd.f32 %v1764_v40, %v523_v18 }
  0xf2   :  { %1387 = vpow2.f32 %v1161_v14  ;;  %v1164_v22 = vmul.f32 -1.442695, %v532_v16  ;;  %v1255_v23 = vpop.f32.mrf.mxu0  ;;  %v1287_v24 = vpop.f32.mrf.mxu1 }
  0xf3   :  { %1389 = vpow2.f32 %v1132_v19  ;;  %v1130_v25 = vmul.f32 -1.442695, %v396_v20  ;;  %v1162_v26 = vmul.f32 -1.442695, %v524_v21  ;;  %v417_v58 = vadd.f32 %v1255_v23, %v1764_v40 }
  0xf4   :  { %v1366_v27 = vpop.eup %1365  ;;  %1391 = vpow2.f32 %v1164_v22  ;;  %v408_v28 = vpop.f32.mrf.mxu0  ;;  %v545_v62 = vadd.f32 %v1287_v24, %v1764_v40 }
  0xf5   :  { %v536_v29 = vpop.f32.mrf.mxu1  ;;  %v1368_v30 = vpop.eup %1367  ;;  %v825_v31 = vadd.f32 1.0, %v1366_v27  ;;  %1393 = vpow2.f32 %v1130_v25  ;;  %v409_v1 = vadd.f32 %v1764_v40, %v408_v28  ;;  %v1135_v8 = vmul.f32 -1.442695, %v417_v58 }
  0xf6   :  { %v1370_v32 = vpop.eup %1369  ;;  %v857_v33 = vadd.f32 1.0, %v1368_v30  ;;  %1395 = vpow2.f32 %v1162_v26  ;;  %v1256_v34 = vpop.f32.mrf.mxu0  ;;  %v537_v4 = vadd.f32 %v1764_v40, %v536_v29  ;;  %v1167_v13 = vmul.f32 -1.442695, %v545_v62 }
  0xf7   :  { %v1372_v35 = vpop.eup %1371  ;;  %1397 = vrcp.f32 %v825_v31  ;;  %v823_v36 = vadd.f32 1.0, %v1370_v32  ;;  %v1288_v37 = vpop.f32.mrf.mxu1  ;;  %v420_v9 = vadd.f32 %v1256_v34, %v1764_v40  ;;  %v1133_v16 = vmul.f32 -1.442695, %v409_v1 }
  0xf8   :  { %v1374_v38 = vpop.eup %1373  ;;  %1399 = vrcp.f32 %v857_v33  ;;  %v855_v39 = vadd.f32 1.0, %v1372_v35  ;;  %v411_v45 = vpop.f32.mrf.mxu0  ;;  %v548_v14 = vadd.f32 %v1288_v37, %v1764_v40  ;;  %v1165_v19 = vmul.f32 -1.442695, %v537_v4 }
  0xf9   :  { %v1376_v41 = vpop.eup %1375  ;;  %1401 = vrcp.f32 %v823_v36  ;;  %v826_v42 = vadd.f32 1.0, %v1374_v38  ;;  %v539_v48 = vpop.f32.mrf.mxu1  ;;  %v412_v17 = vadd.f32 %v1764_v40, %v411_v45  ;;  %v1136_v23 = vmul.f32 -1.442695, %v420_v9 }
  0xfa   :  { %v1378_v43 = vpop.eup %1377  ;;  %1403 = vrcp.f32 %v855_v39  ;;  %v858_v44 = vadd.f32 1.0, %v1376_v41  ;;  %v1259_v55 = vpop.f32.mrf.mxu0  ;;  %v540_v20 = vadd.f32 %v1764_v40, %v539_v48  ;;  %v1168_v27 = vmul.f32 -1.442695, %v548_v14 }
  0xfb   :  { %v1380_v46 = vpop.eup %1379  ;;  %1405 = vrcp.f32 %v826_v42  ;;  %v824_v47 = vadd.f32 1.0, %v1378_v43  ;;  %v1291_v59 = vpop.f32.mrf.mxu1  ;;  %v433_v24 = vadd.f32 %v1259_v55, %v1764_v40  ;;  %v1134_v30 = vmul.f32 -1.442695, %v412_v17 }
  0xfc   :  { %v1382_v49 = vpop.eup %1381  ;;  %1407 = vrcp.f32 %v858_v44  ;;  %v856_v50 = vadd.f32 1.0, %v1380_v46  ;;  %v424_v5 = vpop.f32.mrf.mxu0  ;;  %v561_v28 = vadd.f32 %v1291_v59, %v1764_v40  ;;  %v1166_v33 = vmul.f32 -1.442695, %v540_v20 }
  0xfd   :  { %v1384_v51 = vpop.eup %1383  ;;  %1409 = vrcp.f32 %v824_v47  ;;  %v829_v52 = vadd.f32 1.0, %v1382_v49  ;;  %v552_v10 = vpop.f32.mrf.mxu1  ;;  %v425_v31 = vadd.f32 %v1764_v40, %v424_v5  ;;  %v1139_v37 = vmul.f32 -1.442695, %v433_v24 }
  0xfe   :  { %v1386_v53 = vpop.eup %1385  ;;  %1411 = vrcp.f32 %v856_v50  ;;  %v861_v54 = vadd.f32 1.0, %v1384_v51  ;;  %v1260_v21 = vpop.f32.mrf.mxu0  ;;  %v553_v34 = vadd.f32 %v1764_v40, %v552_v10  ;;  %v1171_v42 = vmul.f32 -1.442695, %v561_v28 }
  0xff   :  { %v1388_v56 = vpop.eup %1387  ;;  %1413 = vrcp.f32 %v829_v52  ;;  %v827_v57 = vadd.f32 1.0, %v1386_v53  ;;  %v1292_v25 = vpop.f32.mrf.mxu1  ;;  %v436_v38 = vadd.f32 %v1260_v21, %v1764_v40  ;;  %v1137_v45 = vmul.f32 -1.442695, %v425_v31 }
 0x100   :  { %v1390_v60 = vpop.eup %1389  ;;  %1415 = vrcp.f32 %v861_v54  ;;  %v859_v61 = vadd.f32 1.0, %v1388_v56  ;;  %v427_v35 = vpop.f32.mrf.mxu0  ;;  %v564_v43 = vadd.f32 %v1292_v25, %v1764_v40  ;;  %v1169_v48 = vmul.f32 -1.442695, %v553_v34 }
 0x101   :  { %v1392_v63 = vpop.eup %1391  ;;  %1417 = vrcp.f32 %v827_v57  ;;  %v830_v0 = vadd.f32 1.0, %v1390_v60  ;;  %v555_v39 = vpop.f32.mrf.mxu1  ;;  %v428_v46 = vadd.f32 %v1764_v40, %v427_v35  ;;  %v1140_v52 = vmul.f32 -1.442695, %v436_v38 }
 0x102   :  { %v1394_v2 = vpop.eup %1393  ;;  %1419 = vrcp.f32 %v859_v61  ;;  %v862_v3 = vadd.f32 1.0, %v1392_v63  ;;  %v556_v49 = vadd.f32 %v1764_v40, %v555_v39  ;;  %v1838_v50 = vpop.f32.mrf.mxu0  ;;  %v1172_v55 = vmul.f32 -1.442695, %v564_v43 }
 0x103   :  { %v1396_v6 = vpop.eup %1395  ;;  %1421 = vrcp.f32 %v830_v0  ;;  %v828_v7 = vadd.f32 1.0, %v1394_v2  ;;  %v1844_v53 = vpop.f32.mrf.mxu1  ;;  %v1138_v57 = vmul.f32 -1.442695, %v428_v46 }
 0x104   :  { %v1398_v11 = vpop.eup %1397  ;;  %1423 = vrcp.f32 %v862_v3  ;;  %v860_v12 = vadd.f32 1.0, %v1396_v6  ;;  %v1170_v59 = vmul.f32 -1.442695, %v556_v49  ;;  %v440_v60 = vpop.f32.mrf.mxu0  ;;  %v577_v31 = vadd.f32 %v1844_v53, %v1764_v40 }
 0x105   :  { %v1400_v15 = vpop.eup %1399  ;;  %1018 = vst.msk [vmem:[%s2101_s3 + $0x10] sm:$0xff] %vm1015_vm0, %v1398_v11  ;;  %1425 = vrcp.f32 %v828_v7  ;;  %v568_v62 = vpop.f32.mrf.mxu1  ;;  %v441_v34 = vadd.f32 %v1764_v40, %v440_v60 }
 0x106   :  { %v1402_v18 = vpop.eup %1401  ;;  %1050 = vst.msk [vmem:[%s2101_s3 + $0x110] sm:$0xff] %vm1015_vm0, %v1400_v15  ;;  %1427 = vrcp.f32 %v860_v12  ;;  %v1264_v4 = vpop.f32.mrf.mxu0 }
 0x107   :  { %v1404_v22 = vpop.eup %1403  ;;  %1016 = vst.msk [vmem:[%s2101_s3] sm:$0xff] %vm1015_vm0, %v1402_v18  ;;  %1429 = vpow2.f32 %v1135_v8  ;;  %v1296_v7 = vpop.f32.mrf.mxu1  ;;  %v452_v43 = vadd.f32 %v1264_v4, %v1764_v40 }
 0x108   :  { %v1406_v26 = vpop.eup %1405  ;;  %1048 = vst.msk [vmem:[%s2101_s3 + $0x100] sm:$0xff] %vm1015_vm0, %v1404_v22  ;;  %1431 = vpow2.f32 %v1167_v13  ;;  %v443_v14 = vpop.f32.mrf.mxu0 }
 0x109   :  { %v1408_v29 = vpop.eup %1407  ;;  %1019 = vst.msk [vmem:[%s2101_s3 + $0x18] sm:$0xff] %vm1015_vm0, %v1406_v26  ;;  %1433 = vpow2.f32 %v1133_v16  ;;  %v571_v17 = vpop.f32.mrf.mxu1 }
 0x10a   :  { %v1410_v32 = vpop.eup %1409  ;;  %1051 = vst.msk [vmem:[%s2101_s3 + $0x118] sm:$0xff] %vm1015_vm0, %v1408_v29  ;;  %1435 = vpow2.f32 %v1165_v19  ;;  %v1267_v24 = vpop.f32.mrf.mxu0 }
 0x10b   :  { %v1412_v36 = vpop.eup %1411  ;;  %1017 = vst.msk [vmem:[%s2101_s3 + $0x8] sm:$0xff] %vm1015_vm0, %v1410_v32  ;;  %1437 = vpow2.f32 %v1136_v23  ;;  %v1299_v28 = vpop.f32.mrf.mxu1 }
 0x10c   :  { %v1414_v41 = vpop.eup %1413  ;;  %1049 = vst.msk [vmem:[%s2101_s3 + $0x108] sm:$0xff] %vm1015_vm0, %v1412_v36  ;;  %1439 = vpow2.f32 %v1168_v27  ;;  %v449_v27 = vadd.f32 %v1838_v50, %v1764_v40  ;;  %v456_v38 = vpop.f32.mrf.mxu0  ;;  %v1141_v50 = vmul.f32 -1.442695, %v441_v34 }
 0x10d   :  { %v1416_v44 = vpop.eup %1415  ;;  %1022 = vst.msk [vmem:[%s2101_s3 + $0x30] sm:$0xff] %vm1015_vm0, %v1414_v41  ;;  %1441 = vpow2.f32 %v1134_v30 }
 0x10e   :  { %v1418_v47 = vpop.eup %1417  ;;  %1054 = vst.msk [vmem:[%s2101_s3 + $0x130] sm:$0xff] %vm1015_vm0, %v1416_v44  ;;  %1443 = vpow2.f32 %v1166_v33  ;;  %v584_v44 = vpop.f32.mrf.mxu1 }
 0x10f   :  { %v1420_v51 = vpop.eup %1419  ;;  %1020 = vst.msk [vmem:[%s2101_s3 + $0x20] sm:$0xff] %vm1015_vm0, %v1418_v47  ;;  %1445 = vpow2.f32 %v1139_v37  ;;  %v569_v37 = vadd.f32 %v1764_v40, %v568_v62  ;;  %v1175_v47 = vmul.f32 -1.442695, %v577_v31  ;;  %v593_v62 = vadd.f32 %v1299_v28, %v1764_v40 }
 0x110   :  { %v1422_v54 = vpop.eup %1421  ;;  %1052 = vst.msk [vmem:[%s2101_s3 + $0x120] sm:$0xff] %vm1015_vm0, %v1420_v51  ;;  %1447 = vpow2.f32 %v1171_v42  ;;  %v1143_v42 = vmul.f32 -1.442695, %v449_v27  ;;  %v444_v51 = vadd.f32 %v1764_v40, %v443_v14  ;;  %v585_v4 = vadd.f32 %v1764_v40, %v584_v44 }
 0x111   :  { %v1424_v56 = vpop.eup %1423  ;;  %1023 = vst.msk [vmem:[%s2101_s3 + $0x38] sm:$0xff] %vm1015_vm0, %v1422_v54  ;;  %1449 = vpow2.f32 %v1137_v45  ;;  %v1173_v53 = vmul.f32 -1.442695, %v569_v37  ;;  %v572_v54 = vadd.f32 %v1764_v40, %v571_v17 }
 0x112   :  { %v1426_v58 = vpop.eup %1425  ;;  %1055 = vst.msk [vmem:[%s2101_s3 + $0x138] sm:$0xff] %vm1015_vm0, %v1424_v56  ;;  %1451 = vpow2.f32 %v1169_v48  ;;  %v580_v48 = vadd.f32 %v1296_v7, %v1764_v40  ;;  %v1177_v17 = vmul.f32 -1.442695, %v585_v4 }
 0x113   :  { %v1428_v61 = vpop.eup %1427  ;;  %1021 = vst.msk [vmem:[%s2101_s3 + $0x28] sm:$0xff] %vm1015_vm0, %v1426_v58  ;;  %1453 = vpow2.f32 %v1140_v52  ;;  %v465_v58 = vadd.f32 %v1267_v24, %v1764_v40 }
 0x114   :  { %v1430_v63 = vpop.eup %1429  ;;  %1053 = vst.msk [vmem:[%s2101_s3 + $0x128] sm:$0xff] %vm1015_vm0, %v1428_v61  ;;  %1455 = vpow2.f32 %v1172_v55  ;;  %v1268_v55 = vpop.f32.mrf.mxu0  ;;  %v1176_v61 = vmul.f32 -1.442695, %v580_v48 }
 0x115   :  { %v1432_v0 = vpop.eup %1431  ;;  %v833_v1 = vadd.f32 1.0, %v1430_v63  ;;  %1457 = vpow2.f32 %v1138_v57  ;;  %v1144_v57 = vmul.f32 -1.442695, %v452_v43  ;;  %v1147_v7 = vmul.f32 -1.442695, %v465_v58 }
 0x116   :  { %v1434_v2 = vpop.eup %1433  ;;  %v865_v3 = vadd.f32 1.0, %v1432_v0  ;;  %1459 = vpow2.f32 %v1170_v59  ;;  %v1300_v59 = vpop.f32.mrf.mxu1  ;;  %v1142_v0 = vmul.f32 -1.442695, %v444_v51 }
 0x117   :  { %v1436_v5 = vpop.eup %1435  ;;  %1461 = vrcp.f32 %v833_v1  ;;  %v831_v6 = vadd.f32 1.0, %v1434_v2  ;;  %v457_v1 = vadd.f32 %v1764_v40, %v456_v38 }
 0x118   :  { %v1438_v8 = vpop.eup %1437  ;;  %1463 = vrcp.f32 %v865_v3  ;;  %v863_v9 = vadd.f32 1.0, %v1436_v5  ;;  %v1174_v3 = vmul.f32 -1.442695, %v572_v54  ;;  %v459_v5 = vpop.f32.mrf.mxu0 }
 0x119   :  { %v1440_v10 = vpop.eup %1439  ;;  %1465 = vrcp.f32 %v831_v6  ;;  %v834_v11 = vadd.f32 1.0, %v1438_v8  ;;  %v468_v8 = vadd.f32 %v1268_v55, %v1764_v40  ;;  %v1145_v14 = vmul.f32 -1.442695, %v457_v1 }
 0x11a   :  { %v1442_v12 = vpop.eup %1441  ;;  %1467 = vrcp.f32 %v863_v9  ;;  %v866_v13 = vadd.f32 1.0, %v1440_v10  ;;  %v587_v9 = vpop.f32.mrf.mxu1 }
 0x11b   :  { %v1444_v15 = vpop.eup %1443  ;;  %1469 = vrcp.f32 %v834_v11  ;;  %v832_v16 = vadd.f32 1.0, %v1442_v12  ;;  %v1179_v11 = vmul.f32 -1.442695, %v593_v62  ;;  %v596_v12 = vadd.f32 %v1300_v59, %v1764_v40 }
 0x11c   :  { %v1446_v18 = vpop.eup %1445  ;;  %1471 = vrcp.f32 %v866_v13  ;;  %v864_v19 = vadd.f32 1.0, %v1444_v15  ;;  %v460_v15 = vadd.f32 %v1764_v40, %v459_v5 }
 0x11d   :  { %v1448_v20 = vpop.eup %1447  ;;  %1473 = vrcp.f32 %v832_v16  ;;  %v837_v21 = vadd.f32 1.0, %v1446_v18  ;;  %v588_v18 = vadd.f32 %v1764_v40, %v587_v9  ;;  %v1180_v24 = vmul.f32 -1.442695, %v596_v12 }
 0x11e   :  { %v1450_v22 = vpop.eup %1449  ;;  %1475 = vrcp.f32 %v864_v19  ;;  %v869_v23 = vadd.f32 1.0, %v1448_v20  ;;  %v1924_v19 = vpop.f32.mrf.mxu0 }
 0x11f   :  { %v1452_v25 = vpop.eup %1451  ;;  %1477 = vrcp.f32 %v837_v21  ;;  %v835_v26 = vadd.f32 1.0, %v1450_v22  ;;  %v1148_v21 = vmul.f32 -1.442695, %v468_v8  ;;  %v1930_v22 = vpop.f32.mrf.mxu1  ;;  %v1178_v28 = vmul.f32 -1.442695, %v588_v18 }
 0x120   :  { %v1454_v29 = vpop.eup %1453  ;;  %1479 = vrcp.f32 %v869_v23  ;;  %v867_v30 = vadd.f32 1.0, %v1452_v25  ;;  %v609_v1 = vadd.f32 %v1930_v22, %v1764_v40 }
 0x121   :  { %v1456_v32 = vpop.eup %1455  ;;  %1481 = vrcp.f32 %v835_v26  ;;  %v838_v33 = vadd.f32 1.0, %v1454_v29  ;;  %v1146_v26 = vmul.f32 -1.442695, %v460_v15  ;;  %v472_v29 = vpop.f32.mrf.mxu0 }
 0x122   :  { %v1458_v35 = vpop.eup %1457  ;;  %1483 = vrcp.f32 %v867_v30  ;;  %v870_v36 = vadd.f32 1.0, %v1456_v32  ;;  %v600_v31 = vpop.f32.mrf.mxu1  ;;  %v473_v4 = vadd.f32 %v1764_v40, %v472_v29 }
 0x123   :  { %v1460_v39 = vpop.eup %1459  ;;  %1485 = vrcp.f32 %v838_v33  ;;  %v836_v41 = vadd.f32 1.0, %v1458_v35  ;;  %v1272_v37 = vpop.f32.mrf.mxu0 }
 0x124   :  { %v1462_v45 = vpop.eup %1461  ;;  %1487 = vrcp.f32 %v870_v36  ;;  %v868_v46 = vadd.f32 1.0, %v1460_v39  ;;  %v484_v12 = vadd.f32 %v1272_v37, %v1764_v40 }
 0x125   :  { %v1464_v49 = vpop.eup %1463  ;;  %1026 = vst.msk [vmem:[%s2101_s3 + $0x50] sm:$0xff] %vm1015_vm0, %v1462_v45  ;;  %1489 = vrcp.f32 %v836_v41  ;;  %v1304_v41 = vpop.f32.mrf.mxu1 }
 0x126   :  { %v1466_v52 = vpop.eup %1465  ;;  %1058 = vst.msk [vmem:[%s2101_s3 + $0x150] sm:$0xff] %vm1015_vm0, %v1464_v49  ;;  %1491 = vrcp.f32 %v868_v46  ;;  %v475_v48 = vpop.f32.mrf.mxu0 }
 0x127   :  { %v1468_v56 = vpop.eup %1467  ;;  %1024 = vst.msk [vmem:[%s2101_s3 + $0x40] sm:$0xff] %vm1015_vm0, %v1466_v52  ;;  %1493 = vpow2.f32 %v1143_v42  ;;  %v603_v51 = vpop.f32.mrf.mxu1 }
 0x128   :  { %v1470_v60 = vpop.eup %1469  ;;  %1056 = vst.msk [vmem:[%s2101_s3 + $0x140] sm:$0xff] %vm1015_vm0, %v1468_v56  ;;  %1495 = vpow2.f32 %v1175_v47  ;;  %v1275_v58 = vpop.f32.mrf.mxu0 }
 0x129   :  { %v1472_v63 = vpop.eup %1471  ;;  %1027 = vst.msk [vmem:[%s2101_s3 + $0x58] sm:$0xff] %vm1015_vm0, %v1470_v60  ;;  %1497 = vpow2.f32 %v1141_v50  ;;  %v1307_v62 = vpop.f32.mrf.mxu1 }
 0x12a   :  { %v1474_v2 = vpop.eup %1473  ;;  %1059 = vst.msk [vmem:[%s2101_s3 + $0x158] sm:$0xff] %vm1015_vm0, %v1472_v63  ;;  %1499 = vpow2.f32 %v1173_v53  ;;  %v488_v8 = vpop.f32.mrf.mxu0 }
 0x12b   :  { %v1476_v6 = vpop.eup %1475  ;;  %1025 = vst.msk [vmem:[%s2101_s3 + $0x48] sm:$0xff] %vm1015_vm0, %v1474_v2  ;;  %1501 = vpow2.f32 %v1144_v57 }
 0x12c   :  { %v1478_v10 = vpop.eup %1477  ;;  %1057 = vst.msk [vmem:[%s2101_s3 + $0x148] sm:$0xff] %vm1015_vm0, %v1476_v6  ;;  %1503 = vpow2.f32 %v1176_v61  ;;  %v481_v61 = vadd.f32 %v1924_v19, %v1764_v40  ;;  %v1149_v19 = vmul.f32 -1.442695, %v473_v4 }
 0x12d   :  { %v1480_v13 = vpop.eup %1479  ;;  %1030 = vst.msk [vmem:[%s2101_s3 + $0x70] sm:$0xff] %vm1015_vm0, %v1478_v10  ;;  %1505 = vpow2.f32 %v1142_v0 }
 0x12e   :  { %v1482_v16 = vpop.eup %1481  ;;  %1062 = vst.msk [vmem:[%s2101_s3 + $0x170] sm:$0xff] %vm1015_vm0, %v1480_v13  ;;  %1507 = vpow2.f32 %v1174_v3  ;;  %v616_v13 = vpop.f32.mrf.mxu1 }
 0x12f   :  { %v1484_v20 = vpop.eup %1483  ;;  %1028 = vst.msk [vmem:[%s2101_s3 + $0x60] sm:$0xff] %vm1015_vm0, %v1482_v16  ;;  %1509 = vpow2.f32 %v1147_v7  ;;  %v601_v7 = vadd.f32 %v1764_v40, %v600_v31  ;;  %v1183_v16 = vmul.f32 -1.442695, %v609_v1  ;;  %v625_v31 = vadd.f32 %v1307_v62, %v1764_v40 }
 0x130   :  { %v1486_v23 = vpop.eup %1485  ;;  %1060 = vst.msk [vmem:[%s2101_s3 + $0x160] sm:$0xff] %vm1015_vm0, %v1484_v20  ;;  %1511 = vpow2.f32 %v1179_v11  ;;  %v1151_v11 = vmul.f32 -1.442695, %v481_v61  ;;  %v476_v20 = vadd.f32 %v1764_v40, %v475_v48  ;;  %v617_v37 = vadd.f32 %v1764_v40, %v616_v13 }
 0x131   :  { %v1488_v25 = vpop.eup %1487  ;;  %1031 = vst.msk [vmem:[%s2101_s3 + $0x78] sm:$0xff] %vm1015_vm0, %v1486_v23  ;;  %1513 = vpow2.f32 %v1145_v14  ;;  %v1181_v22 = vmul.f32 -1.442695, %v601_v7  ;;  %v604_v23 = vadd.f32 %v1764_v40, %v603_v51 }
 0x132   :  { %v1490_v27 = vpop.eup %1489  ;;  %1063 = vst.msk [vmem:[%s2101_s3 + $0x178] sm:$0xff] %vm1015_vm0, %v1488_v25  ;;  %1515 = vpow2.f32 %v1177_v17  ;;  %v612_v17 = vadd.f32 %v1304_v41, %v1764_v40  ;;  %v1185_v51 = vmul.f32 -1.442695, %v617_v37 }
 0x133   :  { %v1492_v30 = vpop.eup %1491  ;;  %1029 = vst.msk [vmem:[%s2101_s3 + $0x68] sm:$0xff] %vm1015_vm0, %v1490_v27  ;;  %1517 = vpow2.f32 %v1148_v21  ;;  %v497_v27 = vadd.f32 %v1275_v58, %v1764_v40 }
 0x134   :  { %v1494_v32 = vpop.eup %1493  ;;  %1061 = vst.msk [vmem:[%s2101_s3 + $0x168] sm:$0xff] %vm1015_vm0, %v1492_v30  ;;  %1519 = vpow2.f32 %v1180_v24  ;;  %v1276_v24 = vpop.f32.mrf.mxu0  ;;  %v1184_v30 = vmul.f32 -1.442695, %v612_v17 }
 0x135   :  { %v1496_v33 = vpop.eup %1495  ;;  %v841_v34 = vadd.f32 1.0, %v1494_v32  ;;  %1521 = vpow2.f32 %v1146_v26  ;;  %v1152_v26 = vmul.f32 -1.442695, %v484_v12  ;;  %v1155_v41 = vmul.f32 -1.442695, %v497_v27 }
 0x136   :  { %v1498_v35 = vpop.eup %1497  ;;  %v873_v36 = vadd.f32 1.0, %v1496_v33  ;;  %1523 = vpow2.f32 %v1178_v28  ;;  %v1308_v28 = vpop.f32.mrf.mxu1  ;;  %v1150_v33 = vmul.f32 -1.442695, %v476_v20 }
 0x137   :  { %v1500_v38 = vpop.eup %1499  ;;  %1525 = vrcp.f32 %v841_v34  ;;  %v839_v39 = vadd.f32 1.0, %v1498_v35  ;;  %v489_v34 = vadd.f32 %v1764_v40, %v488_v8 }
 0x138   :  { %v1502_v42 = vpop.eup %1501  ;;  %1527 = vrcp.f32 %v873_v36  ;;  %v871_v43 = vadd.f32 1.0, %v1500_v38  ;;  %v1182_v36 = vmul.f32 -1.442695, %v604_v23  ;;  %v491_v38 = vpop.f32.mrf.mxu0 }
 0x139   :  { %v1504_v44 = vpop.eup %1503  ;;  %1529 = vrcp.f32 %v839_v39  ;;  %v842_v45 = vadd.f32 1.0, %v1502_v42  ;;  %v500_v42 = vadd.f32 %v1276_v24, %v1764_v40  ;;  %v1153_v48 = vmul.f32 -1.442695, %v489_v34 }
 0x13a   :  { %v1506_v46 = vpop.eup %1505  ;;  %1531 = vrcp.f32 %v871_v43  ;;  %v874_v47 = vadd.f32 1.0, %v1504_v44  ;;  %v619_v43 = vpop.f32.mrf.mxu1 }
 0x13b   :  { %v1508_v49 = vpop.eup %1507  ;;  %1533 = vrcp.f32 %v842_v45  ;;  %v840_v50 = vadd.f32 1.0, %v1506_v46  ;;  %v1187_v45 = vmul.f32 -1.442695, %v625_v31  ;;  %v628_v46 = vadd.f32 %v1308_v28, %v1764_v40 }
 0x13c   :  { %v1510_v52 = vpop.eup %1509  ;;  %1535 = vrcp.f32 %v874_v47  ;;  %v872_v53 = vadd.f32 1.0, %v1508_v49  ;;  %v492_v49 = vadd.f32 %v1764_v40, %v491_v38 }
 0x13d   :  { %v1512_v54 = vpop.eup %1511  ;;  %1537 = vrcp.f32 %v840_v50  ;;  %v845_v55 = vadd.f32 1.0, %v1510_v52  ;;  %v620_v52 = vadd.f32 %v1764_v40, %v619_v43 }
 0x13e   :  { %v1514_v56 = vpop.eup %1513  ;;  %1539 = vrcp.f32 %v872_v53  ;;  %v877_v57 = vadd.f32 1.0, %v1512_v54  ;;  %v1156_v54 = vmul.f32 -1.442695, %v500_v42  ;;  %v1154_v40 = vmul.f32 -1.442695, %v492_v49 }
 0x13f   :  { %v1516_v59 = vpop.eup %1515  ;;  %1541 = vrcp.f32 %v845_v55  ;;  %v843_v60 = vadd.f32 1.0, %v1514_v56  ;;  %v1188_v56 = vmul.f32 -1.442695, %v628_v46 }
 0x140   :  { %v1518_v63 = vpop.eup %1517  ;;  %1543 = vrcp.f32 %v877_v57  ;;  %v875_v0 = vadd.f32 1.0, %v1516_v59  ;;  %v1186_v59 = vmul.f32 -1.442695, %v620_v52 }
 0x141   :  { %v1520_v2 = vpop.eup %1519  ;;  %1545 = vrcp.f32 %v843_v60  ;;  %v846_v3 = vadd.f32 1.0, %v1518_v63 }
 0x142   :  { %v1522_v5 = vpop.eup %1521  ;;  %1547 = vrcp.f32 %v875_v0  ;;  %v878_v6 = vadd.f32 1.0, %v1520_v2 }
 0x143   :  { %v1524_v9 = vpop.eup %1523  ;;  %1549 = vrcp.f32 %v846_v3  ;;  %v844_v10 = vadd.f32 1.0, %v1522_v5 }
 0x144   :  { %v1526_v14 = vpop.eup %1525  ;;  %1551 = vrcp.f32 %v878_v6  ;;  %v876_v15 = vadd.f32 1.0, %v1524_v9 }
 0x145   :  { %v1528_v18 = vpop.eup %1527  ;;  %1034 = vst.msk [vmem:[%s2101_s3 + $0x90] sm:$0xff] %vm1015_vm0, %v1526_v14  ;;  %1553 = vrcp.f32 %v844_v10 }
 0x146   :  { %v1530_v21 = vpop.eup %1529  ;;  %1066 = vst.msk [vmem:[%s2101_s3 + $0x190] sm:$0xff] %vm1015_vm0, %v1528_v18  ;;  %1555 = vrcp.f32 %v876_v15 }
 0x147   :  { %v1532_v25 = vpop.eup %1531  ;;  %1032 = vst.msk [vmem:[%s2101_s3 + $0x80] sm:$0xff] %vm1015_vm0, %v1530_v21  ;;  %1557 = vpow2.f32 %v1151_v11 }
 0x148   :  { %v1534_v29 = vpop.eup %1533  ;;  %1064 = vst.msk [vmem:[%s2101_s3 + $0x180] sm:$0xff] %vm1015_vm0, %v1532_v25  ;;  %1559 = vpow2.f32 %v1183_v16 }
 0x149   :  { %v1536_v32 = vpop.eup %1535  ;;  %1035 = vst.msk [vmem:[%s2101_s3 + $0x98] sm:$0xff] %vm1015_vm0, %v1534_v29  ;;  %1561 = vpow2.f32 %v1149_v19 }
 0x14a   :  { %v1538_v35 = vpop.eup %1537  ;;  %1067 = vst.msk [vmem:[%s2101_s3 + $0x198] sm:$0xff] %vm1015_vm0, %v1536_v32  ;;  %1563 = vpow2.f32 %v1181_v22 }
 0x14b   :  { %v1540_v39 = vpop.eup %1539  ;;  %1033 = vst.msk [vmem:[%s2101_s3 + $0x88] sm:$0xff] %vm1015_vm0, %v1538_v35  ;;  %1565 = vpow2.f32 %v1152_v26 }
 0x14c   :  { %v1542_v44 = vpop.eup %1541  ;;  %1065 = vst.msk [vmem:[%s2101_s3 + $0x188] sm:$0xff] %vm1015_vm0, %v1540_v39  ;;  %1567 = vpow2.f32 %v1184_v30 }
 0x14d   :  { %v1544_v47 = vpop.eup %1543  ;;  %1038 = vst.msk [vmem:[%s2101_s3 + $0xb0] sm:$0xff] %vm1015_vm0, %v1542_v44  ;;  %1569 = vpow2.f32 %v1150_v33 }
 0x14e   :  { %v1546_v50 = vpop.eup %1545  ;;  %1070 = vst.msk [vmem:[%s2101_s3 + $0x1b0] sm:$0xff] %vm1015_vm0, %v1544_v47  ;;  %1571 = vpow2.f32 %v1182_v36 }
 0x14f   :  { %v1548_v53 = vpop.eup %1547  ;;  %1036 = vst.msk [vmem:[%s2101_s3 + $0xa0] sm:$0xff] %vm1015_vm0, %v1546_v50  ;;  %1573 = vpow2.f32 %v1155_v41 }
 0x150   :  { %v1550_v55 = vpop.eup %1549  ;;  %1068 = vst.msk [vmem:[%s2101_s3 + $0x1a0] sm:$0xff] %vm1015_vm0, %v1548_v53  ;;  %1575 = vpow2.f32 %v1187_v45 }
 0x151   :  { %v1552_v57 = vpop.eup %1551  ;;  %1039 = vst.msk [vmem:[%s2101_s3 + $0xb8] sm:$0xff] %vm1015_vm0, %v1550_v55  ;;  %1577 = vpow2.f32 %v1153_v48 }
 0x152   :  { %v1554_v58 = vpop.eup %1553  ;;  %1071 = vst.msk [vmem:[%s2101_s3 + $0x1b8] sm:$0xff] %vm1015_vm0, %v1552_v57  ;;  %1579 = vpow2.f32 %v1185_v51 }
 0x153   :  { %v1556_v60 = vpop.eup %1555  ;;  %1037 = vst.msk [vmem:[%s2101_s3 + $0xa8] sm:$0xff] %vm1015_vm0, %v1554_v58  ;;  %1581 = vpow2.f32 %v1156_v54 }
 0x154   :  { %v1558_v61 = vpop.eup %1557  ;;  %1069 = vst.msk [vmem:[%s2101_s3 + $0x1a8] sm:$0xff] %vm1015_vm0, %v1556_v60  ;;  %1583 = vpow2.f32 %v1188_v56 }
 0x155   :  { %v1560_v62 = vpop.eup %1559  ;;  %v849_v63 = vadd.f32 1.0, %v1558_v61  ;;  %1585 = vpow2.f32 %v1154_v40 }
 0x156   :  { %v1562_v0 = vpop.eup %1561  ;;  %v881_v1 = vadd.f32 1.0, %v1560_v62  ;;  %1587 = vpow2.f32 %v1186_v59 }
 0x157   :  { %v1564_v2 = vpop.eup %1563  ;;  %1589 = vrcp.f32 %v849_v63  ;;  %v847_v3 = vadd.f32 1.0, %v1562_v0 }
 0x158   :  { %v1566_v4 = vpop.eup %1565  ;;  %1591 = vrcp.f32 %v881_v1  ;;  %v879_v5 = vadd.f32 1.0, %v1564_v2 }
 0x159   :  { %v1568_v6 = vpop.eup %1567  ;;  %1593 = vrcp.f32 %v847_v3  ;;  %v850_v7 = vadd.f32 1.0, %v1566_v4 }
 0x15a   :  { %v1570_v8 = vpop.eup %1569  ;;  %1595 = vrcp.f32 %v879_v5  ;;  %v882_v9 = vadd.f32 1.0, %v1568_v6 }
 0x15b   :  { %v1572_v10 = vpop.eup %1571  ;;  %1597 = vrcp.f32 %v850_v7  ;;  %v848_v11 = vadd.f32 1.0, %v1570_v8 }
 0x15c   :  { %v1574_v12 = vpop.eup %1573  ;;  %1599 = vrcp.f32 %v882_v9  ;;  %v880_v13 = vadd.f32 1.0, %v1572_v10 }
 0x15d   :  { %v1576_v14 = vpop.eup %1575  ;;  %1601 = vrcp.f32 %v848_v11  ;;  %v853_v15 = vadd.f32 1.0, %v1574_v12 }
 0x15e   :  { %v1578_v16 = vpop.eup %1577  ;;  %1603 = vrcp.f32 %v880_v13  ;;  %v885_v17 = vadd.f32 1.0, %v1576_v14 }
 0x15f   :  { %v1580_v18 = vpop.eup %1579  ;;  %1605 = vrcp.f32 %v853_v15  ;;  %v851_v19 = vadd.f32 1.0, %v1578_v16 }
 0x160   :  { %v1582_v20 = vpop.eup %1581  ;;  %1607 = vrcp.f32 %v885_v17  ;;  %v883_v21 = vadd.f32 1.0, %v1580_v18 }
 0x161   :  { %v1584_v22 = vpop.eup %1583  ;;  %1609 = vrcp.f32 %v851_v19  ;;  %v854_v23 = vadd.f32 1.0, %v1582_v20 }
 0x162   :  { %v1586_v24 = vpop.eup %1585  ;;  %1611 = vrcp.f32 %v883_v21  ;;  %v886_v25 = vadd.f32 1.0, %v1584_v22 }
 0x163   :  { %v1588_v26 = vpop.eup %1587  ;;  %1613 = vrcp.f32 %v854_v23  ;;  %v852_v27 = vadd.f32 1.0, %v1586_v24 }
 0x164   :  { %v1590_v28 = vpop.eup %1589  ;;  %1615 = vrcp.f32 %v886_v25  ;;  %v884_v29 = vadd.f32 1.0, %v1588_v26 }
 0x165   :  { %v1592_v30 = vpop.eup %1591  ;;  %1042 = vst.msk [vmem:[%s2101_s3 + $0xd0] sm:$0xff] %vm1015_vm0, %v1590_v28  ;;  %1617 = vrcp.f32 %v852_v27 }
 0x166   :  { %v1594_v31 = vpop.eup %1593  ;;  %1074 = vst.msk [vmem:[%s2101_s3 + $0x1d0] sm:$0xff] %vm1015_vm0, %v1592_v30  ;;  %1619 = vrcp.f32 %v884_v29 }
 0x167   :  { %v1596_v32 = vpop.eup %1595  ;;  %1040 = vst.msk [vmem:[%s2101_s3 + $0xc0] sm:$0xff] %vm1015_vm0, %v1594_v31 }
 0x168   :  { %v1598_v33 = vpop.eup %1597  ;;  %1072 = vst.msk [vmem:[%s2101_s3 + $0x1c0] sm:$0xff] %vm1015_vm0, %v1596_v32 }
 0x169   :  { %v1600_v34 = vpop.eup %1599  ;;  %1043 = vst.msk [vmem:[%s2101_s3 + $0xd8] sm:$0xff] %vm1015_vm0, %v1598_v33 }
 0x16a   :  { %v1602_v35 = vpop.eup %1601  ;;  %1075 = vst.msk [vmem:[%s2101_s3 + $0x1d8] sm:$0xff] %vm1015_vm0, %v1600_v34 }
 0x16b   :  { %v1604_v36 = vpop.eup %1603  ;;  %1041 = vst.msk [vmem:[%s2101_s3 + $0xc8] sm:$0xff] %vm1015_vm0, %v1602_v35 }
 0x16c   :  { %v1606_v37 = vpop.eup %1605  ;;  %1073 = vst.msk [vmem:[%s2101_s3 + $0x1c8] sm:$0xff] %vm1015_vm0, %v1604_v36 }
 0x16d   :  { %v1608_v38 = vpop.eup %1607  ;;  %1046 = vst.msk [vmem:[%s2101_s3 + $0xf0] sm:$0xff] %vm1015_vm0, %v1606_v37 }
 0x16e   :  { %v1610_v39 = vpop.eup %1609  ;;  %1078 = vst.msk [vmem:[%s2101_s3 + $0x1f0] sm:$0xff] %vm1015_vm0, %v1608_v38 }
 0x16f   :  { %v1612_v41 = vpop.eup %1611  ;;  %1044 = vst.msk [vmem:[%s2101_s3 + $0xe0] sm:$0xff] %vm1015_vm0, %v1610_v39 }
 0x170   :  { %v1614_v42 = vpop.eup %1613  ;;  %1076 = vst.msk [vmem:[%s2101_s3 + $0x1e0] sm:$0xff] %vm1015_vm0, %v1612_v41 }
 0x171   :  { %v1616_v43 = vpop.eup %1615  ;;  %1047 = vst.msk [vmem:[%s2101_s3 + $0xf8] sm:$0xff] %vm1015_vm0, %v1614_v42 }
 0x172   :  { %v1618_v44 = vpop.eup %1617  ;;  %1079 = vst.msk [vmem:[%s2101_s3 + $0x1f8] sm:$0xff] %vm1015_vm0, %v1616_v43 }
 0x173   :  { %v1620_v45 = vpop.eup %1619  ;;  %1045 = vst.msk [vmem:[%s2101_s3 + $0xe8] sm:$0xff] %vm1015_vm0, %v1618_v44 }
 0x174   :  { %1077 = vst.msk [vmem:[%s2101_s3 + $0x1e8] sm:$0xff] %vm1015_vm0, %v1620_v45 }

</bundles_post_ra>
